<compile_context>
chip_gen: v7x
topology: tpu7x:2x2x1
jax: 0.10.0
libtpu: 0.0.40
codegen_flags: <defaults>
</compile_context>

<pallas_src>
import functools

import jax
import jax.numpy as jnp
from jax.experimental import pallas as pl
from jax.experimental.pallas import tpu as pltpu


def _pick_row_tile(H, W, target_rows=128):
    """Largest divisor TH of H with TH * W <= target_rows (fallback 1)."""
    th = 1
    for cand in range(1, H + 1):
        if H % cand == 0 and cand * W <= target_rows:
            th = cand
    return th


def _convlstm_kernel(x_ref, h_ref, c_ref, w_ref, b_ref,
                     h_out_ref, c_out_ref,
                     xpad_ref, hpad_ref, pcol_ref,
                     *, H, W, KH, KW, Cx, hidden, TH):
    """One batch element per grid step.

    x_ref   : (1, H, W, Cx)                      f32 input frame
    h_ref   : (1, H, W, hidden)                  f32 current hidden state
    c_ref   : (1, H, W, hidden)                  f32 current cell state
    w_ref   : (KH*KW*(Cx+hidden), 4*hidden)      bf16 im2col-ordered weights
    b_ref   : (1, 4*hidden)                      f32 conv bias
    outputs : (1, H, W, hidden)                  f32 h_next, c_next
    scratch : xpad (Hp, Wp, Cx) f32, hpad (Hp, Wp, hidden) f32,
              pcol (H*W, KH*KW*(Cx+hidden)) bf16
    """
    ph, pw = KH // 2, KW // 2
    HW = H * W
    XK = KH * KW * Cx                      # number of x-part im2col columns

    # 1) Stage zero-padded inputs in VMEM (halo handled on-chip, no HBM
    #    pad/concat).  Zeroing every step keeps this correct even when the
    #    "parallel" grid axis is sharded across TensorCores.
    xpad_ref[...] = jnp.zeros_like(xpad_ref)
    hpad_ref[...] = jnp.zeros_like(hpad_ref)
    xpad_ref[ph:ph + H, pw:pw + W, :] = x_ref[0]
    hpad_ref[ph:ph + H, pw:pw + W, :] = h_ref[0]

    # 2) im2col: fuse all KH*KW taps (and the x/h channel split) into a single
    #    contraction axis of depth KH*KW*(Cx+hidden).
    for kh in range(KH):
        for kw in range(KW):
            t = kh * KW + kw
            xp = xpad_ref[kh:kh + H, kw:kw + W, :]              # (H, W, Cx)
            pcol_ref[:, t * Cx:(t + 1) * Cx] = (
                xp.reshape(HW, Cx).astype(jnp.bfloat16))
            hp = hpad_ref[kh:kh + H, kw:kw + W, :]              # (H, W, hidden)
            pcol_ref[:, XK + t * hidden:XK + (t + 1) * hidden] = (
                hp.reshape(HW, hidden).astype(jnp.bfloat16))

    bias = b_ref[...]                                           # (1, 4*hidden)

    # 3) Chunked deep matmul + gate math.  TH rows of H per chunk bounds the
    #    live f32 accumulator (~TH*W x 4*hidden) and gate temporaries.
    #    NOTE: outputs are written in (W, hidden) minor layout; a fully
    #    lane-dense (W*hidden)-fused output was deliberately not used to keep
    #    only last-dim-preserving reshapes inside the kernel.
    TM = TH * W
    for ci in range(H // TH):
        r0 = ci * TM
        y0 = ci * TH
        patch = pcol_ref[r0:r0 + TM, :]                         # (TM, K) bf16
        acc = jnp.dot(patch, w_ref[...],
                      preferred_element_type=jnp.float32)       # (TM, 4*hidden)
        acc = acc + bias

        sig = jax.nn.sigmoid(acc[:, :3 * hidden])               # i | f | o
        g = jnp.tanh(acc[:, 3 * hidden:])
        i = sig[:, 0 * hidden:1 * hidden]
        f = sig[:, 1 * hidden:2 * hidden]
        o = sig[:, 2 * hidden:3 * hidden]

        c_cur = c_ref[0, y0:y0 + TH, :, :].reshape(TM, hidden)
        c_next = f * c_cur + i * g
        h_next = o * jnp.tanh(c_next)

        c_out_ref[0, y0:y0 + TH, :, :] = c_next.reshape(TH, W, hidden)
        h_out_ref[0, y0:y0 + TH, :, :] = h_next.reshape(TH, W, hidden)


@functools.partial(jax.jit, static_argnames=("kernel_size",))
def conv_lstm_cell(x, h_cur, c_cur, weight, bias, kernel_size):
    """ConvLSTMCell forward.

    x      : (B, H, W, input_dim)   float32, NHWC
    h_cur  : (B, H, W, hidden_dim)
    c_cur  : (B, H, W, hidden_dim)
    weight : (KH, KW, input_dim + hidden_dim, 4*hidden_dim)  HWIO
    bias   : (4*hidden_dim,)
    returns (h_next, c_next), each (B, H, W, hidden_dim)
    """
    KH, KW = kernel_size
    assert KH % 2 == 1 and KW % 2 == 1, "odd kernel sizes only (matches module)"
    B, H, W, Cx = x.shape
    hidden = h_cur.shape[-1]
    C4 = 4 * hidden
    Kc = KH * KW * (Cx + hidden)
    ph, pw = KH // 2, KW // 2
    Hp, Wp = H + 2 * ph, W + 2 * pw

    # One-time parameter prep (cached in a real model): split the weight into
    # x-part / h-part so the kernel never channel-concats, flatten to the
    # kernel's im2col column order, and cast to bf16 for native MXU throughput.
    w_x = weight[:, :, :Cx, :].reshape(KH * KW * Cx, C4)
    w_h = weight[:, :, Cx:, :].reshape(KH * KW * hidden, C4)
    wmat = jnp.concatenate([w_x, w_h], axis=0).astype(jnp.bfloat16)   # (Kc, C4)
    bias2d = bias.reshape(1, C4).astype(jnp.float32)

    TH = _pick_row_tile(H, W)

    kernel = functools.partial(_convlstm_kernel, H=H, W=W, KH=KH, KW=KW,
                               Cx=Cx, hidden=hidden, TH=TH)
    out_shape = jax.ShapeDtypeStruct((B, H, W, hidden), jnp.float32)
    h_next, c_next = pl.pallas_call(
        kernel,
        out_shape=(out_shape, out_shape),
        grid_spec=pltpu.PrefetchScalarGridSpec(
            num_scalar_prefetch=0,
            grid=(B,),
            in_specs=[
                pl.BlockSpec((1, H, W, Cx), lambda b: (b, 0, 0, 0)),
                pl.BlockSpec((1, H, W, hidden), lambda b: (b, 0, 0, 0)),
                pl.BlockSpec((1, H, W, hidden), lambda b: (b, 0, 0, 0)),
                pl.BlockSpec((Kc, C4), lambda b: (0, 0)),   # resident weights
                pl.BlockSpec((1, C4), lambda b: (0, 0)),
            ],
            out_specs=[
                pl.BlockSpec((1, H, W, hidden), lambda b: (b, 0, 0, 0)),
                pl.BlockSpec((1, H, W, hidden), lambda b: (b, 0, 0, 0)),
            ],
            scratch_shapes=[
                pltpu.VMEM((Hp, Wp, Cx), jnp.float32),
                pltpu.VMEM((Hp, Wp, hidden), jnp.float32),
                pltpu.VMEM((H * W, Kc), jnp.bfloat16),
            ],
        ),
        compiler_params=pltpu.CompilerParams(
            dimension_semantics=("parallel",)),
    )(x, h_cur, c_cur, wmat, bias2d)
    return h_next, c_next


def _gates(cc, c_cur, hidden):
    cc_i, cc_f, cc_o, cc_g = jnp.split(cc, 4, axis=-1)
    i = jax.nn.sigmoid(cc_i)
    f = jax.nn.sigmoid(cc_f)
    o = jax.nn.sigmoid(cc_o)
    g = jnp.tanh(cc_g)
    c_next = f * c_cur + i * g
    h_next = o * jnp.tanh(c_next)
    return h_next, c_next


def conv_lstm_cell_reference(x, h_cur, c_cur, weight, bias):
    """Pure-JAX f32 reference (same semantics as the PyTorch module)."""
    combined = jnp.concatenate([x, h_cur], axis=-1)
    cc = jax.lax.conv_general_dilated(
        combined, weight, window_strides=(1, 1), padding="SAME",
        dimension_numbers=("NHWC", "HWIO", "NHWC"))
    return _gates(cc + bias, c_cur, h_cur.shape[-1])


def conv_lstm_cell_reference_bf16(x, h_cur, c_cur, weight, bias):
    """Reference with the same bf16 operand rounding as the kernel's MXU path."""
    combined = jnp.concatenate([x, h_cur], axis=-1).astype(jnp.bfloat16)
    cc = jax.lax.conv_general_dilated(
        combined, weight.astype(jnp.bfloat16), window_strides=(1, 1),
        padding="SAME", dimension_numbers=("NHWC", "HWIO", "NHWC"),
        preferred_element_type=jnp.float32)
    return _gates(cc + bias, c_cur, h_cur.shape[-1])


if __name__ == "__main__":
    # Small shapes consistent with the module's forward.
    B, H, W = 2, 16, 16
    input_dim, hidden_dim = 4, 32
    kernel_size = (3, 3)
    KH, KW = kernel_size
    Cin = input_dim + hidden_dim

    key = jax.random.PRNGKey(0)
    kx, kh_, kc, kw_, kb = jax.random.split(key, 5)

    x = jax.random.normal(kx, (B, H, W, input_dim), dtype=jnp.float32)
    h_cur = jax.random.normal(kh_, (B, H, W, hidden_dim), dtype=jnp.float32)
    c_cur = jax.random.normal(kc, (B, H, W, hidden_dim), dtype=jnp.float32)

    # Deterministic synthetic parameters (PyTorch shape (4*hidden, Cin, KH, KW);
    # stored here directly in HWIO layout).
    weight = 0.05 * jax.random.normal(
        kw_, (KH, KW, Cin, 4 * hidden_dim), dtype=jnp.float32)
    bias = 0.05 * jax.random.normal(kb, (4 * hidden_dim,), dtype=jnp.float32)

    h_next, c_next = conv_lstm_cell(x, h_cur, c_cur, weight, bias, kernel_size)
    jax.block_until_ready((h_next, c_next))

    # Semantic check vs the f32 module (loose: kernel uses bf16 MXU operands).
    h_ref, c_ref = conv_lstm_cell_reference(x, h_cur, c_cur, weight, bias)
    assert jnp.allclose(h_next, h_ref, atol=6e-2, rtol=6e-2)
    assert jnp.allclose(c_next, c_ref, atol=6e-2, rtol=6e-2)

    # Tight check vs a reference with identical bf16 operand rounding.
    h_r16, c_r16 = conv_lstm_cell_reference_bf16(x, h_cur, c_cur, weight, bias)
    assert jnp.allclose(h_next, h_r16, atol=5e-3, rtol=5e-3)
    assert jnp.allclose(c_next, c_r16, atol=5e-3, rtol=5e-3)

    print("KERNEL_OK")
</pallas_src>

<mosaic_0001>
module attributes {stable_mosaic.version = 11 : i64} {
  func.func @_convlstm_kernel(%arg0: i32, %arg1: memref<1x16x16x4xf32, #tpu.memory_space<vmem>>, %arg2: memref<1x16x16x32xf32, #tpu.memory_space<vmem>>, %arg3: memref<1x16x16x32xf32, #tpu.memory_space<vmem>>, %arg4: memref<324x128xbf16, #tpu.memory_space<vmem>>, %arg5: memref<1x128xf32, #tpu.memory_space<vmem>>, %arg6: memref<1x16x16x32xf32, #tpu.memory_space<vmem>>, %arg7: memref<1x16x16x32xf32, #tpu.memory_space<vmem>>, %arg8: memref<18x18x4xf32, #tpu.memory_space<vmem>>, %arg9: memref<18x18x32xf32, #tpu.memory_space<vmem>>, %arg10: memref<256x324xbf16, #tpu.memory_space<vmem>>) attributes {dimension_semantics = [#tpu.dimension_semantics<parallel>], iteration_bounds = array<i64: 2>, scalar_prefetch = 0 : i64, scratch_operands = 3 : i64, tpu.core_type = #tpu.core_type<tc>, window_params = [{transform_indices = @transform_0, window_bounds = array<i64: 1, 16, 16, 4>}, {transform_indices = @transform_1, window_bounds = array<i64: 1, 16, 16, 32>}, {transform_indices = @transform_2, window_bounds = array<i64: 1, 16, 16, 32>}, {pipeline_mode = #tpu.pipeline_mode<synchronous>, transform_indices = @transform_3, window_bounds = array<i64: 324, 128>}, {pipeline_mode = #tpu.pipeline_mode<synchronous>, transform_indices = @transform_4, window_bounds = array<i64: 1, 128>}, {transform_indices = @transform_5, window_bounds = array<i64: 1, 16, 16, 32>}, {transform_indices = @transform_6, window_bounds = array<i64: 1, 16, 16, 32>}]} {
    %cst = arith.constant 0.000000e+00 : f32
    %0 = vector.broadcast %cst : f32 to vector<18x18x4xf32>
    %c0 = arith.constant 0 : index
    %c0_0 = arith.constant 0 : index
    %c0_1 = arith.constant 0 : index
    %1 = vector.load %arg8[%c0, %c0_0, %c0_1] : memref<18x18x4xf32, #tpu.memory_space<vmem>>, vector<18x18x4xf32>
    tpu.vector_store %arg8[%c0, %c0_0, %c0_1], %0 {strides = array<i32>} : memref<18x18x4xf32, #tpu.memory_space<vmem>>, vector<18x18x4xf32>,
    %cst_2 = arith.constant 0.000000e+00 : f32
    %2 = vector.broadcast %cst_2 : f32 to vector<18x18x32xf32>
    %c0_3 = arith.constant 0 : index
    %c0_4 = arith.constant 0 : index
    %c0_5 = arith.constant 0 : index
    %3 = vector.load %arg9[%c0_3, %c0_4, %c0_5] : memref<18x18x32xf32, #tpu.memory_space<vmem>>, vector<18x18x32xf32>
    tpu.vector_store %arg9[%c0_3, %c0_4, %c0_5], %2 {strides = array<i32>} : memref<18x18x32xf32, #tpu.memory_space<vmem>>, vector<18x18x32xf32>,
    %c0_6 = arith.constant 0 : index
    %c0_7 = arith.constant 0 : index
    %c0_8 = arith.constant 0 : index
    %c0_9 = arith.constant 0 : index
    %4 = vector.load %arg1[%c0_6, %c0_7, %c0_8, %c0_9] : memref<1x16x16x4xf32, #tpu.memory_space<vmem>>, vector<1x16x16x4xf32>
    %5 = vector.shape_cast %4 : vector<1x16x16x4xf32> to vector<16x16x4xf32>
    %c1 = arith.constant 1 : index
    %c1_10 = arith.constant 1 : index
    %c0_11 = arith.constant 0 : index
    %6 = vector.load %arg8[%c1, %c1_10, %c0_11] : memref<18x18x4xf32, #tpu.memory_space<vmem>>, vector<16x16x4xf32>
    tpu.vector_store %arg8[%c1, %c1_10, %c0_11], %5 {strides = array<i32>} : memref<18x18x4xf32, #tpu.memory_space<vmem>>, vector<16x16x4xf32>,
    %c0_12 = arith.constant 0 : index
    %c0_13 = arith.constant 0 : index
    %c0_14 = arith.constant 0 : index
    %c0_15 = arith.constant 0 : index
    %7 = vector.load %arg2[%c0_12, %c0_13, %c0_14, %c0_15] : memref<1x16x16x32xf32, #tpu.memory_space<vmem>>, vector<1x16x16x32xf32>
    %8 = vector.shape_cast %7 : vector<1x16x16x32xf32> to vector<16x16x32xf32>
    %c1_16 = arith.constant 1 : index
    %c1_17 = arith.constant 1 : index
    %c0_18 = arith.constant 0 : index
    %9 = vector.load %arg9[%c1_16, %c1_17, %c0_18] : memref<18x18x32xf32, #tpu.memory_space<vmem>>, vector<16x16x32xf32>
    tpu.vector_store %arg9[%c1_16, %c1_17, %c0_18], %8 {strides = array<i32>} : memref<18x18x32xf32, #tpu.memory_space<vmem>>, vector<16x16x32xf32>,
    %c0_19 = arith.constant 0 : index
    %c0_20 = arith.constant 0 : index
    %c0_21 = arith.constant 0 : index
    %10 = vector.load %arg8[%c0_19, %c0_20, %c0_21] : memref<18x18x4xf32, #tpu.memory_space<vmem>>, vector<16x16x4xf32>
    %11 = vector.shape_cast %10 : vector<16x16x4xf32> to vector<256x4xf32>
    %12 = arith.truncf %11 : vector<256x4xf32> to vector<256x4xbf16>
    %c0_22 = arith.constant 0 : index
    %c0_23 = arith.constant 0 : index
    %13 = vector.load %arg10[%c0_22, %c0_23] : memref<256x324xbf16, #tpu.memory_space<vmem>>, vector<256x4xbf16>
    tpu.vector_store %arg10[%c0_22, %c0_23], %12 {strides = array<i32>} : memref<256x324xbf16, #tpu.memory_space<vmem>>, vector<256x4xbf16>,
    %c0_24 = arith.constant 0 : index
    %c0_25 = arith.constant 0 : index
    %c0_26 = arith.constant 0 : index
    %14 = vector.load %arg9[%c0_24, %c0_25, %c0_26] : memref<18x18x32xf32, #tpu.memory_space<vmem>>, vector<16x16x32xf32>
    %15 = vector.shape_cast %14 : vector<16x16x32xf32> to vector<256x32xf32>
    %16 = arith.truncf %15 : vector<256x32xf32> to vector<256x32xbf16>
    %c0_27 = arith.constant 0 : index
    %c36 = arith.constant 36 : index
    %17 = vector.load %arg10[%c0_27, %c36] : memref<256x324xbf16, #tpu.memory_space<vmem>>, vector<256x32xbf16>
    tpu.vector_store %arg10[%c0_27, %c36], %16 {strides = array<i32>} : memref<256x324xbf16, #tpu.memory_space<vmem>>, vector<256x32xbf16>,
    %c0_28 = arith.constant 0 : index
    %c1_29 = arith.constant 1 : index
    %c0_30 = arith.constant 0 : index
    %18 = vector.load %arg8[%c0_28, %c1_29, %c0_30] : memref<18x18x4xf32, #tpu.memory_space<vmem>>, vector<16x16x4xf32>
    %19 = vector.shape_cast %18 : vector<16x16x4xf32> to vector<256x4xf32>
    %20 = arith.truncf %19 : vector<256x4xf32> to vector<256x4xbf16>
    %c0_31 = arith.constant 0 : index
    %c4 = arith.constant 4 : index
    %21 = vector.load %arg10[%c0_31, %c4] : memref<256x324xbf16, #tpu.memory_space<vmem>>, vector<256x4xbf16>
    tpu.vector_store %arg10[%c0_31, %c4], %20 {strides = array<i32>} : memref<256x324xbf16, #tpu.memory_space<vmem>>, vector<256x4xbf16>,
    %c0_32 = arith.constant 0 : index
    %c1_33 = arith.constant 1 : index
    %c0_34 = arith.constant 0 : index
    %22 = vector.load %arg9[%c0_32, %c1_33, %c0_34] : memref<18x18x32xf32, #tpu.memory_space<vmem>>, vector<16x16x32xf32>
    %23 = vector.shape_cast %22 : vector<16x16x32xf32> to vector<256x32xf32>
    %24 = arith.truncf %23 : vector<256x32xf32> to vector<256x32xbf16>
    %c0_35 = arith.constant 0 : index
    %c68 = arith.constant 68 : index
    %25 = vector.load %arg10[%c0_35, %c68] : memref<256x324xbf16, #tpu.memory_space<vmem>>, vector<256x32xbf16>
    tpu.vector_store %arg10[%c0_35, %c68], %24 {strides = array<i32>} : memref<256x324xbf16, #tpu.memory_space<vmem>>, vector<256x32xbf16>,
    %c0_36 = arith.constant 0 : index
    %c2 = arith.constant 2 : index
    %c0_37 = arith.constant 0 : index
    %26 = vector.load %arg8[%c0_36, %c2, %c0_37] : memref<18x18x4xf32, #tpu.memory_space<vmem>>, vector<16x16x4xf32>
    %27 = vector.shape_cast %26 : vector<16x16x4xf32> to vector<256x4xf32>
    %28 = arith.truncf %27 : vector<256x4xf32> to vector<256x4xbf16>
    %c0_38 = arith.constant 0 : index
    %c8 = arith.constant 8 : index
    %29 = vector.load %arg10[%c0_38, %c8] : memref<256x324xbf16, #tpu.memory_space<vmem>>, vector<256x4xbf16>
    tpu.vector_store %arg10[%c0_38, %c8], %28 {strides = array<i32>} : memref<256x324xbf16, #tpu.memory_space<vmem>>, vector<256x4xbf16>,
    %c0_39 = arith.constant 0 : index
    %c2_40 = arith.constant 2 : index
    %c0_41 = arith.constant 0 : index
    %30 = vector.load %arg9[%c0_39, %c2_40, %c0_41] : memref<18x18x32xf32, #tpu.memory_space<vmem>>, vector<16x16x32xf32>
    %31 = vector.shape_cast %30 : vector<16x16x32xf32> to vector<256x32xf32>
    %32 = arith.truncf %31 : vector<256x32xf32> to vector<256x32xbf16>
    %c0_42 = arith.constant 0 : index
    %c100 = arith.constant 100 : index
    %33 = vector.load %arg10[%c0_42, %c100] : memref<256x324xbf16, #tpu.memory_space<vmem>>, vector<256x32xbf16>
    tpu.vector_store %arg10[%c0_42, %c100], %32 {strides = array<i32>} : memref<256x324xbf16, #tpu.memory_space<vmem>>, vector<256x32xbf16>,
    %c1_43 = arith.constant 1 : index
    %c0_44 = arith.constant 0 : index
    %c0_45 = arith.constant 0 : index
    %34 = vector.load %arg8[%c1_43, %c0_44, %c0_45] : memref<18x18x4xf32, #tpu.memory_space<vmem>>, vector<16x16x4xf32>
    %35 = vector.shape_cast %34 : vector<16x16x4xf32> to vector<256x4xf32>
    %36 = arith.truncf %35 : vector<256x4xf32> to vector<256x4xbf16>
    %c0_46 = arith.constant 0 : index
    %c12 = arith.constant 12 : index
    %37 = vector.load %arg10[%c0_46, %c12] : memref<256x324xbf16, #tpu.memory_space<vmem>>, vector<256x4xbf16>
    tpu.vector_store %arg10[%c0_46, %c12], %36 {strides = array<i32>} : memref<256x324xbf16, #tpu.memory_space<vmem>>, vector<256x4xbf16>,
    %c1_47 = arith.constant 1 : index
    %c0_48 = arith.constant 0 : index
    %c0_49 = arith.constant 0 : index
    %38 = vector.load %arg9[%c1_47, %c0_48, %c0_49] : memref<18x18x32xf32, #tpu.memory_space<vmem>>, vector<16x16x32xf32>
    %39 = vector.shape_cast %38 : vector<16x16x32xf32> to vector<256x32xf32>
    %40 = arith.truncf %39 : vector<256x32xf32> to vector<256x32xbf16>
    %c0_50 = arith.constant 0 : index
    %c132 = arith.constant 132 : index
    %41 = vector.load %arg10[%c0_50, %c132] : memref<256x324xbf16, #tpu.memory_space<vmem>>, vector<256x32xbf16>
    tpu.vector_store %arg10[%c0_50, %c132], %40 {strides = array<i32>} : memref<256x324xbf16, #tpu.memory_space<vmem>>, vector<256x32xbf16>,
    %c1_51 = arith.constant 1 : index
    %c1_52 = arith.constant 1 : index
    %c0_53 = arith.constant 0 : index
    %42 = vector.load %arg8[%c1_51, %c1_52, %c0_53] : memref<18x18x4xf32, #tpu.memory_space<vmem>>, vector<16x16x4xf32>
    %43 = vector.shape_cast %42 : vector<16x16x4xf32> to vector<256x4xf32>
    %44 = arith.truncf %43 : vector<256x4xf32> to vector<256x4xbf16>
    %c0_54 = arith.constant 0 : index
    %c16 = arith.constant 16 : index
    %45 = vector.load %arg10[%c0_54, %c16] : memref<256x324xbf16, #tpu.memory_space<vmem>>, vector<256x4xbf16>
    tpu.vector_store %arg10[%c0_54, %c16], %44 {strides = array<i32>} : memref<256x324xbf16, #tpu.memory_space<vmem>>, vector<256x4xbf16>,
    %c1_55 = arith.constant 1 : index
    %c1_56 = arith.constant 1 : index
    %c0_57 = arith.constant 0 : index
    %46 = vector.load %arg9[%c1_55, %c1_56, %c0_57] : memref<18x18x32xf32, #tpu.memory_space<vmem>>, vector<16x16x32xf32>
    %47 = vector.shape_cast %46 : vector<16x16x32xf32> to vector<256x32xf32>
    %48 = arith.truncf %47 : vector<256x32xf32> to vector<256x32xbf16>
    %c0_58 = arith.constant 0 : index
    %c164 = arith.constant 164 : index
    %49 = vector.load %arg10[%c0_58, %c164] : memref<256x324xbf16, #tpu.memory_space<vmem>>, vector<256x32xbf16>
    tpu.vector_store %arg10[%c0_58, %c164], %48 {strides = array<i32>} : memref<256x324xbf16, #tpu.memory_space<vmem>>, vector<256x32xbf16>,
    %c1_59 = arith.constant 1 : index
    %c2_60 = arith.constant 2 : index
    %c0_61 = arith.constant 0 : index
    %50 = vector.load %arg8[%c1_59, %c2_60, %c0_61] : memref<18x18x4xf32, #tpu.memory_space<vmem>>, vector<16x16x4xf32>
    %51 = vector.shape_cast %50 : vector<16x16x4xf32> to vector<256x4xf32>
    %52 = arith.truncf %51 : vector<256x4xf32> to vector<256x4xbf16>
    %c0_62 = arith.constant 0 : index
    %c20 = arith.constant 20 : index
    %53 = vector.load %arg10[%c0_62, %c20] : memref<256x324xbf16, #tpu.memory_space<vmem>>, vector<256x4xbf16>
    tpu.vector_store %arg10[%c0_62, %c20], %52 {strides = array<i32>} : memref<256x324xbf16, #tpu.memory_space<vmem>>, vector<256x4xbf16>,
    %c1_63 = arith.constant 1 : index
    %c2_64 = arith.constant 2 : index
    %c0_65 = arith.constant 0 : index
    %54 = vector.load %arg9[%c1_63, %c2_64, %c0_65] : memref<18x18x32xf32, #tpu.memory_space<vmem>>, vector<16x16x32xf32>
    %55 = vector.shape_cast %54 : vector<16x16x32xf32> to vector<256x32xf32>
    %56 = arith.truncf %55 : vector<256x32xf32> to vector<256x32xbf16>
    %c0_66 = arith.constant 0 : index
    %c196 = arith.constant 196 : index
    %57 = vector.load %arg10[%c0_66, %c196] : memref<256x324xbf16, #tpu.memory_space<vmem>>, vector<256x32xbf16>
    tpu.vector_store %arg10[%c0_66, %c196], %56 {strides = array<i32>} : memref<256x324xbf16, #tpu.memory_space<vmem>>, vector<256x32xbf16>,
    %c2_67 = arith.constant 2 : index
    %c0_68 = arith.constant 0 : index
    %c0_69 = arith.constant 0 : index
    %58 = vector.load %arg8[%c2_67, %c0_68, %c0_69] : memref<18x18x4xf32, #tpu.memory_space<vmem>>, vector<16x16x4xf32>
    %59 = vector.shape_cast %58 : vector<16x16x4xf32> to vector<256x4xf32>
    %60 = arith.truncf %59 : vector<256x4xf32> to vector<256x4xbf16>
    %c0_70 = arith.constant 0 : index
    %c24 = arith.constant 24 : index
    %61 = vector.load %arg10[%c0_70, %c24] : memref<256x324xbf16, #tpu.memory_space<vmem>>, vector<256x4xbf16>
    tpu.vector_store %arg10[%c0_70, %c24], %60 {strides = array<i32>} : memref<256x324xbf16, #tpu.memory_space<vmem>>, vector<256x4xbf16>,
    %c2_71 = arith.constant 2 : index
    %c0_72 = arith.constant 0 : index
    %c0_73 = arith.constant 0 : index
    %62 = vector.load %arg9[%c2_71, %c0_72, %c0_73] : memref<18x18x32xf32, #tpu.memory_space<vmem>>, vector<16x16x32xf32>
    %63 = vector.shape_cast %62 : vector<16x16x32xf32> to vector<256x32xf32>
    %64 = arith.truncf %63 : vector<256x32xf32> to vector<256x32xbf16>
    %c0_74 = arith.constant 0 : index
    %c228 = arith.constant 228 : index
    %65 = vector.load %arg10[%c0_74, %c228] : memref<256x324xbf16, #tpu.memory_space<vmem>>, vector<256x32xbf16>
    tpu.vector_store %arg10[%c0_74, %c228], %64 {strides = array<i32>} : memref<256x324xbf16, #tpu.memory_space<vmem>>, vector<256x32xbf16>,
    %c2_75 = arith.constant 2 : index
    %c1_76 = arith.constant 1 : index
    %c0_77 = arith.constant 0 : index
    %66 = vector.load %arg8[%c2_75, %c1_76, %c0_77] : memref<18x18x4xf32, #tpu.memory_space<vmem>>, vector<16x16x4xf32>
    %67 = vector.shape_cast %66 : vector<16x16x4xf32> to vector<256x4xf32>
    %68 = arith.truncf %67 : vector<256x4xf32> to vector<256x4xbf16>
    %c0_78 = arith.constant 0 : index
    %c28 = arith.constant 28 : index
    %69 = vector.load %arg10[%c0_78, %c28] : memref<256x324xbf16, #tpu.memory_space<vmem>>, vector<256x4xbf16>
    tpu.vector_store %arg10[%c0_78, %c28], %68 {strides = array<i32>} : memref<256x324xbf16, #tpu.memory_space<vmem>>, vector<256x4xbf16>,
    %c2_79 = arith.constant 2 : index
    %c1_80 = arith.constant 1 : index
    %c0_81 = arith.constant 0 : index
    %70 = vector.load %arg9[%c2_79, %c1_80, %c0_81] : memref<18x18x32xf32, #tpu.memory_space<vmem>>, vector<16x16x32xf32>
    %71 = vector.shape_cast %70 : vector<16x16x32xf32> to vector<256x32xf32>
    %72 = arith.truncf %71 : vector<256x32xf32> to vector<256x32xbf16>
    %c0_82 = arith.constant 0 : index
    %c260 = arith.constant 260 : index
    %73 = vector.load %arg10[%c0_82, %c260] : memref<256x324xbf16, #tpu.memory_space<vmem>>, vector<256x32xbf16>
    tpu.vector_store %arg10[%c0_82, %c260], %72 {strides = array<i32>} : memref<256x324xbf16, #tpu.memory_space<vmem>>, vector<256x32xbf16>,
    %c2_83 = arith.constant 2 : index
    %c2_84 = arith.constant 2 : index
    %c0_85 = arith.constant 0 : index
    %74 = vector.load %arg8[%c2_83, %c2_84, %c0_85] : memref<18x18x4xf32, #tpu.memory_space<vmem>>, vector<16x16x4xf32>
    %75 = vector.shape_cast %74 : vector<16x16x4xf32> to vector<256x4xf32>
    %76 = arith.truncf %75 : vector<256x4xf32> to vector<256x4xbf16>
    %c0_86 = arith.constant 0 : index
    %c32 = arith.constant 32 : index
    %77 = vector.load %arg10[%c0_86, %c32] : memref<256x324xbf16, #tpu.memory_space<vmem>>, vector<256x4xbf16>
    tpu.vector_store %arg10[%c0_86, %c32], %76 {strides = array<i32>} : memref<256x324xbf16, #tpu.memory_space<vmem>>, vector<256x4xbf16>,
    %c2_87 = arith.constant 2 : index
    %c2_88 = arith.constant 2 : index
    %c0_89 = arith.constant 0 : index
    %78 = vector.load %arg9[%c2_87, %c2_88, %c0_89] : memref<18x18x32xf32, #tpu.memory_space<vmem>>, vector<16x16x32xf32>
    %79 = vector.shape_cast %78 : vector<16x16x32xf32> to vector<256x32xf32>
    %80 = arith.truncf %79 : vector<256x32xf32> to vector<256x32xbf16>
    %c0_90 = arith.constant 0 : index
    %c292 = arith.constant 292 : index
    %81 = vector.load %arg10[%c0_90, %c292] : memref<256x324xbf16, #tpu.memory_space<vmem>>, vector<256x32xbf16>
    tpu.vector_store %arg10[%c0_90, %c292], %80 {strides = array<i32>} : memref<256x324xbf16, #tpu.memory_space<vmem>>, vector<256x32xbf16>,
    %c0_91 = arith.constant 0 : index
    %c0_92 = arith.constant 0 : index
    %82 = vector.load %arg5[%c0_91, %c0_92] : memref<1x128xf32, #tpu.memory_space<vmem>>, vector<1x128xf32>
    %c0_93 = arith.constant 0 : index
    %c0_94 = arith.constant 0 : index
    %83 = vector.load %arg10[%c0_93, %c0_94] : memref<256x324xbf16, #tpu.memory_space<vmem>>, vector<128x324xbf16>
    %c0_95 = arith.constant 0 : index
    %c0_96 = arith.constant 0 : index
    %84 = vector.load %arg4[%c0_95, %c0_96] : memref<324x128xbf16, #tpu.memory_space<vmem>>, vector<324x128xbf16>
    %cst_97 = arith.constant dense<0.000000e+00> : vector<128x128xf32>
    %85 = tpu.matmul %83, %84, %cst_97 {dimension_numbers = #tpu.dot_dimension_numbers<[1], [0], [0], [1], [0, 0, 1, 1], [], []>} : vector<128x324xbf16>, vector<324x128xbf16>, vector<128x128xf32> -> vector<128x128xf32>
    %86 = vector.broadcast %82 : vector<1x128xf32> to vector<128x128xf32>
    %87 = arith.addf %85, %86 : vector<128x128xf32>
    %88 = vector.extract_strided_slice %87 {offsets = [0, 0], sizes = [128, 96], strides = [1, 1]} : vector<128x128xf32> to vector<128x96xf32>
    %89 = arith.negf %88 : vector<128x96xf32>
    %90 = math.exp %89 : vector<128x96xf32>
    %cst_98 = arith.constant 1.000000e+00 : f32
    %91 = vector.broadcast %cst_98 : f32 to vector<128x96xf32>
    %92 = arith.addf %91, %90 : vector<128x96xf32>
    %93 = arith.divf %91, %92 : vector<128x96xf32>
    %94 = vector.extract_strided_slice %87 {offsets = [0, 96], sizes = [128, 32], strides = [1, 1]} : vector<128x128xf32> to vector<128x32xf32>
    %95 = math.tanh %94 : vector<128x32xf32>
    %96 = vector.extract_strided_slice %93 {offsets = [0, 0], sizes = [128, 32], strides = [1, 1]} : vector<128x96xf32> to vector<128x32xf32>
    %97 = vector.extract_strided_slice %93 {offsets = [0, 32], sizes = [128, 32], strides = [1, 1]} : vector<128x96xf32> to vector<128x32xf32>
    %98 = vector.extract_strided_slice %93 {offsets = [0, 64], sizes = [128, 32], strides = [1, 1]} : vector<128x96xf32> to vector<128x32xf32>
    %c0_99 = arith.constant 0 : index
    %c0_100 = arith.constant 0 : index
    %c0_101 = arith.constant 0 : index
    %c0_102 = arith.constant 0 : index
    %99 = vector.load %arg3[%c0_99, %c0_100, %c0_101, %c0_102] : memref<1x16x16x32xf32, #tpu.memory_space<vmem>>, vector<1x8x16x32xf32>
    %100 = vector.shape_cast %99 : vector<1x8x16x32xf32> to vector<8x16x32xf32>
    %101 = vector.shape_cast %100 : vector<8x16x32xf32> to vector<128x32xf32>
    %102 = arith.mulf %97, %101 : vector<128x32xf32>
    %103 = arith.mulf %96, %95 : vector<128x32xf32>
    %104 = arith.addf %102, %103 : vector<128x32xf32>
    %105 = math.tanh %104 : vector<128x32xf32>
    %106 = arith.mulf %98, %105 : vector<128x32xf32>
    %107 = vector.shape_cast %104 : vector<128x32xf32> to vector<8x16x32xf32>
    %c0_103 = arith.constant 0 : index
    %c0_104 = arith.constant 0 : index
    %c0_105 = arith.constant 0 : index
    %c0_106 = arith.constant 0 : index
    %108 = vector.load %arg7[%c0_103, %c0_104, %c0_105, %c0_106] : memref<1x16x16x32xf32, #tpu.memory_space<vmem>>, vector<1x8x16x32xf32>
    %109 = vector.shape_cast %108 : vector<1x8x16x32xf32> to vector<8x16x32xf32>
    %110 = vector.shape_cast %107 : vector<8x16x32xf32> to vector<1x8x16x32xf32>
    tpu.vector_store %arg7[%c0_103, %c0_104, %c0_105, %c0_106], %110 {strides = array<i32>} : memref<1x16x16x32xf32, #tpu.memory_space<vmem>>, vector<1x8x16x32xf32>,
    %111 = vector.shape_cast %106 : vector<128x32xf32> to vector<8x16x32xf32>
    %c0_107 = arith.constant 0 : index
    %c0_108 = arith.constant 0 : index
    %c0_109 = arith.constant 0 : index
    %c0_110 = arith.constant 0 : index
    %112 = vector.load %arg6[%c0_107, %c0_108, %c0_109, %c0_110] : memref<1x16x16x32xf32, #tpu.memory_space<vmem>>, vector<1x8x16x32xf32>
    %113 = vector.shape_cast %112 : vector<1x8x16x32xf32> to vector<8x16x32xf32>
    %114 = vector.shape_cast %111 : vector<8x16x32xf32> to vector<1x8x16x32xf32>
    tpu.vector_store %arg6[%c0_107, %c0_108, %c0_109, %c0_110], %114 {strides = array<i32>} : memref<1x16x16x32xf32, #tpu.memory_space<vmem>>, vector<1x8x16x32xf32>,
    %c128 = arith.constant 128 : index
    %c0_111 = arith.constant 0 : index
    %115 = vector.load %arg10[%c128, %c0_111] : memref<256x324xbf16, #tpu.memory_space<vmem>>, vector<128x324xbf16>
    %c0_112 = arith.constant 0 : index
    %c0_113 = arith.constant 0 : index
    %116 = vector.load %arg4[%c0_112, %c0_113] : memref<324x128xbf16, #tpu.memory_space<vmem>>, vector<324x128xbf16>
    %cst_114 = arith.constant dense<0.000000e+00> : vector<128x128xf32>
    %117 = tpu.matmul %115, %116, %cst_114 {dimension_numbers = #tpu.dot_dimension_numbers<[1], [0], [0], [1], [0, 0, 1, 1], [], []>} : vector<128x324xbf16>, vector<324x128xbf16>, vector<128x128xf32> -> vector<128x128xf32>
    %118 = vector.broadcast %82 : vector<1x128xf32> to vector<128x128xf32>
    %119 = arith.addf %117, %118 : vector<128x128xf32>
    %120 = vector.extract_strided_slice %119 {offsets = [0, 0], sizes = [128, 96], strides = [1, 1]} : vector<128x128xf32> to vector<128x96xf32>
    %121 = arith.negf %120 : vector<128x96xf32>
    %122 = math.exp %121 : vector<128x96xf32>
    %cst_115 = arith.constant 1.000000e+00 : f32
    %123 = vector.broadcast %cst_115 : f32 to vector<128x96xf32>
    %124 = arith.addf %123, %122 : vector<128x96xf32>
    %125 = arith.divf %123, %124 : vector<128x96xf32>
    %126 = vector.extract_strided_slice %119 {offsets = [0, 96], sizes = [128, 32], strides = [1, 1]} : vector<128x128xf32> to vector<128x32xf32>
    %127 = math.tanh %126 : vector<128x32xf32>
    %128 = vector.extract_strided_slice %125 {offsets = [0, 0], sizes = [128, 32], strides = [1, 1]} : vector<128x96xf32> to vector<128x32xf32>
    %129 = vector.extract_strided_slice %125 {offsets = [0, 32], sizes = [128, 32], strides = [1, 1]} : vector<128x96xf32> to vector<128x32xf32>
    %130 = vector.extract_strided_slice %125 {offsets = [0, 64], sizes = [128, 32], strides = [1, 1]} : vector<128x96xf32> to vector<128x32xf32>
    %c0_116 = arith.constant 0 : index
    %c8_117 = arith.constant 8 : index
    %c0_118 = arith.constant 0 : index
    %c0_119 = arith.constant 0 : index
    %131 = vector.load %arg3[%c0_116, %c8_117, %c0_118, %c0_119] : memref<1x16x16x32xf32, #tpu.memory_space<vmem>>, vector<1x8x16x32xf32>
    %132 = vector.shape_cast %131 : vector<1x8x16x32xf32> to vector<8x16x32xf32>
    %133 = vector.shape_cast %132 : vector<8x16x32xf32> to vector<128x32xf32>
    %134 = arith.mulf %129, %133 : vector<128x32xf32>
    %135 = arith.mulf %128, %127 : vector<128x32xf32>
    %136 = arith.addf %134, %135 : vector<128x32xf32>
    %137 = math.tanh %136 : vector<128x32xf32>
    %138 = arith.mulf %130, %137 : vector<128x32xf32>
    %139 = vector.shape_cast %136 : vector<128x32xf32> to vector<8x16x32xf32>
    %c0_120 = arith.constant 0 : index
    %c8_121 = arith.constant 8 : index
    %c0_122 = arith.constant 0 : index
    %c0_123 = arith.constant 0 : index
    %140 = vector.load %arg7[%c0_120, %c8_121, %c0_122, %c0_123] : memref<1x16x16x32xf32, #tpu.memory_space<vmem>>, vector<1x8x16x32xf32>
    %141 = vector.shape_cast %140 : vector<1x8x16x32xf32> to vector<8x16x32xf32>
    %142 = vector.shape_cast %139 : vector<8x16x32xf32> to vector<1x8x16x32xf32>
    tpu.vector_store %arg7[%c0_120, %c8_121, %c0_122, %c0_123], %142 {strides = array<i32>} : memref<1x16x16x32xf32, #tpu.memory_space<vmem>>, vector<1x8x16x32xf32>,
    %143 = vector.shape_cast %138 : vector<128x32xf32> to vector<8x16x32xf32>
    %c0_124 = arith.constant 0 : index
    %c8_125 = arith.constant 8 : index
    %c0_126 = arith.constant 0 : index
    %c0_127 = arith.constant 0 : index
    %144 = vector.load %arg6[%c0_124, %c8_125, %c0_126, %c0_127] : memref<1x16x16x32xf32, #tpu.memory_space<vmem>>, vector<1x8x16x32xf32>
    %145 = vector.shape_cast %144 : vector<1x8x16x32xf32> to vector<8x16x32xf32>
    %146 = vector.shape_cast %143 : vector<8x16x32xf32> to vector<1x8x16x32xf32>
    tpu.vector_store %arg6[%c0_124, %c8_125, %c0_126, %c0_127], %146 {strides = array<i32>} : memref<1x16x16x32xf32, #tpu.memory_space<vmem>>, vector<1x8x16x32xf32>,
    return
  }
  func.func @transform_0(%arg0: i32) -> (i32, i32, i32, i32) {
    %c0_i32 = arith.constant 0 : i32
    %c0_i32_0 = arith.constant 0 : i32
    %c0_i32_1 = arith.constant 0 : i32
    %c0_i32_2 = arith.constant 0 : i32
    return %arg0, %c0_i32, %c0_i32_0, %c0_i32_1 : i32, i32, i32, i32
  }
  func.func @transform_1(%arg0: i32) -> (i32, i32, i32, i32) {
    %c0_i32 = arith.constant 0 : i32
    %c0_i32_0 = arith.constant 0 : i32
    %c0_i32_1 = arith.constant 0 : i32
    %c0_i32_2 = arith.constant 0 : i32
    return %arg0, %c0_i32, %c0_i32_0, %c0_i32_1 : i32, i32, i32, i32
  }
  func.func @transform_2(%arg0: i32) -> (i32, i32, i32, i32) {
    %c0_i32 = arith.constant 0 : i32
    %c0_i32_0 = arith.constant 0 : i32
    %c0_i32_1 = arith.constant 0 : i32
    %c0_i32_2 = arith.constant 0 : i32
    return %arg0, %c0_i32, %c0_i32_0, %c0_i32_1 : i32, i32, i32, i32
  }
  func.func @transform_3(%arg0: i32) -> (i32, i32) {
    %c0_i32 = arith.constant 0 : i32
    %c0_i32_0 = arith.constant 0 : i32
    %c0_i32_1 = arith.constant 0 : i32
    return %c0_i32, %c0_i32_0 : i32, i32
  }
  func.func @transform_4(%arg0: i32) -> (i32, i32) {
    %c0_i32 = arith.constant 0 : i32
    %c0_i32_0 = arith.constant 0 : i32
    %c0_i32_1 = arith.constant 0 : i32
    return %c0_i32, %c0_i32_0 : i32, i32
  }
  func.func @transform_5(%arg0: i32) -> (i32, i32, i32, i32) {
    %c0_i32 = arith.constant 0 : i32
    %c0_i32_0 = arith.constant 0 : i32
    %c0_i32_1 = arith.constant 0 : i32
    %c0_i32_2 = arith.constant 0 : i32
    return %arg0, %c0_i32, %c0_i32_0, %c0_i32_1 : i32, i32, i32, i32
  }
  func.func @transform_6(%arg0: i32) -> (i32, i32, i32, i32) {
    %c0_i32 = arith.constant 0 : i32
    %c0_i32_0 = arith.constant 0 : i32
    %c0_i32_1 = arith.constant 0 : i32
    %c0_i32_2 = arith.constant 0 : i32
    return %arg0, %c0_i32, %c0_i32_0, %c0_i32_1 : i32, i32, i32, i32
  }
}

</mosaic_0001>

<bundles_post_ra>
// kernel: conv_lstm_cell.1
= control target key start
LH: loop header
LB: loop body
LE: loop exit
PB: predicated region body
PF: predicated region fallthrough
CT: control target
= control target key end

     0   :  { %12 = vsyncpa [#allocation6], 0  ;;  %s8402_s0 = inlined_call_operand.vmem [shape: f32[2,16,16,4], index: 0, kind: input, shape index: {}]   ;;  %s8403_s1 = inlined_call_operand.vmem [shape: f32[2,16,16,32], index: 1, kind: input, shape index: {}]   ;;  %s8404_s2 = inlined_call_operand.vmem [shape: f32[2,16,16,32], index: 2, kind: input, shape index: {}]   ;;  %s8405_s3 = inlined_call_operand.vmem [shape: bf16[324,128], index: 3, kind: input, shape index: {}]   ;;  %s8406_s4 = inlined_call_operand.vmem [shape: f32[1,128], index: 4, kind: input, shape index: {}]   ;;  %s8407_s5 = inlined_call_operand.hbm [shape: f32[2,16,16,32], index: 5, kind: output, shape index: {0}]   ;;  %s8408_s6 = inlined_call_operand.hbm [shape: f32[2,16,16,32], index: 6, kind: output, shape index: {1}]  }
   0x1   :  { %14 = vsyncpa [#allocation6 + $0x1], 0 }
   0x2   :  { %15 = vsyncpa [#allocation8], 0 }
   0x3   :  { %17 = vsyncpa [#allocation8 + $0x1], 0  ;;  %s5938_s21 = smov 0   ;;  %s5940_s22 = smov 0  }
   0x4   :  { %s5942_s23 = smov 0   ;;  %s5944_s24 = smov 0  }
   0x5 LB: > { %s5959_s25 = sadd.s32 4294967295, %s5884_s24   ;;  %s5061_s26 = sadd.s32 4294967294, %s5884_s24   ;;  %s5884_s24 = sphi %s5944_s24, %s8417_s24   ;;  %s5880_s23 = sphi %s5942_s23, %s8416_s23   ;;  %s5876_s22 = sphi %s5940_s22, %s8415_s22   ;;  %s5872_s21 = sphi %s5938_s21, %s8414_s21  }
   0x6   : > { %s5963_s27 = sadd.s32 1, %s5884_s24   ;;  %s150_s28 = sadd.s32 1, %s5880_s23 }
   0x7   : > { %s147_s29 = ssub.s32 %s5884_s24, %s5963_s27  ;;  %p160_p0 = scmp.ne.s32.totalorder %s5880_s23, %s5876_s22 }
   0x8   : > { %p148_p1 = scmp.eq.s32.totalorder %s147_s29, 0  ;;  %p161_p2 = scmp.eq.s32.totalorder %s5959_s25, 1 }
   0x9   : > { %p166_p3 = scmp.ne.s32.totalorder %s5876_s22, %s5872_s21  ;;  %p167_p4 = scmp.eq.s32.totalorder %s5061_s26, 1 }
   0xa   : > { %s5974_s30 = scalar_select %p148_p1, %s5880_s23, %s150_s28  }
   0xb   : > { %p5976_p5 = por %p161_p2, %p160_p0  ;;  %p5980_p6 = por %p167_p4, %p166_p3 }
   0xc   : > { %p5064_p7 = scmp.ge.s32.totalorder %s5884_s24, 1  ;;  %p241_p8 = scmp.lt.s32.totalorder %s5884_s24, 3 }
   0xe   : > { %p242_p9 = pnand %p5064_p7, %p241_p8 }
  0x10   : > { %245 = sbr.rel (%p242_p9) target bundleno = 1669 (0x685), region = 40 }
  0x17   : > { %vm358_vm0 = vcmask 261120   ;;  %p286_p10 = scmp.lt.s32.totalorder %s5959_s25, 1  ;;  %vm361_vm1 = vcmask 254976   ;;  %vm302_vm2 = vcmask 31744   ;;  %v5886_v0 = vmov 0.0   ;;  %s5887_s14 = smov 36  }
  0x18   : > { %359 = vst.msk [vmem:[#allocation3] sm:$0xff] %vm358_vm0, %v5886_v0  ;;  %360 = vst.msk [vmem:[#allocation3 + $0x8] sm:$0xff] %vm358_vm0, %v5886_v0  ;;  %vm305_vm3 = vcmask 25600   ;;  %s5888_s18 = smov 4   ;;  %s5889_s19 = smov 68   ;;  %vm720_vm4 = vcmask 556320  }
  0x19   : > { %363 = vst.msk [vmem:[#allocation3 + $0x18] sm:$0xff] %vm358_vm0, %v5886_v0  ;;  %364 = vst.msk [vmem:[#allocation3 + $0x20] sm:$0xff] %vm358_vm0, %v5886_v0  ;;  %s287_s9 = scalar_select %p286_p10, %s5959_s25, 1  ;;  %vm849_vm5 = vcmask 64544   ;;  %vm978_vm6 = vcmask 818720   ;;  %vm1107_vm7 = vcmask 97344  }
  0x1a   : > { %366 = vst.msk [vmem:[#allocation3 + $0x30] sm:$0xff] %vm358_vm0, %v5886_v0  ;;  %367 = vst.msk [vmem:[#allocation3 + $0x38] sm:$0xff] %vm358_vm0, %v5886_v0  ;;  %s5890_s20 = smov 8   ;;  %s5891_s26 = smov 100   ;;  %vm1236_vm8 = vcmask 1048352   ;;  %vm1381_vm9 = vcmask 130144  }
  0x1b   : > { %369 = vst.msk [vmem:[#allocation3 + $0x48] sm:$0xff] %vm358_vm0, %v5886_v0  ;;  %370 = vst.msk [vmem:[#allocation3 + $0x50] sm:$0xff] %vm358_vm0, %v5886_v0  ;;  %s6206_s10 = sshll.u32 %s287_s9, 8  ;;  %s5892_s28 = smov 12   ;;  %vm3050_vm10 = vcmask 1041408   ;;  %vm1510_vm11 = vcmask 293920  }
  0x1c   : > { %372 = vst.msk [vmem:[#allocation3 + $0x60] sm:$0xff] %vm358_vm0, %v5886_v0  ;;  %373 = vst.msk [vmem:[#allocation3 + $0x68] sm:$0xff] %vm358_vm0, %v5886_v0  ;;  %s6212_s13 = scalar_lea.vmem %s8403_s1, %s6206_s10  ;;  %s6274_s17 = scalar_lea.vmem %s8402_s0, %s6206_s10  ;;  %vm1639_vm12 = vcmask 162944   ;;  %vm1896_vm13 = vcmask 195744   ;;  %vm2154_vm14 = vcmask 228544   ;;  %vm2428_vm15 = vcmask 261344  }
  0x1d   : > { %375 = vst.msk [vmem:[#allocation3 + $0x78] sm:$0xff] %vm358_vm0, %v5886_v0  ;;  %376 = vst.msk [vmem:[#allocation3 + $0x80] sm:$0xff] %vm358_vm0, %v5886_v0  ;;  %v481_v1 = vld [vmem:[%s6212_s13 + $0x10] sm:$0xff]  ;;  %v482_v2 = vld [vmem:[%s6212_s13 + $0x18] sm:$0xff]  ;;  %s5893_s29 = smov 16   ;;  %s5894_s11 = smov 20  }
  0x1e   : > { %378 = vst.msk [vmem:[#allocation3 + $0x90] sm:$0xff] %vm358_vm0, %v5886_v0  ;;  %379 = vst.msk [vmem:[#allocation3 + $0x98] sm:$0xff] %vm358_vm0, %v5886_v0  ;;  %v479_v3 = vld [vmem:[%s6212_s13] sm:$0xff]  ;;  %v480_v4 = vld [vmem:[%s6212_s13 + $0x8] sm:$0xff]  ;;  %s5896_s9 = smov 28   ;;  %s5897_s12 = smov 32  }
  0x1f   : > { %381 = vst.msk [vmem:[#allocation3 + $0xa8] sm:$0xff] %vm358_vm0, %v5886_v0  ;;  %382 = vst.msk [vmem:[#allocation3 + $0xb0] sm:$0xff] %vm358_vm0, %v5886_v0  ;;  %v483_v5 = vld [vmem:[%s6212_s13 + $0x20] sm:$0xff]  ;;  %v484_v6 = vld [vmem:[%s6212_s13 + $0x28] sm:$0xff] }
  0x20   : > { %384 = vst.msk [vmem:[#allocation3 + $0xc0] sm:$0xff] %vm358_vm0, %v5886_v0  ;;  %385 = vst.msk [vmem:[#allocation3 + $0xc8] sm:$0xff] %vm358_vm0, %v5886_v0  ;;  %v608_v7 = vld [vmem:[#allocation3] sm:$0xff]  ;;  %v609_v8 = vld [vmem:[#allocation3 + $0x8] sm:$0xff] }
  0x21   : > { %387 = vst.msk [vmem:[#allocation3 + $0xd8] sm:$0xff] %vm358_vm0, %v5886_v0  ;;  %388 = vst.msk [vmem:[#allocation3 + $0xe0] sm:$0xff] %vm358_vm0, %v5886_v0  ;;  %v485_v9 = vld [vmem:[%s6212_s13 + $0x30] sm:$0xff]  ;;  %v640_v10 = vpack.c.bf16 %v609_v8, %v608_v7  ;;  %v486_v11 = vld [vmem:[%s6212_s13 + $0x38] sm:$0xff] }
  0x22   : > { %390 = vst.msk [vmem:[#allocation3 + $0xf0] sm:$0xff] %vm358_vm0, %v5886_v0  ;;  %391 = vst.msk [vmem:[#allocation3 + $0xf8] sm:$0xff] %vm358_vm0, %v5886_v0  ;;  %v487_v12 = vld [vmem:[%s6212_s13 + $0x40] sm:$0xff]  ;;  %v488_v13 = vld [vmem:[%s6212_s13 + $0x48] sm:$0xff] }
  0x23   : > { %393 = vst.msk [vmem:[#allocation3 + $0x108] sm:$0xff] %vm358_vm0, %v5886_v0  ;;  %394 = vst.msk [vmem:[#allocation3 + $0x110] sm:$0xff] %vm358_vm0, %v5886_v0  ;;  %v489_v14 = vld [vmem:[%s6212_s13 + $0x50] sm:$0xff]  ;;  %v490_v15 = vld [vmem:[%s6212_s13 + $0x58] sm:$0xff]  ;;  %672 = vrot.lane.b32.xlu0 %v640_v10, %s5887_s14 }
  0x24   : > { %396 = vst.msk [vmem:[#allocation3 + $0x120] sm:$0xff] %vm358_vm0, %v5886_v0  ;;  %397 = vst.msk [vmem:[#allocation3 + $0x128] sm:$0xff] %vm358_vm0, %v5886_v0  ;;  %v491_v16 = vld [vmem:[%s6212_s13 + $0x60] sm:$0xff]  ;;  %v492_v17 = vld [vmem:[%s6212_s13 + $0x68] sm:$0xff] }
  0x25   : > { %399 = vst.msk [vmem:[#allocation3 + $0x138] sm:$0xff] %vm358_vm0, %v5886_v0  ;;  %400 = vst.msk [vmem:[#allocation3 + $0x140] sm:$0xff] %vm358_vm0, %v5886_v0  ;;  %v493_v18 = vld [vmem:[%s6212_s13 + $0x70] sm:$0xff]  ;;  %v494_v19 = vld [vmem:[%s6212_s13 + $0x78] sm:$0xff] }
  0x26   : > { %402 = vst.msk [vmem:[#allocation3 + $0x150] sm:$0xff] %vm358_vm0, %v5886_v0  ;;  %403 = vst.msk [vmem:[#allocation3 + $0x158] sm:$0xff] %vm358_vm0, %v5886_v0  ;;  %v495_v20 = vld [vmem:[%s6212_s13 + $0x80] sm:$0xff]  ;;  %v496_v21 = vld [vmem:[%s6212_s13 + $0x88] sm:$0xff] }
  0x27   : > { %405 = vst.msk [vmem:[#allocation3 + $0x168] sm:$0xff] %vm358_vm0, %v5886_v0  ;;  %406 = vst.msk [vmem:[#allocation3 + $0x170] sm:$0xff] %vm358_vm0, %v5886_v0  ;;  %v497_v22 = vld [vmem:[%s6212_s13 + $0x90] sm:$0xff]  ;;  %v498_v23 = vld [vmem:[%s6212_s13 + $0x98] sm:$0xff] }
  0x28   : > { %408 = vst.msk [vmem:[#allocation3 + $0x180] sm:$0xff] %vm358_vm0, %v5886_v0  ;;  %409 = vst.msk [vmem:[#allocation3 + $0x188] sm:$0xff] %vm358_vm0, %v5886_v0  ;;  %v499_v24 = vld [vmem:[%s6212_s13 + $0xa0] sm:$0xff]  ;;  %v500_v25 = vld [vmem:[%s6212_s13 + $0xa8] sm:$0xff] }
  0x29   : > { %411 = vst.msk [vmem:[#allocation3 + $0x198] sm:$0xff] %vm358_vm0, %v5886_v0  ;;  %412 = vst.msk [vmem:[#allocation3 + $0x1a0] sm:$0xff] %vm358_vm0, %v5886_v0  ;;  %v501_v35 = vld [vmem:[%s6212_s13 + $0xb0] sm:$0xff]  ;;  %v502_v36 = vld [vmem:[%s6212_s13 + $0xb8] sm:$0xff] }
  0x2a   : > { %368 = vst.msk [vmem:[#allocation3 + $0x40] sm:$0x3] %vm361_vm1, %v5886_v0  ;;  %362 = vst.msk [vmem:[#allocation3 + $0x10] sm:$0x3] %vm361_vm1, %v5886_v0  ;;  %v503_v50 = vld [vmem:[%s6212_s13 + $0xc0] sm:$0xff]  ;;  %v504_v51 = vld [vmem:[%s6212_s13 + $0xc8] sm:$0xff] }
  0x2b   : > { %365 = vst.msk [vmem:[#allocation3 + $0x28] sm:$0x3] %vm361_vm1, %v5886_v0  ;;  %371 = vst.msk [vmem:[#allocation3 + $0x58] sm:$0x3] %vm361_vm1, %v5886_v0  ;;  %v505_v52 = vld [vmem:[%s6212_s13 + $0xd0] sm:$0xff]  ;;  %v506_v53 = vld [vmem:[%s6212_s13 + $0xd8] sm:$0xff] }
  0x2c   : > { %374 = vst.msk [vmem:[#allocation3 + $0x70] sm:$0x3] %vm361_vm1, %v5886_v0  ;;  %377 = vst.msk [vmem:[#allocation3 + $0x88] sm:$0x3] %vm361_vm1, %v5886_v0  ;;  %v507_v54 = vld [vmem:[%s6212_s13 + $0xe0] sm:$0xff]  ;;  %v508_v55 = vld [vmem:[%s6212_s13 + $0xe8] sm:$0xff] }
  0x2d   : > { %380 = vst.msk [vmem:[#allocation3 + $0xa0] sm:$0x3] %vm361_vm1, %v5886_v0  ;;  %383 = vst.msk [vmem:[#allocation3 + $0xb8] sm:$0x3] %vm361_vm1, %v5886_v0  ;;  %v416_v61 = vld [vmem:[%s6274_s17 + $0x10] sm:$0xff]  ;;  %v417_v62 = vld [vmem:[%s6274_s17 + $0x18] sm:$0xff] }
  0x2e   : > { %386 = vst.msk [vmem:[#allocation3 + $0xd0] sm:$0x3] %vm361_vm1, %v5886_v0  ;;  %389 = vst.msk [vmem:[#allocation3 + $0xe8] sm:$0x3] %vm361_vm1, %v5886_v0  ;;  %v425_v7 = vld [vmem:[%s6274_s17 + $0x58] sm:$0xff]  ;;  %v422_v8 = vld [vmem:[%s6274_s17 + $0x40] sm:$0xff] }
  0x2f   : > { %392 = vst.msk [vmem:[#allocation3 + $0x100] sm:$0x3] %vm361_vm1, %v5886_v0  ;;  %395 = vst.msk [vmem:[#allocation3 + $0x118] sm:$0x3] %vm361_vm1, %v5886_v0  ;;  %v423_v10 = vld [vmem:[%s6274_s17 + $0x48] sm:$0xff] }
  0x30   : > { %398 = vst.msk [vmem:[#allocation3 + $0x130] sm:$0x3] %vm361_vm1, %v5886_v0  ;;  %401 = vst.msk [vmem:[#allocation3 + $0x148] sm:$0x3] %vm361_vm1, %v5886_v0 }
  0x31   : > { %404 = vst.msk [vmem:[#allocation3 + $0x160] sm:$0x3] %vm361_vm1, %v5886_v0  ;;  %407 = vst.msk [vmem:[#allocation3 + $0x178] sm:$0x3] %vm361_vm1, %v5886_v0 }
  0x32   : > { %410 = vst.msk [vmem:[#allocation3 + $0x190] sm:$0x3] %vm361_vm1, %v5886_v0  ;;  %413 = vst.msk [vmem:[#allocation3 + $0x1a8] sm:$0x3] %vm361_vm1, %v5886_v0  ;;  %vm3025_vm1 = vcmask 556032  }
  0x33   : > { %303 = vst.msk [vmem:[#allocation2] sm:$0xff] %vm302_vm2, %v5886_v0  ;;  %304 = vst.msk [vmem:[#allocation2 + $0x8] sm:$0xff] %vm302_vm2, %v5886_v0 }
  0x34   : > { %307 = vst.msk [vmem:[#allocation2 + $0x18] sm:$0xff] %vm302_vm2, %v5886_v0  ;;  %308 = vst.msk [vmem:[#allocation2 + $0x20] sm:$0xff] %vm302_vm2, %v5886_v0 }
  0x35   : > { %310 = vst.msk [vmem:[#allocation2 + $0x30] sm:$0xff] %vm302_vm2, %v5886_v0  ;;  %311 = vst.msk [vmem:[#allocation2 + $0x38] sm:$0xff] %vm302_vm2, %v5886_v0 }
  0x36   : > { %313 = vst.msk [vmem:[#allocation2 + $0x48] sm:$0xff] %vm302_vm2, %v5886_v0  ;;  %314 = vst.msk [vmem:[#allocation2 + $0x50] sm:$0xff] %vm302_vm2, %v5886_v0 }
  0x37   : > { %316 = vst.msk [vmem:[#allocation2 + $0x60] sm:$0xff] %vm302_vm2, %v5886_v0  ;;  %317 = vst.msk [vmem:[#allocation2 + $0x68] sm:$0xff] %vm302_vm2, %v5886_v0 }
  0x38   : > { %319 = vst.msk [vmem:[#allocation2 + $0x78] sm:$0xff] %vm302_vm2, %v5886_v0  ;;  %320 = vst.msk [vmem:[#allocation2 + $0x80] sm:$0xff] %vm302_vm2, %v5886_v0 }
  0x39   : > { %322 = vst.msk [vmem:[#allocation2 + $0x90] sm:$0xff] %vm302_vm2, %v5886_v0  ;;  %323 = vst.msk [vmem:[#allocation2 + $0x98] sm:$0xff] %vm302_vm2, %v5886_v0 }
  0x3a   : > { %325 = vst.msk [vmem:[#allocation2 + $0xa8] sm:$0xff] %vm302_vm2, %v5886_v0  ;;  %326 = vst.msk [vmem:[#allocation2 + $0xb0] sm:$0xff] %vm302_vm2, %v5886_v0 }
  0x3b   : > { %328 = vst.msk [vmem:[#allocation2 + $0xc0] sm:$0xff] %vm302_vm2, %v5886_v0  ;;  %329 = vst.msk [vmem:[#allocation2 + $0xc8] sm:$0xff] %vm302_vm2, %v5886_v0 }
  0x3c   : > { %331 = vst.msk [vmem:[#allocation2 + $0xd8] sm:$0xff] %vm302_vm2, %v5886_v0  ;;  %332 = vst.msk [vmem:[#allocation2 + $0xe0] sm:$0xff] %vm302_vm2, %v5886_v0 }
  0x3d   : > { %334 = vst.msk [vmem:[#allocation2 + $0xf0] sm:$0xff] %vm302_vm2, %v5886_v0  ;;  %335 = vst.msk [vmem:[#allocation2 + $0xf8] sm:$0xff] %vm302_vm2, %v5886_v0 }
  0x3e   : > { %337 = vst.msk [vmem:[#allocation2 + $0x108] sm:$0xff] %vm302_vm2, %v5886_v0  ;;  %338 = vst.msk [vmem:[#allocation2 + $0x110] sm:$0xff] %vm302_vm2, %v5886_v0 }
  0x3f   : > { %340 = vst.msk [vmem:[#allocation2 + $0x120] sm:$0xff] %vm302_vm2, %v5886_v0  ;;  %341 = vst.msk [vmem:[#allocation2 + $0x128] sm:$0xff] %vm302_vm2, %v5886_v0 }
  0x40   : > { %343 = vst.msk [vmem:[#allocation2 + $0x138] sm:$0xff] %vm302_vm2, %v5886_v0  ;;  %344 = vst.msk [vmem:[#allocation2 + $0x140] sm:$0xff] %vm302_vm2, %v5886_v0 }
  0x41   : > { %346 = vst.msk [vmem:[#allocation2 + $0x150] sm:$0xff] %vm302_vm2, %v5886_v0  ;;  %347 = vst.msk [vmem:[#allocation2 + $0x158] sm:$0xff] %vm302_vm2, %v5886_v0 }
  0x42   : > { %349 = vst.msk [vmem:[#allocation2 + $0x168] sm:$0xff] %vm302_vm2, %v5886_v0  ;;  %350 = vst.msk [vmem:[#allocation2 + $0x170] sm:$0xff] %vm302_vm2, %v5886_v0 }
  0x43   : > { %352 = vst.msk [vmem:[#allocation2 + $0x180] sm:$0xff] %vm302_vm2, %v5886_v0  ;;  %353 = vst.msk [vmem:[#allocation2 + $0x188] sm:$0xff] %vm302_vm2, %v5886_v0 }
  0x44   : > { %355 = vst.msk [vmem:[#allocation2 + $0x198] sm:$0xff] %vm302_vm2, %v5886_v0  ;;  %356 = vst.msk [vmem:[#allocation2 + $0x1a0] sm:$0xff] %vm302_vm2, %v5886_v0 }
  0x45   : > { %306 = vst.msk [vmem:[#allocation2 + $0x10] sm:$0x3] %vm305_vm3, %v5886_v0  ;;  %309 = vst.msk [vmem:[#allocation2 + $0x28] sm:$0x3] %vm305_vm3, %v5886_v0 }
  0x46   : > { %312 = vst.msk [vmem:[#allocation2 + $0x40] sm:$0x3] %vm305_vm3, %v5886_v0  ;;  %315 = vst.msk [vmem:[#allocation2 + $0x58] sm:$0x3] %vm305_vm3, %v5886_v0 }
  0x47   : > { %318 = vst.msk [vmem:[#allocation2 + $0x70] sm:$0x3] %vm305_vm3, %v5886_v0  ;;  %321 = vst.msk [vmem:[#allocation2 + $0x88] sm:$0x3] %vm305_vm3, %v5886_v0 }
  0x48   : > { %324 = vst.msk [vmem:[#allocation2 + $0xa0] sm:$0x3] %vm305_vm3, %v5886_v0  ;;  %327 = vst.msk [vmem:[#allocation2 + $0xb8] sm:$0x3] %vm305_vm3, %v5886_v0 }
  0x49   : > { %330 = vst.msk [vmem:[#allocation2 + $0xd0] sm:$0x3] %vm305_vm3, %v5886_v0  ;;  %333 = vst.msk [vmem:[#allocation2 + $0xe8] sm:$0x3] %vm305_vm3, %v5886_v0 }
  0x4a   : > { %336 = vst.msk [vmem:[#allocation2 + $0x100] sm:$0x3] %vm305_vm3, %v5886_v0  ;;  %339 = vst.msk [vmem:[#allocation2 + $0x118] sm:$0x3] %vm305_vm3, %v5886_v0 }
  0x4b   : > { %342 = vst.msk [vmem:[#allocation2 + $0x130] sm:$0x3] %vm305_vm3, %v5886_v0  ;;  %345 = vst.msk [vmem:[#allocation2 + $0x148] sm:$0x3] %vm305_vm3, %v5886_v0 }
  0x4c   : > { %348 = vst.msk [vmem:[#allocation2 + $0x160] sm:$0x3] %vm305_vm3, %v5886_v0  ;;  %351 = vst.msk [vmem:[#allocation2 + $0x178] sm:$0x3] %vm305_vm3, %v5886_v0 }
  0x4d   : > { %354 = vst.msk [vmem:[#allocation2 + $0x190] sm:$0x3] %vm305_vm3, %v5886_v0  ;;  %357 = vst.msk [vmem:[#allocation2 + $0x1a8] sm:$0x3] %vm305_vm3, %v5886_v0  ;;  %v414_v0 = vld [vmem:[%s6274_s17] sm:$0xff]  ;;  %vm2685_vm3 = vcmask 294144  }
  0x4e   : > { %514 = vst.msk [vmem:[#allocation3 + $0x31] sm:$0xff] %vm358_vm0, %v481_v1  ;;  %515 = vst.msk [vmem:[#allocation3 + $0x39] sm:$0xff] %vm358_vm0, %v482_v2  ;;  %v415_v1 = vld [vmem:[%s6274_s17 + $0x8] sm:$0xff]  ;;  %v420_v2 = vld [vmem:[%s6274_s17 + $0x30] sm:$0xff] }
  0x4f   : > { %512 = vst.msk [vmem:[#allocation3 + $0x19] sm:$0xff] %vm358_vm0, %v479_v3  ;;  %513 = vst.msk [vmem:[#allocation3 + $0x21] sm:$0xff] %vm358_vm0, %v480_v4  ;;  %v421_v3 = vld [vmem:[%s6274_s17 + $0x38] sm:$0xff]  ;;  %v418_v4 = vld [vmem:[%s6274_s17 + $0x20] sm:$0xff] }
  0x50   : > { %516 = vst.msk [vmem:[#allocation3 + $0x49] sm:$0xff] %vm358_vm0, %v483_v5  ;;  %517 = vst.msk [vmem:[#allocation3 + $0x51] sm:$0xff] %vm358_vm0, %v484_v6  ;;  %v419_v5 = vld [vmem:[%s6274_s17 + $0x28] sm:$0xff]  ;;  %v424_v6 = vld [vmem:[%s6274_s17 + $0x50] sm:$0xff] }
  0x51   : > { %518 = vst.msk [vmem:[#allocation3 + $0x61] sm:$0xff] %vm358_vm0, %v485_v9  ;;  %519 = vst.msk [vmem:[#allocation3 + $0x69] sm:$0xff] %vm358_vm0, %v486_v11  ;;  %v428_v11 = vld [vmem:[%s6274_s17 + $0x70] sm:$0xff] }
  0x52   : > { %520 = vst.msk [vmem:[#allocation3 + $0x79] sm:$0xff] %vm358_vm0, %v487_v12  ;;  %521 = vst.msk [vmem:[#allocation3 + $0x81] sm:$0xff] %vm358_vm0, %v488_v13  ;;  %v429_v12 = vld [vmem:[%s6274_s17 + $0x78] sm:$0xff] }
  0x53   : > { %522 = vst.msk [vmem:[#allocation3 + $0x91] sm:$0xff] %vm358_vm0, %v489_v14  ;;  %523 = vst.msk [vmem:[#allocation3 + $0x99] sm:$0xff] %vm358_vm0, %v490_v15 }
  0x54   : > { %524 = vst.msk [vmem:[#allocation3 + $0xa9] sm:$0xff] %vm358_vm0, %v491_v16  ;;  %525 = vst.msk [vmem:[#allocation3 + $0xb1] sm:$0xff] %vm358_vm0, %v492_v17 }
  0x55   : > { %526 = vst.msk [vmem:[#allocation3 + $0xc1] sm:$0xff] %vm358_vm0, %v493_v18  ;;  %527 = vst.msk [vmem:[#allocation3 + $0xc9] sm:$0xff] %vm358_vm0, %v494_v19  ;;  %v612_v26 = vld [vmem:[#allocation3 + $0x30] sm:$0xff]  ;;  %v613_v27 = vld [vmem:[#allocation3 + $0x38] sm:$0xff] }
  0x56   : > { %528 = vst.msk [vmem:[#allocation3 + $0xd9] sm:$0xff] %vm358_vm0, %v495_v20  ;;  %529 = vst.msk [vmem:[#allocation3 + $0xe1] sm:$0xff] %vm358_vm0, %v496_v21  ;;  %v610_v28 = vld [vmem:[#allocation3 + $0x18] sm:$0xff]  ;;  %v642_v29 = vpack.c.bf16 %v613_v27, %v612_v26  ;;  %v611_v30 = vld [vmem:[#allocation3 + $0x20] sm:$0xff] }
  0x57   : > { %530 = vst.msk [vmem:[#allocation3 + $0xf1] sm:$0xff] %vm358_vm0, %v497_v22  ;;  %531 = vst.msk [vmem:[#allocation3 + $0xf9] sm:$0xff] %vm358_vm0, %v498_v23  ;;  %v614_v31 = vld [vmem:[#allocation3 + $0x48] sm:$0xff]  ;;  %v615_v32 = vld [vmem:[#allocation3 + $0x50] sm:$0xff]  ;;  %v641_v33 = vpack.c.bf16 %v611_v30, %v610_v28 }
  0x58   : > { %532 = vst.msk [vmem:[#allocation3 + $0x109] sm:$0xff] %vm358_vm0, %v499_v24  ;;  %533 = vst.msk [vmem:[#allocation3 + $0x111] sm:$0xff] %vm358_vm0, %v500_v25  ;;  %v616_v34 = vld [vmem:[#allocation3 + $0x60] sm:$0xff]  ;;  %676 = vrot.lane.b32.xlu1 %v642_v29, %s5887_s14  ;;  %v643_v37 = vpack.c.bf16 %v615_v32, %v614_v31  ;;  %v617_v38 = vld [vmem:[#allocation3 + $0x68] sm:$0xff] }
  0x59   : > { %534 = vst.msk [vmem:[#allocation3 + $0x121] sm:$0xff] %vm358_vm0, %v501_v35  ;;  %535 = vst.msk [vmem:[#allocation3 + $0x129] sm:$0xff] %vm358_vm0, %v502_v36  ;;  %674 = vrot.lane.b32.xlu0 %v641_v33, %s5887_s14  ;;  %v644_v39 = vpack.c.bf16 %v617_v38, %v616_v34  ;;  %v618_v40 = vld [vmem:[#allocation3 + $0x78] sm:$0xff]  ;;  %v619_v41 = vld [vmem:[#allocation3 + $0x80] sm:$0xff] }
  0x5a   : > { %v620_v42 = vld [vmem:[#allocation3 + $0x90] sm:$0xff]  ;;  %v621_v43 = vld [vmem:[#allocation3 + $0x98] sm:$0xff]  ;;  %v645_v45 = vpack.c.bf16 %v619_v41, %v618_v40  ;;  %536 = vst.msk [vmem:[#allocation3 + $0x139] sm:$0xff] %vm358_vm0, %v503_v50  ;;  %537 = vst.msk [vmem:[#allocation3 + $0x141] sm:$0xff] %vm358_vm0, %v504_v51 }
  0x5b   : > { %v622_v44 = vld [vmem:[#allocation3 + $0xa8] sm:$0xff]  ;;  %v623_v46 = vld [vmem:[#allocation3 + $0xb0] sm:$0xff]  ;;  %v646_v49 = vpack.c.bf16 %v621_v43, %v620_v42  ;;  %538 = vst.msk [vmem:[#allocation3 + $0x151] sm:$0xff] %vm358_vm0, %v505_v52  ;;  %539 = vst.msk [vmem:[#allocation3 + $0x159] sm:$0xff] %vm358_vm0, %v506_v53 }
  0x5c   : > { %678 = vrot.lane.b32.xlu1 %v643_v37, %s5887_s14  ;;  %v624_v47 = vld [vmem:[#allocation3 + $0xc0] sm:$0xff]  ;;  %v625_v48 = vld [vmem:[#allocation3 + $0xc8] sm:$0xff]  ;;  %540 = vst.msk [vmem:[#allocation3 + $0x169] sm:$0xff] %vm358_vm0, %v507_v54  ;;  %541 = vst.msk [vmem:[#allocation3 + $0x171] sm:$0xff] %vm358_vm0, %v508_v55  ;;  %v647_v58 = vpack.c.bf16 %v623_v46, %v622_v44 }
  0x5d   : > { %680 = vrot.lane.b32.xlu0 %v644_v39, %s5887_s14  ;;  %v626_v56 = vld [vmem:[#allocation3 + $0xd8] sm:$0xff]  ;;  %v627_v57 = vld [vmem:[#allocation3 + $0xe0] sm:$0xff]  ;;  %v648_v63 = vpack.c.bf16 %v625_v48, %v624_v47  ;;  %449 = vst.msk [vmem:[#allocation2 + $0x31] sm:$0xff] %vm302_vm2, %v416_v61  ;;  %450 = vst.msk [vmem:[#allocation2 + $0x39] sm:$0xff] %vm302_vm2, %v417_v62 }
  0x5e   : > { %v628_v59 = vld [vmem:[#allocation3 + $0xf0] sm:$0xff]  ;;  %v629_v60 = vld [vmem:[#allocation3 + $0xf8] sm:$0xff]  ;;  %447 = vst.msk [vmem:[#allocation2 + $0x19] sm:$0xff] %vm302_vm2, %v414_v0  ;;  %448 = vst.msk [vmem:[#allocation2 + $0x21] sm:$0xff] %vm302_vm2, %v415_v1  ;;  %v649_v9 = vpack.c.bf16 %v627_v57, %v626_v56 }
  0x5f   : > { %453 = vst.msk [vmem:[#allocation2 + $0x61] sm:$0xff] %vm302_vm2, %v420_v2  ;;  %454 = vst.msk [vmem:[#allocation2 + $0x69] sm:$0xff] %vm302_vm2, %v421_v3  ;;  %v650_v13 = vpack.c.bf16 %v629_v60, %v628_v59  ;;  %v630_v14 = vld [vmem:[#allocation3 + $0x108] sm:$0xff]  ;;  %v631_v15 = vld [vmem:[#allocation3 + $0x110] sm:$0xff] }
  0x60   : > { %682 = vrot.lane.b32.xlu1 %v645_v45, %s5887_s14  ;;  %451 = vst.msk [vmem:[#allocation2 + $0x49] sm:$0xff] %vm302_vm2, %v418_v4  ;;  %452 = vst.msk [vmem:[#allocation2 + $0x51] sm:$0xff] %vm302_vm2, %v419_v5  ;;  %v632_v16 = vld [vmem:[#allocation3 + $0x120] sm:$0xff]  ;;  %v633_v17 = vld [vmem:[#allocation3 + $0x128] sm:$0xff]  ;;  %v651_v21 = vpack.c.bf16 %v631_v15, %v630_v14 }
  0x61   : > { %684 = vrot.lane.b32.xlu0 %v646_v49, %s5887_s14  ;;  %457 = vst.msk [vmem:[#allocation2 + $0x91] sm:$0xff] %vm302_vm2, %v424_v6  ;;  %458 = vst.msk [vmem:[#allocation2 + $0x99] sm:$0xff] %vm302_vm2, %v425_v7  ;;  %v426_v18 = vld [vmem:[%s6274_s17 + $0x60] sm:$0xff]  ;;  %v427_v19 = vld [vmem:[%s6274_s17 + $0x68] sm:$0xff]  ;;  %v652_v23 = vpack.c.bf16 %v633_v17, %v632_v16 }
  0x62   : > { %455 = vst.msk [vmem:[#allocation2 + $0x79] sm:$0xff] %vm302_vm2, %v422_v8  ;;  %456 = vst.msk [vmem:[#allocation2 + $0x81] sm:$0xff] %vm302_vm2, %v423_v10  ;;  %v432_v20 = vld [vmem:[%s6274_s17 + $0x90] sm:$0xff]  ;;  %v433_v22 = vld [vmem:[%s6274_s17 + $0x98] sm:$0xff] }
  0x63   : > { %461 = vst.msk [vmem:[#allocation2 + $0xc1] sm:$0xff] %vm302_vm2, %v428_v11  ;;  %462 = vst.msk [vmem:[#allocation2 + $0xc9] sm:$0xff] %vm302_vm2, %v429_v12  ;;  %v634_v24 = vld [vmem:[#allocation3 + $0x138] sm:$0xff]  ;;  %v635_v25 = vld [vmem:[#allocation3 + $0x140] sm:$0xff] }
  0x64   : > { %686 = vrot.lane.b32.xlu1 %v647_v58, %s5887_s14  ;;  %459 = vst.msk [vmem:[#allocation2 + $0xa9] sm:$0xff] %vm302_vm2, %v426_v18  ;;  %460 = vst.msk [vmem:[#allocation2 + $0xb1] sm:$0xff] %vm302_vm2, %v427_v19  ;;  %v636_v26 = vld [vmem:[#allocation3 + $0x150] sm:$0xff]  ;;  %v637_v27 = vld [vmem:[#allocation3 + $0x158] sm:$0xff]  ;;  %v653_v28 = vpack.c.bf16 %v635_v25, %v634_v24 }
  0x65   : > { %688 = vrot.lane.b32.xlu0 %v648_v63, %s5887_s14  ;;  %465 = vst.msk [vmem:[#allocation2 + $0xf1] sm:$0xff] %vm302_vm2, %v432_v20  ;;  %466 = vst.msk [vmem:[#allocation2 + $0xf9] sm:$0xff] %vm302_vm2, %v433_v22  ;;  %v638_v29 = vld [vmem:[#allocation3 + $0x168] sm:$0xff]  ;;  %v639_v30 = vld [vmem:[#allocation3 + $0x170] sm:$0xff]  ;;  %v654_v33 = vpack.c.bf16 %v637_v27, %v636_v26 }
  0x66   : > { %v737_v31 = vld [vmem:[#allocation2 + $0x1] sm:$0xff]  ;;  %v738_v32 = vld [vmem:[#allocation2 + $0x9] sm:$0xff]  ;;  %v437_v37 = vld [vmem:[%s6274_s17 + $0xb8] sm:$0xff]  ;;  %v655_v40 = vpack.c.bf16 %v639_v30, %v638_v29 }
  0x67   : > { %v430_v34 = vld [vmem:[%s6274_s17 + $0x80] sm:$0xff]  ;;  %v431_v35 = vld [vmem:[%s6274_s17 + $0x88] sm:$0xff]  ;;  %v436_v36 = vld [vmem:[%s6274_s17 + $0xb0] sm:$0xff]  ;;  %470 = vst.msk [vmem:[#allocation2 + $0x129] sm:$0xff] %vm302_vm2, %v437_v37  ;;  %v769_v45 = vpack.c.bf16 %v738_v32, %v737_v31 }
  0x68   : > { %690 = vrot.lane.b32.xlu1 %v649_v9, %s5887_s14  ;;  %463 = vst.msk [vmem:[#allocation2 + $0xd9] sm:$0xff] %vm302_vm2, %v430_v34  ;;  %464 = vst.msk [vmem:[#allocation2 + $0xe1] sm:$0xff] %vm302_vm2, %v431_v35  ;;  %v434_v38 = vld [vmem:[%s6274_s17 + $0xa0] sm:$0xff]  ;;  %v435_v39 = vld [vmem:[%s6274_s17 + $0xa8] sm:$0xff] }
  0x69   : > { %692 = vrot.lane.b32.xlu0 %v650_v13, %s5887_s14  ;;  %469 = vst.msk [vmem:[#allocation2 + $0x121] sm:$0xff] %vm302_vm2, %v436_v36  ;;  %467 = vst.msk [vmem:[#allocation2 + $0x109] sm:$0xff] %vm302_vm2, %v434_v38  ;;  %v741_v41 = vld [vmem:[#allocation2 + $0x31] sm:$0xff]  ;;  %v739_v42 = vld [vmem:[#allocation2 + $0x19] sm:$0xff] }
  0x6a   : > { %468 = vst.msk [vmem:[#allocation2 + $0x111] sm:$0xff] %vm302_vm2, %v435_v39  ;;  %v440_v43 = vld [vmem:[%s6274_s17 + $0xd0] sm:$0xff]  ;;  %v441_v44 = vld [vmem:[%s6274_s17 + $0xd8] sm:$0xff]  ;;  %v740_v46 = vld [vmem:[#allocation2 + $0x21] sm:$0xff] }
  0x6b   : > { %473 = vst.msk [vmem:[#allocation2 + $0x151] sm:$0xff] %vm302_vm2, %v440_v43  ;;  %474 = vst.msk [vmem:[#allocation2 + $0x159] sm:$0xff] %vm302_vm2, %v441_v44  ;;  %v438_v47 = vld [vmem:[%s6274_s17 + $0xc0] sm:$0xff]  ;;  %v439_v48 = vld [vmem:[%s6274_s17 + $0xc8] sm:$0xff]  ;;  %v770_v52 = vpack.c.bf16 %v740_v46, %v739_v42 }
  0x6c   : > { %694 = vrot.lane.b32.xlu1 %v651_v21, %s5887_s14  ;;  %v742_v49 = vld [vmem:[#allocation2 + $0x39] sm:$0xff]  ;;  %471 = vst.msk [vmem:[#allocation2 + $0x139] sm:$0xff] %vm302_vm2, %v438_v47  ;;  %472 = vst.msk [vmem:[#allocation2 + $0x141] sm:$0xff] %vm302_vm2, %v439_v48  ;;  %v443_v51 = vld [vmem:[%s6274_s17 + $0xe8] sm:$0xff] }
  0x6d   : > { %696 = vrot.lane.b32.xlu0 %v652_v23, %s5887_s14  ;;  %v442_v50 = vld [vmem:[%s6274_s17 + $0xe0] sm:$0xff]  ;;  %476 = vst.msk [vmem:[#allocation2 + $0x171] sm:$0xff] %vm302_vm2, %v443_v51  ;;  %v771_v53 = vpack.c.bf16 %v742_v49, %v741_v41  ;;  %v743_v54 = vld [vmem:[#allocation2 + $0x49] sm:$0xff]  ;;  %v744_v55 = vld [vmem:[#allocation2 + $0x51] sm:$0xff] }
  0x6e   : > { %475 = vst.msk [vmem:[#allocation2 + $0x169] sm:$0xff] %vm302_vm2, %v442_v50  ;;  %v745_v56 = vld [vmem:[#allocation2 + $0x61] sm:$0xff]  ;;  %v746_v57 = vld [vmem:[#allocation2 + $0x69] sm:$0xff]  ;;  %v772_v58 = vpack.c.bf16 %v744_v55, %v743_v54  ;;  %v747_v60 = vld [vmem:[#allocation2 + $0x79] sm:$0xff] }
  0x6f   : > { %v773_v59 = vpack.c.bf16 %v746_v57, %v745_v56  ;;  %v748_v61 = vld [vmem:[#allocation2 + $0x81] sm:$0xff]  ;;  %v749_v62 = vld [vmem:[#allocation2 + $0x91] sm:$0xff]  ;;  %v750_v63 = vld [vmem:[#allocation2 + $0x99] sm:$0xff] }
  0x70   : > { %698 = vrot.lane.b32.xlu1 %v653_v28, %s5887_s14  ;;  %v774_v0 = vpack.c.bf16 %v748_v61, %v747_v60  ;;  %v775_v1 = vpack.c.bf16 %v750_v63, %v749_v62  ;;  %v751_v2 = vld [vmem:[#allocation2 + $0xa9] sm:$0xff]  ;;  %v752_v3 = vld [vmem:[#allocation2 + $0xb1] sm:$0xff]  ;;  %v753_v4 = vld [vmem:[#allocation2 + $0xc1] sm:$0xff] }
  0x71   : > { %700 = vrot.lane.b32.xlu0 %v654_v33, %s5887_s14  ;;  %v754_v5 = vld [vmem:[#allocation2 + $0xc9] sm:$0xff]  ;;  %v776_v6 = vpack.c.bf16 %v752_v3, %v751_v2  ;;  %v755_v8 = vld [vmem:[#allocation2 + $0xd9] sm:$0xff]  ;;  %v756_v9 = vld [vmem:[#allocation2 + $0xe1] sm:$0xff] }
  0x72   : > { %v777_v7 = vpack.c.bf16 %v754_v5, %v753_v4  ;;  %v757_v10 = vld [vmem:[#allocation2 + $0xf1] sm:$0xff]  ;;  %v758_v11 = vld [vmem:[#allocation2 + $0xf9] sm:$0xff]  ;;  %v778_v12 = vpack.c.bf16 %v756_v9, %v755_v8  ;;  %v759_v14 = vld [vmem:[#allocation2 + $0x109] sm:$0xff] }
  0x73   : > { %v779_v13 = vpack.c.bf16 %v758_v11, %v757_v10  ;;  %v760_v15 = vld [vmem:[#allocation2 + $0x111] sm:$0xff]  ;;  %v761_v16 = vld [vmem:[#allocation2 + $0x121] sm:$0xff]  ;;  %v762_v17 = vld [vmem:[#allocation2 + $0x129] sm:$0xff] }
  0x74   : > { %702 = vrot.lane.b32.xlu1 %v655_v40, %s5887_s14  ;;  %v544_v18 = vld [vmem:[#allocation2] sm:$0xff]  ;;  %v545_v19 = vld [vmem:[#allocation2 + $0x8] sm:$0xff]  ;;  %v780_v20 = vpack.c.bf16 %v760_v15, %v759_v14  ;;  %v781_v24 = vpack.c.bf16 %v762_v17, %v761_v16  ;;  %v548_v25 = vld [vmem:[#allocation2 + $0x30] sm:$0xff] }
  0x75   : > { %801 = vrot.lane.b32.xlu0 %v769_v45, %s5888_s18  ;;  %v763_v21 = vld [vmem:[#allocation2 + $0x139] sm:$0xff]  ;;  %v764_v22 = vld [vmem:[#allocation2 + $0x141] sm:$0xff]  ;;  %v576_v23 = vpack.c.bf16 %v545_v19, %v544_v18  ;;  %v765_v28 = vld [vmem:[#allocation2 + $0x151] sm:$0xff] }
  0x76   : > { %v549_v26 = vld [vmem:[#allocation2 + $0x38] sm:$0xff]  ;;  %v547_v31 = vld [vmem:[#allocation2 + $0x20] sm:$0xff]  ;;  %v550_v33 = vld [vmem:[#allocation2 + $0x48] sm:$0xff]  ;;  %v782_v34 = vpack.c.bf16 %v764_v22, %v763_v21 }
  0x77   : > { %v546_v27 = vld [vmem:[#allocation2 + $0x18] sm:$0xff]  ;;  %592 = vst.msk [vmem:[#allocation4] sm:$0xff] %vm302_vm2, %v576_v23  ;;  %v6368_v30 = vpack.c.bf16 %v549_v26, %v548_v25  ;;  %v551_v35 = vld [vmem:[#allocation2 + $0x50] sm:$0xff]  ;;  %v552_v36 = vld [vmem:[#allocation2 + $0x60] sm:$0xff] }
  0x78   : > { %803 = vrot.lane.b32.xlu1 %v770_v52, %s5888_s18  ;;  %v766_v29 = vld [vmem:[#allocation2 + $0x159] sm:$0xff]  ;;  %v6370_v32 = vpack.c.bf16 %v547_v31, %v546_v27  ;;  %v553_v37 = vld [vmem:[#allocation2 + $0x68] sm:$0xff]  ;;  %v866_v39 = vld [vmem:[#allocation3 + $0x1] sm:$0xff]  ;;  %v6378_v42 = vpack.c.bf16 %v551_v35, %v550_v33 }
  0x79   : > { %805 = vrot.lane.b32.xlu0 %v771_v53, %s5888_s18  ;;  %594 = vst.msk [vmem:[#allocation4 + $0x30] sm:$0xff] %vm302_vm2, %v6368_v30  ;;  %v783_v38 = vpack.c.bf16 %v766_v29, %v765_v28  ;;  %v767_v40 = vld [vmem:[#allocation2 + $0x169] sm:$0xff]  ;;  %v768_v41 = vld [vmem:[#allocation2 + $0x171] sm:$0xff]  ;;  %v6380_v43 = vpack.c.bf16 %v553_v37, %v552_v36  ;;  %v867_v44 = vld [vmem:[#allocation3 + $0x9] sm:$0xff] }
  0x7a   : > { %593 = vst.msk [vmem:[#allocation4 + $0x18] sm:$0xff] %vm302_vm2, %v6370_v32  ;;  %v554_v45 = vld [vmem:[#allocation2 + $0x78] sm:$0xff]  ;;  %v555_v46 = vld [vmem:[#allocation2 + $0x80] sm:$0xff]  ;;  %595 = vst.msk [vmem:[#allocation4 + $0x48] sm:$0xff] %vm302_vm2, %v6378_v42  ;;  %v784_v50 = vpack.c.bf16 %v768_v41, %v767_v40  ;;  %v898_v54 = vpack.c.bf16 %v867_v44, %v866_v39 }
  0x7b   : > { %596 = vst.msk [vmem:[#allocation4 + $0x60] sm:$0xff] %vm302_vm2, %v6380_v43  ;;  %v6386_v47 = vpack.c.bf16 %v555_v46, %v554_v45  ;;  %v556_v48 = vld [vmem:[#allocation2 + $0x90] sm:$0xff]  ;;  %v557_v49 = vld [vmem:[#allocation2 + $0x98] sm:$0xff]  ;;  %v558_v55 = vld [vmem:[#allocation2 + $0xa8] sm:$0xff] }
  0x7c   : > { %807 = vrot.lane.b32.xlu1 %v772_v58, %s5888_s18  ;;  %v868_v51 = vld [vmem:[#allocation3 + $0x19] sm:$0xff]  ;;  %v869_v52 = vld [vmem:[#allocation3 + $0x21] sm:$0xff]  ;;  %v6389_v53 = vpack.c.bf16 %v557_v49, %v556_v48  ;;  %v560_v57 = vld [vmem:[#allocation2 + $0xc0] sm:$0xff] }
  0x7d   : > { %809 = vrot.lane.b32.xlu0 %v773_v59, %s5888_s18  ;;  %597 = vst.msk [vmem:[#allocation4 + $0x78] sm:$0xff] %vm302_vm2, %v6386_v47  ;;  %v559_v56 = vld [vmem:[#allocation2 + $0xb0] sm:$0xff]  ;;  %v870_v58 = vld [vmem:[#allocation3 + $0x31] sm:$0xff]  ;;  %v562_v63 = vld [vmem:[#allocation2 + $0xd8] sm:$0xff] }
  0x7e   : > { %v871_v59 = vld [vmem:[#allocation3 + $0x39] sm:$0xff]  ;;  %598 = vst.msk [vmem:[#allocation4 + $0x90] sm:$0xff] %vm302_vm2, %v6389_v53  ;;  %v6396_v60 = vpack.c.bf16 %v559_v56, %v558_v55  ;;  %v565_v3 = vld [vmem:[#allocation2 + $0xf8] sm:$0xff]  ;;  %v568_v14 = vld [vmem:[#allocation2 + $0x120] sm:$0xff] }
  0x7f   : > { %v561_v61 = vld [vmem:[#allocation2 + $0xc8] sm:$0xff]  ;;  %v564_v2 = vld [vmem:[#allocation2 + $0xf0] sm:$0xff]  ;;  %v900_v4 = vpack.c.bf16 %v871_v59, %v870_v58  ;;  %v875_v10 = vld [vmem:[#allocation3 + $0x69] sm:$0xff] }
  0x80   : > { %811 = vrot.lane.b32.xlu1 %v774_v0, %s5888_s18  ;;  %v6398_v62 = vpack.c.bf16 %v561_v61, %v560_v57  ;;  %v899_v0 = vpack.c.bf16 %v869_v52, %v868_v51  ;;  %599 = vst.msk [vmem:[#allocation4 + $0xa8] sm:$0xff] %vm302_vm2, %v6396_v60  ;;  %v874_v5 = vld [vmem:[#allocation3 + $0x61] sm:$0xff]  ;;  %v6408_v9 = vpack.c.bf16 %v565_v3, %v564_v2  ;;  %v566_v11 = vld [vmem:[#allocation2 + $0x108] sm:$0xff]  ;;  %v571_v22 = vld [vmem:[#allocation2 + $0x140] sm:$0xff] }
  0x81   : > { %813 = vrot.lane.b32.xlu0 %v775_v1, %s5888_s18  ;;  %v563_v1 = vld [vmem:[#allocation2 + $0xe0] sm:$0xff]  ;;  %v569_v15 = vld [vmem:[#allocation2 + $0x128] sm:$0xff]  ;;  %v877_v18 = vld [vmem:[#allocation3 + $0x81] sm:$0xff] }
  0x82   : > { %600 = vst.msk [vmem:[#allocation4 + $0xc0] sm:$0xff] %vm302_vm2, %v6398_v62  ;;  %v6406_v8 = vpack.c.bf16 %v563_v1, %v562_v63  ;;  %602 = vst.msk [vmem:[#allocation4 + $0xf0] sm:$0xff] %vm302_vm2, %v6408_v9  ;;  %v876_v17 = vld [vmem:[#allocation3 + $0x79] sm:$0xff]  ;;  %v6417_v19 = vpack.c.bf16 %v569_v15, %v568_v14  ;;  %v570_v21 = vld [vmem:[#allocation2 + $0x138] sm:$0xff] }
  0x83   : > { %v572_v23 = vld [vmem:[#allocation2 + $0x150] sm:$0xff]  ;;  %v6424_v26 = vpack.c.bf16 %v571_v22, %v570_v21  ;;  %v573_v27 = vld [vmem:[#allocation2 + $0x158] sm:$0xff]  ;;  %v574_v29 = vld [vmem:[#allocation2 + $0x168] sm:$0xff]  ;;  %v903_v31 = vpack.c.bf16 %v877_v18, %v876_v17 }
  0x84   : > { %815 = vrot.lane.b32.xlu1 %v776_v6, %s5888_s18  ;;  %v872_v6 = vld [vmem:[#allocation3 + $0x49] sm:$0xff]  ;;  %601 = vst.msk [vmem:[#allocation4 + $0xd8] sm:$0xff] %vm302_vm2, %v6406_v8  ;;  %v879_v25 = vld [vmem:[#allocation3 + $0x99] sm:$0xff]  ;;  %604 = vst.msk [vmem:[#allocation4 + $0x120] sm:$0xff] %vm302_vm2, %v6417_v19  ;;  %v6426_v28 = vpack.c.bf16 %v573_v27, %v572_v23 }
  0x85   : > { %817 = vrot.lane.b32.xlu0 %v777_v7, %s5888_s18  ;;  %v873_v7 = vld [vmem:[#allocation3 + $0x51] sm:$0xff]  ;;  %605 = vst.msk [vmem:[#allocation4 + $0x138] sm:$0xff] %vm302_vm2, %v6424_v26  ;;  %v575_v33 = vld [vmem:[#allocation2 + $0x170] sm:$0xff]  ;;  %v880_v35 = vld [vmem:[#allocation3 + $0xa9] sm:$0xff] }
  0x86   : > { %v901_v16 = vpack.c.bf16 %v873_v7, %v872_v6  ;;  %v881_v36 = vld [vmem:[#allocation3 + $0xb1] sm:$0xff]  ;;  %606 = vst.msk [vmem:[#allocation4 + $0x150] sm:$0xff] %vm302_vm2, %v6426_v28  ;;  %v6434_v37 = vpack.c.bf16 %v575_v33, %v574_v29  ;;  %v883_v39 = vld [vmem:[#allocation3 + $0xc9] sm:$0xff]  ;;  %v884_v44 = vld [vmem:[#allocation3 + $0xd9] sm:$0xff] }
  0x87   : > { %v905_v40 = vpack.c.bf16 %v881_v36, %v880_v35  ;;  %v885_v45 = vld [vmem:[#allocation3 + $0xe1] sm:$0xff]  ;;  %v886_v48 = vld [vmem:[#allocation3 + $0xf1] sm:$0xff]  ;;  %v887_v49 = vld [vmem:[#allocation3 + $0xf9] sm:$0xff] }
  0x88   : > { %819 = vrot.lane.b32.xlu1 %v778_v12, %s5888_s18  ;;  %v567_v12 = vld [vmem:[#allocation2 + $0x110] sm:$0xff]  ;;  %607 = vst.msk [vmem:[#allocation4 + $0x168] sm:$0xff] %vm302_vm2, %v6434_v37  ;;  %v907_v51 = vpack.c.bf16 %v885_v45, %v884_v44  ;;  %v908_v52 = vpack.c.bf16 %v887_v49, %v886_v48  ;;  %v889_v55 = vld [vmem:[#allocation3 + $0x111] sm:$0xff]  ;;  %v891_v57 = vld [vmem:[#allocation3 + $0x129] sm:$0xff] }
  0x89   : > { %821 = vrot.lane.b32.xlu0 %v779_v13, %s5888_s18  ;;  %v6414_v13 = vpack.c.bf16 %v567_v12, %v566_v11  ;;  %v444_v46 = vld [vmem:[%s6274_s17 + $0xf0] sm:$0xff]  ;;  %v896_v2 = vld [vmem:[#allocation3 + $0x169] sm:$0xff]  ;;  %v897_v3 = vld [vmem:[#allocation3 + $0x171] sm:$0xff] }
  0x8a   : > { %477 = vst.msk [vmem:[#allocation2 + $0x181] sm:$0xff] %vm302_vm2, %v444_v46  ;;  %v890_v56 = vld [vmem:[#allocation3 + $0x121] sm:$0xff]  ;;  %v892_v59 = vld [vmem:[#allocation3 + $0x139] sm:$0xff]  ;;  %v997_v12 = vld [vmem:[#allocation2 + $0x1a] sm:$0xff]  ;;  %v913_v15 = vpack.c.bf16 %v897_v3, %v896_v2 }
  0x8b   : > { %603 = vst.msk [vmem:[#allocation4 + $0x108] sm:$0xff] %vm302_vm2, %v6414_v13  ;;  %v910_v61 = vpack.c.bf16 %v891_v57, %v890_v56  ;;  %v893_v63 = vld [vmem:[#allocation3 + $0x141] sm:$0xff]  ;;  %v895_v1 = vld [vmem:[#allocation3 + $0x159] sm:$0xff]  ;;  %v1000_v18 = vld [vmem:[#allocation2 + $0x3a] sm:$0xff] }
  0x8c   : > { %823 = vrot.lane.b32.xlu1 %v780_v20, %s5888_s18  ;;  %v902_v20 = vpack.c.bf16 %v875_v10, %v874_v5  ;;  %v911_v5 = vpack.c.bf16 %v893_v63, %v892_v59  ;;  %v510_v6 = vld [vmem:[%s6212_s13 + $0xf8] sm:$0xff]  ;;  %v995_v10 = vld [vmem:[#allocation2 + $0x2] sm:$0xff]  ;;  %v996_v11 = vld [vmem:[#allocation2 + $0xa] sm:$0xff] }
  0x8d   : > { %825 = vrot.lane.b32.xlu0 %v781_v24, %s5888_s18  ;;  %v878_v24 = vld [vmem:[#allocation3 + $0x91] sm:$0xff]  ;;  %543 = vst.msk [vmem:[#allocation3 + $0x189] sm:$0xff] %vm358_vm0, %v510_v6  ;;  %v999_v17 = vld [vmem:[#allocation2 + $0x32] sm:$0xff]  ;;  %v1009_v36 = vld [vmem:[#allocation2 + $0xaa] sm:$0xff] }
  0x8e   : > { %v998_v14 = vld [vmem:[#allocation2 + $0x22] sm:$0xff]  ;;  %v1002_v22 = vld [vmem:[#allocation2 + $0x52] sm:$0xff]  ;;  %v1029_v23 = vpack.c.bf16 %v1000_v18, %v999_v17  ;;  %v1005_v27 = vld [vmem:[#allocation2 + $0x7a] sm:$0xff] }
  0x8f   : > { %v1028_v21 = vpack.c.bf16 %v998_v14, %v997_v12  ;;  %v1006_v29 = vld [vmem:[#allocation2 + $0x82] sm:$0xff]  ;;  %v1008_v35 = vld [vmem:[#allocation2 + $0x9a] sm:$0xff]  ;;  %v1012_v44 = vld [vmem:[#allocation2 + $0xca] sm:$0xff] }
  0x90   : > { %827 = vrot.lane.b32.xlu1 %v782_v34, %s5888_s18  ;;  %v904_v34 = vpack.c.bf16 %v879_v25, %v878_v24  ;;  %v1003_v24 = vld [vmem:[#allocation2 + $0x62] sm:$0xff]  ;;  %v1004_v25 = vld [vmem:[#allocation2 + $0x6a] sm:$0xff]  ;;  %v1013_v45 = vld [vmem:[#allocation2 + $0xda] sm:$0xff] }
  0x91   : > { %829 = vrot.lane.b32.xlu0 %v783_v38, %s5888_s18  ;;  %v882_v38 = vld [vmem:[#allocation3 + $0xc1] sm:$0xff]  ;;  %v1031_v33 = vpack.c.bf16 %v1004_v25, %v1003_v24  ;;  %v1014_v46 = vld [vmem:[#allocation2 + $0xe2] sm:$0xff] }
  0x92   : > { %v906_v41 = vpack.c.bf16 %v883_v39, %v882_v38  ;;  %v1010_v38 = vld [vmem:[#allocation2 + $0xb2] sm:$0xff]  ;;  %v1032_v39 = vpack.c.bf16 %v1006_v29, %v1005_v27  ;;  %v1020_v59 = vld [vmem:[#allocation2 + $0x12a] sm:$0xff]  ;;  %v1022_v63 = vld [vmem:[#allocation2 + $0x142] sm:$0xff] }
  0x93   : > { %v1034_v48 = vpack.c.bf16 %v1010_v38, %v1009_v36  ;;  %v1018_v57 = vld [vmem:[#allocation2 + $0x112] sm:$0xff]  ;;  %v1025_v6 = vld [vmem:[#allocation2 + $0x16a] sm:$0xff]  ;;  %v1133_v36 = vld [vmem:[#allocation3 + $0x6a] sm:$0xff] }
  0x94   : > { %831 = vrot.lane.b32.xlu1 %v784_v50, %s5888_s18  ;;  %v445_v50 = vld [vmem:[%s6274_s17 + $0xf8] sm:$0xff]  ;;  %v1129_v24 = vld [vmem:[#allocation3 + $0x3a] sm:$0xff]  ;;  %s5899_s17 = smov 64  }
  0x95   : > { %930 = vrot.lane.b32.xlu0 %v898_v54, %s5889_s19  ;;  %478 = vst.msk [vmem:[#allocation2 + $0x189] sm:$0xff] %vm302_vm2, %v445_v50  ;;  %v888_v54 = vld [vmem:[#allocation3 + $0x109] sm:$0xff] }
  0x96   : > { %v909_v58 = vpack.c.bf16 %v889_v55, %v888_v54  ;;  %v1015_v50 = vld [vmem:[#allocation2 + $0xf2] sm:$0xff]  ;;  %v673_v54 = vpop.permute.xlu0 %672  ;;  %v1036_v55 = vpack.c.bf16 %v1014_v46, %v1013_v45  ;;  %v1136_v46 = vld [vmem:[#allocation3 + $0x92] sm:$0xff] }
  0x97   : > { %721 = vst.msk [vmem:[#allocation4] sm:$0xff] %vm720_vm4, %v673_v54  ;;  %v1023_v3 = vld [vmem:[#allocation2 + $0x152] sm:$0xff]  ;;  %v1139_v54 = vld [vmem:[#allocation3 + $0xb2] sm:$0xff] }
  0x98   : > { %932 = vrot.lane.b32.xlu1 %v899_v0, %s5889_s19  ;;  %v894_v0 = vld [vmem:[#allocation3 + $0x151] sm:$0xff]  ;;  %v1124_v14 = vld [vmem:[#allocation3 + $0x2] sm:$0xff] }
  0x99   : > { %934 = vrot.lane.b32.xlu0 %v900_v4, %s5889_s19  ;;  %v509_v4 = vld [vmem:[%s6212_s13 + $0xf0] sm:$0xff]  ;;  %v912_v7 = vpack.c.bf16 %v895_v1, %v894_v0 }
  0x9a   : > { %542 = vst.msk [vmem:[#allocation3 + $0x181] sm:$0xff] %vm358_vm0, %v509_v4  ;;  %v1024_v4 = vld [vmem:[#allocation2 + $0x15a] sm:$0xff] }
  0x9c   : > { %936 = vrot.lane.b32.xlu1 %v901_v16, %s5889_s19  ;;  %v1027_v16 = vpack.c.bf16 %v996_v11, %v995_v10  ;;  %v1041_v11 = vpack.c.bf16 %v1024_v4, %v1023_v3  ;;  %v1145_v3 = vld [vmem:[#allocation3 + $0xfa] sm:$0xff] }
  0x9d   : > { %938 = vrot.lane.b32.xlu0 %v902_v20, %s5889_s19  ;;  %v1001_v20 = vld [vmem:[#allocation2 + $0x4a] sm:$0xff] }
  0xa0   : > { %940 = vrot.lane.b32.xlu1 %v903_v31, %s5889_s19  ;;  %v1030_v31 = vpack.c.bf16 %v1002_v22, %v1001_v20  ;;  %v1126_v20 = vld [vmem:[#allocation3 + $0x1a] sm:$0xff] }
  0xa1   : > { %942 = vrot.lane.b32.xlu0 %v904_v34, %s5889_s19  ;;  %v1007_v34 = vld [vmem:[#allocation2 + $0x92] sm:$0xff] }
  0xa4   : > { %944 = vrot.lane.b32.xlu1 %v905_v40, %s5889_s19  ;;  %v1033_v40 = vpack.c.bf16 %v1008_v35, %v1007_v34  ;;  %v1132_v35 = vld [vmem:[#allocation3 + $0x62] sm:$0xff] }
  0xa5   : > { %946 = vrot.lane.b32.xlu0 %v906_v41, %s5889_s19  ;;  %v1011_v41 = vld [vmem:[#allocation2 + $0xc2] sm:$0xff] }
  0xa6   : > { %v1035_v49 = vpack.c.bf16 %v1012_v44, %v1011_v41  ;;  %v1134_v41 = vld [vmem:[#allocation3 + $0x7a] sm:$0xff]  ;;  %v1135_v44 = vld [vmem:[#allocation3 + $0x82] sm:$0xff] }
  0xa8   : > { %948 = vrot.lane.b32.xlu1 %v907_v51, %s5889_s19  ;;  %v1016_v51 = vld [vmem:[#allocation2 + $0xfa] sm:$0xff] }
  0xa9   : > { %950 = vrot.lane.b32.xlu0 %v908_v52, %s5889_s19  ;;  %v1017_v52 = vld [vmem:[#allocation2 + $0x10a] sm:$0xff]  ;;  %v1037_v56 = vpack.c.bf16 %v1016_v51, %v1015_v50  ;;  %v1161_v50 = vpack.c.bf16 %v1135_v44, %v1134_v41 }
  0xaa   : > { %v1038_v0 = vpack.c.bf16 %v1018_v57, %v1017_v52  ;;  %v1138_v52 = vld [vmem:[#allocation3 + $0xaa] sm:$0xff] }
  0xab   : > { %v1141_v57 = vld [vmem:[#allocation3 + $0xca] sm:$0xff] }
  0xac   : > { %952 = vrot.lane.b32.xlu1 %v909_v58, %s5889_s19  ;;  %v1019_v58 = vld [vmem:[#allocation2 + $0x122] sm:$0xff] }
  0xad   : > { %954 = vrot.lane.b32.xlu0 %v910_v61, %s5889_s19  ;;  %v1021_v61 = vld [vmem:[#allocation2 + $0x13a] sm:$0xff]  ;;  %v1039_v1 = vpack.c.bf16 %v1020_v59, %v1019_v58  ;;  %v1163_v59 = vpack.c.bf16 %v1139_v54, %v1138_v52 }
  0xae   : > { %v1040_v10 = vpack.c.bf16 %v1022_v63, %v1021_v61  ;;  %v1142_v63 = vld [vmem:[#allocation3 + $0xda] sm:$0xff]  ;;  %v1402_v52 = vld [vmem:[#allocation3 + $0x48] sm:$0xff]  ;;  %v1403_v54 = vld [vmem:[#allocation3 + $0x50] sm:$0xff] }
  0xb0   : > { %956 = vrot.lane.b32.xlu1 %v911_v5, %s5889_s19 }
  0xb1   : > { %958 = vrot.lane.b32.xlu0 %v912_v7, %s5889_s19  ;;  %v1026_v7 = vld [vmem:[#allocation2 + $0x172] sm:$0xff] }
  0xb2   : > { %v1042_v17 = vpack.c.bf16 %v1026_v7, %v1025_v6  ;;  %v1146_v7 = vld [vmem:[#allocation3 + $0x10a] sm:$0xff] }
  0xb4   : > { %960 = vrot.lane.b32.xlu1 %v913_v15, %s5889_s19  ;;  %v1125_v15 = vld [vmem:[#allocation3 + $0xa] sm:$0xff] }
  0xb5   : > { %1059 = vrot.lane.b32.xlu0 %v1027_v16, %s5890_s20  ;;  %v1156_v18 = vpack.c.bf16 %v1125_v15, %v1124_v14  ;;  %v1149_v14 = vld [vmem:[#allocation3 + $0x12a] sm:$0xff] }
  0xb8   : > { %1061 = vrot.lane.b32.xlu1 %v1028_v21, %s5890_s20  ;;  %v1127_v21 = vld [vmem:[#allocation3 + $0x22] sm:$0xff] }
  0xb9   : > { %1063 = vrot.lane.b32.xlu0 %v1029_v23, %s5890_s20  ;;  %v1128_v23 = vld [vmem:[#allocation3 + $0x32] sm:$0xff]  ;;  %v1157_v27 = vpack.c.bf16 %v1127_v21, %v1126_v20  ;;  %v1151_v20 = vld [vmem:[#allocation3 + $0x142] sm:$0xff] }
  0xba   : > { %v1158_v29 = vpack.c.bf16 %v1129_v24, %v1128_v23  ;;  %v1153_v23 = vld [vmem:[#allocation3 + $0x15a] sm:$0xff] }
  0xbc   : > { %1065 = vrot.lane.b32.xlu1 %v1030_v31, %s5890_s20  ;;  %v1130_v31 = vld [vmem:[#allocation3 + $0x4a] sm:$0xff] }
  0xbd   : > { %1067 = vrot.lane.b32.xlu0 %v1031_v33, %s5890_s20  ;;  %v1131_v33 = vld [vmem:[#allocation3 + $0x52] sm:$0xff] }
  0xc0   : > { %1069 = vrot.lane.b32.xlu1 %v1032_v39, %s5890_s20  ;;  %v1159_v39 = vpack.c.bf16 %v1131_v33, %v1130_v31  ;;  %v1155_v31 = vld [vmem:[#allocation3 + $0x172] sm:$0xff] }
  0xc1   : > { %1071 = vrot.lane.b32.xlu0 %v1033_v40, %s5890_s20  ;;  %v1160_v40 = vpack.c.bf16 %v1133_v36, %v1132_v35 }
  0xc4   : > { %1073 = vrot.lane.b32.xlu1 %v1034_v48, %s5890_s20  ;;  %v1137_v48 = vld [vmem:[#allocation3 + $0x9a] sm:$0xff] }
  0xc5   : > { %1075 = vrot.lane.b32.xlu0 %v1035_v49, %s5890_s20  ;;  %v1162_v51 = vpack.c.bf16 %v1137_v48, %v1136_v46  ;;  %v1398_v48 = vld [vmem:[#allocation3 + $0x18] sm:$0xff] }
  0xc8   : > { %1077 = vrot.lane.b32.xlu1 %v1036_v55, %s5890_s20 }
  0xc9   : > { %1079 = vrot.lane.b32.xlu0 %v1037_v56, %s5890_s20  ;;  %v1140_v56 = vld [vmem:[#allocation3 + $0xc2] sm:$0xff] }
  0xca   : > { %v677_v2 = vpop.permute.xlu1 %676  ;;  %v1164_v61 = vpack.c.bf16 %v1141_v57, %v1140_v56  ;;  %v1405_v57 = vld [vmem:[#allocation3 + $0x68] sm:$0xff] }
  0xcb   : > { %723 = vst.msk [vmem:[#allocation4 + $0x30] sm:$0xff] %vm720_vm4, %v677_v2  ;;  %v675_v5 = vpop.permute.xlu0 %674  ;;  %v1144_v2 = vld [vmem:[#allocation3 + $0xf2] sm:$0xff] }
  0xcc   : > { %722 = vst.msk [vmem:[#allocation4 + $0x18] sm:$0xff] %vm720_vm4, %v675_v5  ;;  %1081 = vrot.lane.b32.xlu1 %v1038_v0, %s5890_s20  ;;  %v1143_v0 = vld [vmem:[#allocation3 + $0xe2] sm:$0xff]  ;;  %v1166_v6 = vpack.c.bf16 %v1145_v3, %v1144_v2  ;;  %v1408_v2 = vld [vmem:[#allocation3 + $0x90] sm:$0xff]  ;;  %v1409_v3 = vld [vmem:[#allocation3 + $0x98] sm:$0xff] }
  0xcd   : > { %1083 = vrot.lane.b32.xlu0 %v1039_v1, %s5890_s20  ;;  %v1165_v5 = vpack.c.bf16 %v1143_v0, %v1142_v63 }
  0xce   : > { %v679_v12 = vpop.permute.xlu1 %678 }
  0xcf   : > { %724 = vst.msk [vmem:[#allocation4 + $0x48] sm:$0xff] %vm720_vm4, %v679_v12  ;;  %v681_v16 = vpop.permute.xlu0 %680  ;;  %v1148_v12 = vld [vmem:[#allocation3 + $0x122] sm:$0xff] }
  0xd0   : > { %725 = vst.msk [vmem:[#allocation4 + $0x60] sm:$0xff] %vm720_vm4, %v681_v16  ;;  %1085 = vrot.lane.b32.xlu1 %v1040_v10, %s5890_s20  ;;  %v1147_v10 = vld [vmem:[#allocation3 + $0x112] sm:$0xff] }
  0xd1   : > { %1087 = vrot.lane.b32.xlu0 %v1041_v11, %s5890_s20  ;;  %v1167_v16 = vpack.c.bf16 %v1147_v10, %v1146_v7  ;;  %v6578_v10 = vpack.c.bf16 %v1409_v3, %v1408_v2  ;;  %v1536_v2 = vld [vmem:[#allocation2 + $0x81] sm:$0xff] }
  0xd2   : > { %v683_v22 = vpop.permute.xlu1 %682 }
  0xd3   : > { %726 = vst.msk [vmem:[#allocation4 + $0x78] sm:$0xff] %vm720_vm4, %v683_v22  ;;  %v685_v25 = vpop.permute.xlu0 %684  ;;  %v1152_v22 = vld [vmem:[#allocation3 + $0x152] sm:$0xff] }
  0xd4   : > { %727 = vst.msk [vmem:[#allocation4 + $0x90] sm:$0xff] %vm720_vm4, %v685_v25  ;;  %1089 = vrot.lane.b32.xlu1 %v1042_v17, %s5890_s20  ;;  %v1168_v17 = vpack.c.bf16 %v1149_v14, %v1148_v12  ;;  %v1412_v12 = vld [vmem:[#allocation3 + $0xc0] sm:$0xff]  ;;  %v1413_v14 = vld [vmem:[#allocation3 + $0xc8] sm:$0xff] }
  0xd5   : > { %1188 = vrot.lane.b32.xlu0 %v1156_v18, %s5891_s26  ;;  %v1150_v18 = vld [vmem:[#allocation3 + $0x13a] sm:$0xff] }
  0xd6   : > { %v687_v34 = vpop.permute.xlu1 %686  ;;  %v1169_v25 = vpack.c.bf16 %v1151_v20, %v1150_v18  ;;  %v6588_v20 = vpack.c.bf16 %v1413_v14, %v1412_v12  ;;  %v1539_v14 = vld [vmem:[#allocation2 + $0xa9] sm:$0xff] }
  0xd7   : > { %728 = vst.msk [vmem:[#allocation4 + $0xa8] sm:$0xff] %vm720_vm4, %v687_v34  ;;  %v689_v38 = vpop.permute.xlu0 %688 }
  0xd8   : > { %729 = vst.msk [vmem:[#allocation4 + $0xc0] sm:$0xff] %vm720_vm4, %v689_v38  ;;  %1190 = vrot.lane.b32.xlu1 %v1157_v27, %s5891_s26  ;;  %v1170_v27 = vpack.c.bf16 %v1153_v23, %v1152_v22  ;;  %v1416_v22 = vld [vmem:[#allocation3 + $0xf0] sm:$0xff]  ;;  %v1417_v23 = vld [vmem:[#allocation3 + $0xf8] sm:$0xff] }
  0xd9   : > { %1192 = vrot.lane.b32.xlu0 %v1158_v29, %s5891_s26  ;;  %v1154_v29 = vld [vmem:[#allocation3 + $0x16a] sm:$0xff] }
  0xda   : > { %v691_v45 = vpop.permute.xlu1 %690  ;;  %v1171_v35 = vpack.c.bf16 %v1155_v31, %v1154_v29  ;;  %v1439_v31 = vpack.c.bf16 %v1417_v23, %v1416_v22  ;;  %v1541_v22 = vld [vmem:[#allocation2 + $0xc1] sm:$0xff]  ;;  %v1542_v23 = vld [vmem:[#allocation2 + $0xc9] sm:$0xff] }
  0xdb   : > { %730 = vst.msk [vmem:[#allocation4 + $0xd8] sm:$0xff] %vm720_vm4, %v691_v45  ;;  %v693_v49 = vpop.permute.xlu0 %692 }
  0xdc   : > { %731 = vst.msk [vmem:[#allocation4 + $0xf0] sm:$0xff] %vm720_vm4, %v693_v49  ;;  %1194 = vrot.lane.b32.xlu1 %v1159_v39, %s5891_s26 }
  0xdd   : > { %1196 = vrot.lane.b32.xlu0 %v1160_v40, %s5891_s26 }
  0xde   : > { %v695_v55 = vpop.permute.xlu1 %694 }
  0xdf   : > { %732 = vst.msk [vmem:[#allocation4 + $0x108] sm:$0xff] %vm720_vm4, %v695_v55  ;;  %v697_v58 = vpop.permute.xlu0 %696 }
  0xe0   : > { %733 = vst.msk [vmem:[#allocation4 + $0x120] sm:$0xff] %vm720_vm4, %v697_v58  ;;  %1198 = vrot.lane.b32.xlu1 %v1161_v50, %s5891_s26  ;;  %v1400_v50 = vld [vmem:[#allocation3 + $0x30] sm:$0xff] }
  0xe1   : > { %1200 = vrot.lane.b32.xlu0 %v1162_v51, %s5891_s26 }
  0xe2   : > { %v699_v1 = vpop.permute.xlu1 %698 }
  0xe3   : > { %734 = vst.msk [vmem:[#allocation4 + $0x138] sm:$0xff] %vm720_vm4, %v699_v1  ;;  %v701_v4 = vpop.permute.xlu0 %700 }
  0xe4   : > { %735 = vst.msk [vmem:[#allocation4 + $0x150] sm:$0xff] %vm720_vm4, %v701_v4  ;;  %1202 = vrot.lane.b32.xlu1 %v1163_v59, %s5891_s26  ;;  %v1406_v59 = vld [vmem:[#allocation3 + $0x78] sm:$0xff] }
  0xe5   : > { %1204 = vrot.lane.b32.xlu0 %v1164_v61, %s5891_s26  ;;  %v1407_v61 = vld [vmem:[#allocation3 + $0x80] sm:$0xff] }
  0xe6   : > { %v703_v11 = vpop.permute.xlu1 %702  ;;  %v6572_v1 = vpack.c.bf16 %v1407_v61, %v1406_v59  ;;  %v1534_v59 = vld [vmem:[#allocation2 + $0x69] sm:$0xff] }
  0xe7   : > { %736 = vst.msk [vmem:[#allocation4 + $0x168] sm:$0xff] %vm720_vm4, %v703_v11  ;;  %v802_v15 = vpop.permute.xlu0 %801 }
  0xe8   : > { %850 = vst.msk [vmem:[#allocation4] sm:$0xff] %vm849_vm5, %v802_v15  ;;  %1206 = vrot.lane.b32.xlu1 %v1165_v5, %s5891_s26  ;;  %v1410_v5 = vld [vmem:[#allocation3 + $0xa8] sm:$0xff] }
  0xe9   : > { %1208 = vrot.lane.b32.xlu0 %v1166_v6, %s5891_s26  ;;  %v1411_v6 = vld [vmem:[#allocation3 + $0xb0] sm:$0xff] }
  0xea   : > { %v804_v21 = vpop.permute.xlu1 %803  ;;  %v6582_v11 = vpack.c.bf16 %v1411_v6, %v1410_v5  ;;  %v1537_v6 = vld [vmem:[#allocation2 + $0x91] sm:$0xff] }
  0xeb   : > { %v806_v24 = vpop.permute.xlu0 %805  ;;  %851 = vst.msk [vmem:[#allocation4 + $0x18] sm:$0xff] %vm849_vm5, %v804_v21 }
  0xec   : > { %852 = vst.msk [vmem:[#allocation4 + $0x30] sm:$0xff] %vm849_vm5, %v806_v24  ;;  %1210 = vrot.lane.b32.xlu1 %v1167_v16, %s5891_s26  ;;  %v1414_v16 = vld [vmem:[#allocation3 + $0xd8] sm:$0xff] }
  0xed   : > { %1212 = vrot.lane.b32.xlu0 %v1168_v17, %s5891_s26  ;;  %v1415_v17 = vld [vmem:[#allocation3 + $0xe0] sm:$0xff] }
  0xee   : > { %v808_v33 = vpop.permute.xlu1 %807  ;;  %v6592_v21 = vpack.c.bf16 %v1415_v17, %v1414_v16 }
  0xef   : > { %v810_v34 = vpop.permute.xlu0 %809  ;;  %853 = vst.msk [vmem:[#allocation4 + $0x48] sm:$0xff] %vm849_vm5, %v808_v33 }
  0xf0   : > { %854 = vst.msk [vmem:[#allocation4 + $0x60] sm:$0xff] %vm849_vm5, %v810_v34  ;;  %1214 = vrot.lane.b32.xlu1 %v1169_v25, %s5891_s26  ;;  %v1418_v25 = vld [vmem:[#allocation3 + $0x108] sm:$0xff]  ;;  %v1420_v34 = vld [vmem:[#allocation3 + $0x120] sm:$0xff] }
  0xf1   : > { %1216 = vrot.lane.b32.xlu0 %v1170_v27, %s5891_s26  ;;  %v1419_v27 = vld [vmem:[#allocation3 + $0x110] sm:$0xff] }
  0xf2   : > { %v812_v36 = vpop.permute.xlu1 %811  ;;  %v1440_v33 = vpack.c.bf16 %v1419_v27, %v1418_v25  ;;  %v1543_v25 = vld [vmem:[#allocation2 + $0xd9] sm:$0xff]  ;;  %v1544_v27 = vld [vmem:[#allocation2 + $0xe1] sm:$0xff] }
  0xf3   : > { %v814_v38 = vpop.permute.xlu0 %813  ;;  %855 = vst.msk [vmem:[#allocation4 + $0x78] sm:$0xff] %vm849_vm5, %v812_v36 }
  0xf4   : > { %856 = vst.msk [vmem:[#allocation4 + $0x90] sm:$0xff] %vm849_vm5, %v814_v38  ;;  %1218 = vrot.lane.b32.xlu1 %v1171_v35, %s5891_s26  ;;  %v1421_v35 = vld [vmem:[#allocation3 + $0x128] sm:$0xff]  ;;  %v1422_v38 = vld [vmem:[#allocation3 + $0x138] sm:$0xff] }
  0xf5   : > { %1333 = vrot.lane.b32.xlu0 %v6370_v32, %s5892_s28 }
  0xf6   : > { %v816_v39 = vpop.permute.xlu1 %815 }
  0xf7   : > { %v818_v40 = vpop.permute.xlu0 %817  ;;  %857 = vst.msk [vmem:[#allocation4 + $0xa8] sm:$0xff] %vm849_vm5, %v816_v39  ;;  %v1423_v39 = vld [vmem:[#allocation3 + $0x140] sm:$0xff] }
  0xf8   : > { %858 = vst.msk [vmem:[#allocation4 + $0xc0] sm:$0xff] %vm849_vm5, %v818_v40  ;;  %1335 = vrot.lane.b32.xlu1 %v6368_v30, %s5892_s28 }
  0xf9   : > { %1337 = vrot.lane.b32.xlu0 %v6378_v42, %s5892_s28 }
  0xfa   : > { %v820_v41 = vpop.permute.xlu1 %819 }
  0xfb   : > { %v822_v44 = vpop.permute.xlu0 %821  ;;  %859 = vst.msk [vmem:[#allocation4 + $0xd8] sm:$0xff] %vm849_vm5, %v820_v41  ;;  %v1441_v41 = vpack.c.bf16 %v1421_v35, %v1420_v34  ;;  %v1545_v34 = vld [vmem:[#allocation2 + $0xf1] sm:$0xff]  ;;  %v1546_v35 = vld [vmem:[#allocation2 + $0xf9] sm:$0xff] }
  0xfc   : > { %860 = vst.msk [vmem:[#allocation4 + $0xf0] sm:$0xff] %vm849_vm5, %v822_v44  ;;  %1339 = vrot.lane.b32.xlu1 %v6380_v43, %s5892_s28  ;;  %v1442_v44 = vpack.c.bf16 %v1423_v39, %v1422_v38  ;;  %v1547_v38 = vld [vmem:[#allocation2 + $0x109] sm:$0xff]  ;;  %v1548_v39 = vld [vmem:[#allocation2 + $0x111] sm:$0xff] }
  0xfd   : > { %1341 = vrot.lane.b32.xlu0 %v6386_v47, %s5892_s28 }
  0xfe   : > { %v824_v32 = vpop.permute.xlu1 %823 }
  0xff   : > { %v826_v45 = vpop.permute.xlu0 %825  ;;  %861 = vst.msk [vmem:[#allocation4 + $0x108] sm:$0xff] %vm849_vm5, %v824_v32  ;;  %v1424_v32 = vld [vmem:[#allocation3 + $0x150] sm:$0xff] }
 0x100   : > { %862 = vst.msk [vmem:[#allocation4 + $0x120] sm:$0xff] %vm849_vm5, %v826_v45  ;;  %1343 = vrot.lane.b32.xlu1 %v6389_v53, %s5892_s28  ;;  %v1425_v45 = vld [vmem:[#allocation3 + $0x158] sm:$0xff] }
 0x101   : > { %1345 = vrot.lane.b32.xlu0 %v6396_v60, %s5892_s28 }
 0x102   : > { %v828_v30 = vpop.permute.xlu1 %827 }
 0x103   : > { %v830_v42 = vpop.permute.xlu0 %829  ;;  %863 = vst.msk [vmem:[#allocation4 + $0x138] sm:$0xff] %vm849_vm5, %v828_v30 }
 0x104   : > { %864 = vst.msk [vmem:[#allocation4 + $0x150] sm:$0xff] %vm849_vm5, %v830_v42  ;;  %1347 = vrot.lane.b32.xlu1 %v6398_v62, %s5892_s28  ;;  %v1299_v62 = vld [vmem:[#allocation2 + $0x180] sm:$0xff]  ;;  %v1426_v42 = vld [vmem:[#allocation3 + $0x168] sm:$0xff] }
 0x105   : > { %1349 = vrot.lane.b32.xlu0 %v6406_v8, %s5892_s28  ;;  %v1300_v8 = vld [vmem:[#allocation2 + $0x188] sm:$0xff] }
 0x106   : > { %v832_v43 = vpop.permute.xlu1 %831 }
 0x107   : > { %v931_v47 = vpop.permute.xlu0 %930  ;;  %865 = vst.msk [vmem:[#allocation4 + $0x168] sm:$0xff] %vm849_vm5, %v832_v43  ;;  %v1427_v43 = vld [vmem:[#allocation3 + $0x170] sm:$0xff] }
 0x108   : > { %979 = vst.msk [vmem:[#allocation4] sm:$0xff] %vm978_vm6, %v931_v47  ;;  %1351 = vrot.lane.b32.xlu1 %v6408_v9, %s5892_s28  ;;  %v1399_v9 = vld [vmem:[#allocation3 + $0x20] sm:$0xff] }
 0x109   : > { %1353 = vrot.lane.b32.xlu0 %v6414_v13, %s5892_s28  ;;  %v1316_v13 = vpack.c.bf16 %v1300_v8, %v1299_v62  ;;  %v1428_v62 = vld [vmem:[#allocation3 + $0x180] sm:$0xff]  ;;  %v1429_v8 = vld [vmem:[#allocation3 + $0x188] sm:$0xff] }
 0x10a   : > { %v933_v53 = vpop.permute.xlu1 %932 }
 0x10b   : > { %v935_v60 = vpop.permute.xlu0 %934  ;;  %980 = vst.msk [vmem:[#allocation4 + $0x18] sm:$0xff] %vm978_vm6, %v933_v53  ;;  %v1443_v53 = vpack.c.bf16 %v1425_v45, %v1424_v32  ;;  %v1549_v32 = vld [vmem:[#allocation2 + $0x121] sm:$0xff]  ;;  %v1550_v45 = vld [vmem:[#allocation2 + $0x129] sm:$0xff] }
 0x10c   : > { %981 = vst.msk [vmem:[#allocation4 + $0x30] sm:$0xff] %vm978_vm6, %v935_v60  ;;  %1355 = vrot.lane.b32.xlu1 %v6417_v19, %s5892_s28  ;;  %v1430_v19 = vpack.c.bf16 %v1399_v9, %v1398_v48  ;;  %v1444_v60 = vpack.c.bf16 %v1427_v43, %v1426_v42  ;;  %v1527_v48 = vld [vmem:[#allocation2 + $0x19] sm:$0xff]  ;;  %v1528_v9 = vld [vmem:[#allocation2 + $0x21] sm:$0xff] }
 0x10d   : > { %1357 = vrot.lane.b32.xlu0 %v6424_v26, %s5892_s28  ;;  %v1401_v26 = vld [vmem:[#allocation3 + $0x38] sm:$0xff]  ;;  %v1551_v42 = vld [vmem:[#allocation2 + $0x139] sm:$0xff] }
 0x10e   : > { %v937_v46 = vpop.permute.xlu1 %936  ;;  %v6559_v56 = vpack.c.bf16 %v1401_v26, %v1400_v50  ;;  %v1529_v50 = vld [vmem:[#allocation2 + $0x31] sm:$0xff]  ;;  %v1530_v26 = vld [vmem:[#allocation2 + $0x39] sm:$0xff]  ;;  %v1552_v43 = vld [vmem:[#allocation2 + $0x141] sm:$0xff] }
 0x10f   : > { %v939_v49 = vpop.permute.xlu0 %938  ;;  %982 = vst.msk [vmem:[#allocation4 + $0x48] sm:$0xff] %vm978_vm6, %v937_v46 }
 0x110   : > { %983 = vst.msk [vmem:[#allocation4 + $0x60] sm:$0xff] %vm978_vm6, %v939_v49  ;;  %1359 = vrot.lane.b32.xlu1 %v6426_v28, %s5892_s28  ;;  %v6562_v28 = vpack.c.bf16 %v1403_v54, %v1402_v52  ;;  %v1531_v52 = vld [vmem:[#allocation2 + $0x49] sm:$0xff]  ;;  %v1532_v54 = vld [vmem:[#allocation2 + $0x51] sm:$0xff] }
 0x111   : > { %1361 = vrot.lane.b32.xlu0 %v6434_v37, %s5892_s28  ;;  %v1404_v37 = vld [vmem:[#allocation3 + $0x60] sm:$0xff] }
 0x112   : > { %v941_v51 = vpop.permute.xlu1 %940  ;;  %v6568_v0 = vpack.c.bf16 %v1405_v57, %v1404_v37  ;;  %v6615_v37 = vpack.c.bf16 %v1530_v26, %v1529_v50  ;;  %v6618_v57 = vpack.c.bf16 %v1532_v54, %v1531_v52  ;;  %v1557_v50 = vld [vmem:[#allocation2 + $0x181] sm:$0xff]  ;;  %v1558_v26 = vld [vmem:[#allocation2 + $0x189] sm:$0xff]  ;;  %v1657_v54 = vld [vmem:[#allocation3 + $0x21] sm:$0xff] }
 0x113   : > { %v943_v55 = vpop.permute.xlu0 %942  ;;  %984 = vst.msk [vmem:[#allocation4 + $0x78] sm:$0xff] %vm978_vm6, %v941_v51  ;;  %v1656_v52 = vld [vmem:[#allocation3 + $0x19] sm:$0xff] }
 0x114   : > { %985 = vst.msk [vmem:[#allocation4 + $0x90] sm:$0xff] %vm978_vm6, %v943_v55  ;;  %1363 = vrot.lane.b32.xlu1 %v1316_v13, %s5892_s28  ;;  %v1445_v13 = vpack.c.bf16 %v1429_v8, %v1428_v62  ;;  %v1553_v62 = vld [vmem:[#allocation2 + $0x151] sm:$0xff]  ;;  %v1554_v8 = vld [vmem:[#allocation2 + $0x159] sm:$0xff] }
 0x115   : > { %1462 = vrot.lane.b32.xlu0 %v1430_v19, %s5888_s18  ;;  %v1559_v19 = vpack.c.bf16 %v1528_v9, %v1527_v48  ;;  %v1555_v48 = vld [vmem:[#allocation2 + $0x169] sm:$0xff]  ;;  %v1556_v9 = vld [vmem:[#allocation2 + $0x171] sm:$0xff] }
 0x116   : > { %v945_v58 = vpop.permute.xlu1 %944 }
 0x117   : > { %v947_v63 = vpop.permute.xlu0 %946  ;;  %986 = vst.msk [vmem:[#allocation4 + $0xa8] sm:$0xff] %vm978_vm6, %v945_v58  ;;  %v1533_v58 = vld [vmem:[#allocation2 + $0x61] sm:$0xff] }
 0x118   : > { %987 = vst.msk [vmem:[#allocation4 + $0xc0] sm:$0xff] %vm978_vm6, %v947_v63  ;;  %1464 = vrot.lane.b32.xlu1 %v6559_v56, %s5888_s18  ;;  %v1535_v63 = vld [vmem:[#allocation2 + $0x79] sm:$0xff] }
 0x119   : > { %1466 = vrot.lane.b32.xlu0 %v6562_v28, %s5888_s18  ;;  %v6628_v5 = vpack.c.bf16 %v1536_v2, %v1535_v63  ;;  %v1659_v63 = vld [vmem:[#allocation3 + $0x39] sm:$0xff] }
 0x11a   : > { %v949_v4 = vpop.permute.xlu1 %948 }
 0x11b   : > { %v951_v7 = vpop.permute.xlu0 %950  ;;  %988 = vst.msk [vmem:[#allocation4 + $0xd8] sm:$0xff] %vm978_vm6, %v949_v4  ;;  %v6624_v4 = vpack.c.bf16 %v1534_v59, %v1533_v58  ;;  %v1574_v58 = vpack.c.bf16 %v1558_v26, %v1557_v50  ;;  %v1688_v59 = vpack.c.bf16 %v1657_v54, %v1656_v52  ;;  %v1678_v50 = vld [vmem:[#allocation3 + $0x121] sm:$0xff]  ;;  %v1679_v26 = vld [vmem:[#allocation3 + $0x129] sm:$0xff]  ;;  %v1680_v52 = vld [vmem:[#allocation3 + $0x139] sm:$0xff] }
 0x11c   : > { %989 = vst.msk [vmem:[#allocation4 + $0xf0] sm:$0xff] %vm978_vm6, %v951_v7  ;;  %1468 = vrot.lane.b32.xlu1 %v6568_v0, %s5888_s18  ;;  %v1538_v7 = vld [vmem:[#allocation2 + $0x99] sm:$0xff]  ;;  %v1681_v54 = vld [vmem:[#allocation3 + $0x141] sm:$0xff] }
 0x11d   : > { %1470 = vrot.lane.b32.xlu0 %v6572_v1, %s5888_s18  ;;  %v6634_v17 = vpack.c.bf16 %v1538_v7, %v1537_v6  ;;  %v1661_v6 = vld [vmem:[#allocation3 + $0x51] sm:$0xff] }
 0x11e   : > { %v953_v15 = vpop.permute.xlu1 %952 }
 0x11f   : > { %v955_v18 = vpop.permute.xlu0 %954  ;;  %990 = vst.msk [vmem:[#allocation4 + $0x108] sm:$0xff] %vm978_vm6, %v953_v15  ;;  %v1540_v15 = vld [vmem:[#allocation2 + $0xb1] sm:$0xff] }
 0x120   : > { %991 = vst.msk [vmem:[#allocation4 + $0x120] sm:$0xff] %vm978_vm6, %v955_v18  ;;  %1472 = vrot.lane.b32.xlu1 %v6578_v10, %s5888_s18  ;;  %v1565_v18 = vpack.c.bf16 %v1540_v15, %v1539_v14  ;;  %v1662_v15 = vld [vmem:[#allocation3 + $0x61] sm:$0xff] }
 0x121   : > { %1474 = vrot.lane.b32.xlu0 %v6582_v11, %s5888_s18 }
 0x122   : > { %v957_v24 = vpop.permute.xlu1 %956 }
 0x123   : > { %v959_v29 = vpop.permute.xlu0 %958  ;;  %992 = vst.msk [vmem:[#allocation4 + $0x138] sm:$0xff] %vm978_vm6, %v957_v24 }
 0x124   : > { %993 = vst.msk [vmem:[#allocation4 + $0x150] sm:$0xff] %vm978_vm6, %v959_v29  ;;  %1476 = vrot.lane.b32.xlu1 %v6588_v20, %s5888_s18 }
 0x125   : > { %1478 = vrot.lane.b32.xlu0 %v6592_v21, %s5888_s18 }
 0x126   : > { %v961_v36 = vpop.permute.xlu1 %960 }
 0x127   : > { %v1060_v40 = vpop.permute.xlu0 %1059  ;;  %994 = vst.msk [vmem:[#allocation4 + $0x168] sm:$0xff] %vm978_vm6, %v961_v36 }
 0x128   : > { %1108 = vst.msk [vmem:[#allocation4] sm:$0xff] %vm1107_vm7, %v1060_v40  ;;  %1480 = vrot.lane.b32.xlu1 %v1439_v31, %s5888_s18  ;;  %v1566_v31 = vpack.c.bf16 %v1542_v23, %v1541_v22  ;;  %v1664_v22 = vld [vmem:[#allocation3 + $0x79] sm:$0xff]  ;;  %v1665_v23 = vld [vmem:[#allocation3 + $0x81] sm:$0xff] }
 0x129   : > { %1482 = vrot.lane.b32.xlu0 %v1440_v33, %s5888_s18  ;;  %v1567_v33 = vpack.c.bf16 %v1544_v27, %v1543_v25  ;;  %v6687_v27 = vpack.c.bf16 %v1665_v23, %v1664_v22  ;;  %v5497_v22 = vld [vmem:[%s8405_s3 + $0x50] sm:$0xff]   ;;  %v5498_v23 = vld [vmem:[%s8405_s3 + $0x88] sm:$0xff]  }
 0x12a   : > { %v1062_v30 = vpop.permute.xlu1 %1061 }
 0x12b   : > { %v1064_v47 = vpop.permute.xlu0 %1063  ;;  %1109 = vst.msk [vmem:[#allocation4 + $0x18] sm:$0xff] %vm1107_vm7, %v1062_v30 }
 0x12c   : > { %1110 = vst.msk [vmem:[#allocation4 + $0x30] sm:$0xff] %vm1107_vm7, %v1064_v47  ;;  %1484 = vrot.lane.b32.xlu1 %v1441_v41, %s5888_s18  ;;  %v6646_v41 = vpack.c.bf16 %v1546_v35, %v1545_v34  ;;  %v1668_v34 = vld [vmem:[#allocation3 + $0xa9] sm:$0xff]  ;;  %v1669_v35 = vld [vmem:[#allocation3 + $0xb1] sm:$0xff] }
 0x12d   : > { %1486 = vrot.lane.b32.xlu0 %v1442_v44, %s5888_s18  ;;  %v1569_v44 = vpack.c.bf16 %v1548_v39, %v1547_v38  ;;  %v6699_v39 = vpack.c.bf16 %v1669_v35, %v1668_v34  ;;  %v1687_v34 = vld [vmem:[#allocation3 + $0x189] sm:$0xff] }
 0x12e   : > { %v1066_v46 = vpop.permute.xlu1 %1065 }
 0x12f   : > { %v1068_v49 = vpop.permute.xlu0 %1067  ;;  %1111 = vst.msk [vmem:[#allocation4 + $0x48] sm:$0xff] %vm1107_vm7, %v1066_v46 }
 0x130   : > { %1112 = vst.msk [vmem:[#allocation4 + $0x60] sm:$0xff] %vm1107_vm7, %v1068_v49  ;;  %1488 = vrot.lane.b32.xlu1 %v1443_v53, %s5888_s18  ;;  %v1570_v53 = vpack.c.bf16 %v1550_v45, %v1549_v32  ;;  %v1672_v45 = vld [vmem:[#allocation3 + $0xd9] sm:$0xff] }
 0x131   : > { %1490 = vrot.lane.b32.xlu0 %v1444_v60, %s5888_s18  ;;  %v1571_v60 = vpack.c.bf16 %v1552_v43, %v1551_v42 }
 0x132   : > { %v1070_v51 = vpop.permute.xlu1 %1069 }
 0x133   : > { %v1072_v55 = vpop.permute.xlu0 %1071  ;;  %1113 = vst.msk [vmem:[#allocation4 + $0x78] sm:$0xff] %vm1107_vm7, %v1070_v51 }
 0x134   : > { %1114 = vst.msk [vmem:[#allocation4 + $0x90] sm:$0xff] %vm1107_vm7, %v1072_v55  ;;  %1492 = vrot.lane.b32.xlu1 %v1445_v13, %s5888_s18  ;;  %v1572_v13 = vpack.c.bf16 %v1554_v8, %v1553_v62  ;;  %v1676_v8 = vld [vmem:[#allocation3 + $0x109] sm:$0xff] }
 0x135   : > { %1591 = vrot.lane.b32.xlu0 %v1559_v19, %s5893_s29  ;;  %v1573_v19 = vpack.c.bf16 %v1556_v9, %v1555_v48  ;;  %v5492_v9 = vld [vmem:[%s8405_s3 + $0x40] sm:$0xff]  }
 0x136   : > { %v1074_v61 = vpop.permute.xlu1 %1073  ;;  %5225 = vmatprep.subr.bf16.mxu0 %v5492_v9 }
 0x137   : > { %v1076_v3 = vpop.permute.xlu0 %1075  ;;  %1115 = vst.msk [vmem:[#allocation4 + $0xa8] sm:$0xff] %vm1107_vm7, %v1074_v61  ;;  %v1658_v61 = vld [vmem:[#allocation3 + $0x31] sm:$0xff] }
 0x138   : > { %1116 = vst.msk [vmem:[#allocation4 + $0xc0] sm:$0xff] %vm1107_vm7, %v1076_v3  ;;  %1593 = vrot.lane.b32.xlu1 %v6615_v37, %s5893_s29  ;;  %v1660_v3 = vld [vmem:[#allocation3 + $0x49] sm:$0xff] }
 0x139   : > { %1595 = vrot.lane.b32.xlu0 %v6618_v57, %s5893_s29  ;;  %v6675_v14 = vpack.c.bf16 %v1661_v6, %v1660_v3  ;;  %v1682_v3 = vld [vmem:[#allocation3 + $0x151] sm:$0xff]  ;;  %v1683_v6 = vld [vmem:[#allocation3 + $0x159] sm:$0xff] }
 0x13a   : > { %v1078_v12 = vpop.permute.xlu1 %1077 }
 0x13b   : > { %v1080_v16 = vpop.permute.xlu0 %1079  ;;  %1117 = vst.msk [vmem:[#allocation4 + $0xd8] sm:$0xff] %vm1107_vm7, %v1078_v12  ;;  %v6672_v12 = vpack.c.bf16 %v1659_v63, %v1658_v61  ;;  %v1699_v61 = vpack.c.bf16 %v1679_v26, %v1678_v50  ;;  %v5496_v63 = vld [vmem:[%s8405_s3 + $0x8] sm:$0xff]  }
 0x13c   : > { %1118 = vst.msk [vmem:[#allocation4 + $0xf0] sm:$0xff] %vm1107_vm7, %v1080_v16  ;;  %1597 = vrot.lane.b32.xlu1 %v6624_v4, %s5893_s29  ;;  %v1663_v16 = vld [vmem:[#allocation3 + $0x69] sm:$0xff]  ;;  %v5508_v50 = vld [vmem:[%s8405_s3 + $0x28] sm:$0xff]  }
 0x13d   : > { %1599 = vrot.lane.b32.xlu0 %v6628_v5, %s5893_s29  ;;  %v6683_v25 = vpack.c.bf16 %v1663_v16, %v1662_v15  ;;  %v1684_v15 = vld [vmem:[#allocation3 + $0x169] sm:$0xff]  ;;  %v1685_v16 = vld [vmem:[#allocation3 + $0x171] sm:$0xff] }
 0x13e   : > { %v1082_v24 = vpop.permute.xlu1 %1081  ;;  %v2702_v26 = vld [vmem:[#allocation3 + $0x32] sm:$0xff] }
 0x13f   : > { %v1084_v29 = vpop.permute.xlu0 %1083  ;;  %1119 = vst.msk [vmem:[#allocation4 + $0x108] sm:$0xff] %vm1107_vm7, %v1082_v24 }
 0x140   : > { %1120 = vst.msk [vmem:[#allocation4 + $0x120] sm:$0xff] %vm1107_vm7, %v1084_v29  ;;  %1601 = vrot.lane.b32.xlu1 %v6634_v17, %s5893_s29  ;;  %v1666_v29 = vld [vmem:[#allocation3 + $0x91] sm:$0xff] }
 0x141   : > { %1603 = vrot.lane.b32.xlu0 %v1565_v18, %s5893_s29 }
 0x142   : > { %v1086_v36 = vpop.permute.xlu1 %1085 }
 0x143   : > { %v1088_v40 = vpop.permute.xlu0 %1087  ;;  %1121 = vst.msk [vmem:[#allocation4 + $0x138] sm:$0xff] %vm1107_vm7, %v1086_v36 }
 0x144   : > { %1122 = vst.msk [vmem:[#allocation4 + $0x150] sm:$0xff] %vm1107_vm7, %v1088_v40  ;;  %1605 = vrot.lane.b32.xlu1 %v1566_v31, %s5893_s29  ;;  %v1667_v31 = vld [vmem:[#allocation3 + $0x99] sm:$0xff]  ;;  %v1670_v40 = vld [vmem:[#allocation3 + $0xc1] sm:$0xff] }
 0x145   : > { %1607 = vrot.lane.b32.xlu0 %v1567_v33, %s5893_s29  ;;  %v6695_v38 = vpack.c.bf16 %v1667_v31, %v1666_v29  ;;  %v5499_v29 = vld [vmem:[%s8405_s3 + $0x10] sm:$0xff]   ;;  %v1702_v31 = vpack.c.bf16 %v1685_v16, %v1684_v15  ;;  %v2043_v15 = vld [vmem:[#allocation2 + $0x38] sm:$0xff] }
 0x146   : > { %v1090_v30 = vpop.permute.xlu1 %1089 }
 0x147   : > { %v1189_v47 = vpop.permute.xlu0 %1188  ;;  %1123 = vst.msk [vmem:[#allocation4 + $0x168] sm:$0xff] %vm1107_vm7, %v1090_v30  ;;  %v1673_v30 = vld [vmem:[#allocation3 + $0xe1] sm:$0xff] }
 0x148   : > { %1237 = vst.msk [vmem:[#allocation4] sm:$0xff] %vm1236_vm8, %v1189_v47  ;;  %1609 = vrot.lane.b32.xlu1 %v6646_v41, %s5893_s29 }
 0x149   : > { %1238 = vst.msk [vmem:[#allocation4 + $0x8] sm:$0xff] %vm302_vm2, %v1189_v47  ;;  %1611 = vrot.lane.b32.xlu0 %v1569_v44, %s5893_s29  ;;  %v1671_v44 = vld [vmem:[#allocation3 + $0xc9] sm:$0xff]  ;;  %v6711_v47 = vpack.c.bf16 %v1673_v30, %v1672_v45  ;;  %v5501_v45 = vld [vmem:[%s8405_s3 + $0x90] sm:$0xff]  }
 0x14a   : > { %v1191_v46 = vpop.permute.xlu1 %1190  ;;  %v6707_v43 = vpack.c.bf16 %v1671_v44, %v1670_v40  ;;  %v1785_v40 = vld [vmem:[#allocation2 + $0x22] sm:$0xff] }
 0x14b   : > { %v1193_v49 = vpop.permute.xlu0 %1192  ;;  %1239 = vst.msk [vmem:[#allocation4 + $0x18] sm:$0xff] %vm1236_vm8, %v1191_v46 }
 0x14c   : > { %1240 = vst.msk [vmem:[#allocation4 + $0x20] sm:$0xff] %vm302_vm2, %v1191_v46  ;;  %1242 = vst.msk [vmem:[#allocation4 + $0x38] sm:$0xff] %vm302_vm2, %v1193_v49  ;;  %1613 = vrot.lane.b32.xlu1 %v1570_v53, %s5893_s29  ;;  %v1674_v53 = vld [vmem:[#allocation3 + $0xf1] sm:$0xff] }
 0x14d   : > { %1241 = vst.msk [vmem:[#allocation4 + $0x30] sm:$0xff] %vm1236_vm8, %v1193_v49  ;;  %1615 = vrot.lane.b32.xlu0 %v1571_v60, %s5893_s29  ;;  %v1675_v60 = vld [vmem:[#allocation3 + $0xf9] sm:$0xff]  ;;  %v1677_v46 = vld [vmem:[#allocation3 + $0x111] sm:$0xff] }
 0x14e   : > { %v1195_v51 = vpop.permute.xlu1 %1194  ;;  %v1697_v49 = vpack.c.bf16 %v1675_v60, %v1674_v53 }
 0x14f   : > { %v1197_v55 = vpop.permute.xlu0 %1196  ;;  %1243 = vst.msk [vmem:[#allocation4 + $0x48] sm:$0xff] %vm1236_vm8, %v1195_v51 }
 0x150   : > { %1244 = vst.msk [vmem:[#allocation4 + $0x50] sm:$0xff] %vm302_vm2, %v1195_v51  ;;  %1246 = vst.msk [vmem:[#allocation4 + $0x68] sm:$0xff] %vm302_vm2, %v1197_v55  ;;  %1617 = vrot.lane.b32.xlu1 %v1572_v13, %s5893_s29  ;;  %v5493_v13 = vld [vmem:[%s8405_s3] sm:$0xff]  }
 0x151   : > { %1245 = vst.msk [vmem:[#allocation4 + $0x60] sm:$0xff] %vm1236_vm8, %v1197_v55  ;;  %1619 = vrot.lane.b32.xlu0 %v1573_v19, %s5893_s29  ;;  %v1698_v19 = vpack.c.bf16 %v1677_v46, %v1676_v8  ;;  %5226 = vmatpush3.bf16.msra.mxu0 %v5493_v13  ;;  %v5503_v8 = vld [vmem:[%s8405_s3 + $0x60] sm:$0xff]   ;;  %v5504_v46 = vld [vmem:[%s8405_s3 + $0x98] sm:$0xff]   ;;  %v5506_v13 = vld [vmem:[%s8405_s3 + $0x68] sm:$0xff]  }
 0x152   : > { %v1199_v2 = vpop.permute.xlu1 %1198 }
 0x153   : > { %v1201_v7 = vpop.permute.xlu0 %1200  ;;  %1247 = vst.msk [vmem:[#allocation4 + $0x78] sm:$0xff] %vm1236_vm8, %v1199_v2 }
 0x154   : > { %1248 = vst.msk [vmem:[#allocation4 + $0x80] sm:$0xff] %vm302_vm2, %v1199_v2  ;;  %1250 = vst.msk [vmem:[#allocation4 + $0x98] sm:$0xff] %vm302_vm2, %v1201_v7  ;;  %1621 = vrot.lane.b32.xlu1 %v1574_v58, %s5893_s29  ;;  %v5494_v58 = vld [vmem:[%s8405_s3 + $0x48] sm:$0xff]   ;;  %v1700_v2 = vpack.c.bf16 %v1681_v54, %v1680_v52  ;;  %s5895_s29 = smov 24  }
 0x155   : > { %1249 = vst.msk [vmem:[#allocation4 + $0x90] sm:$0xff] %vm1236_vm8, %v1201_v7  ;;  %1720 = vrot.lane.b32.xlu0 %v1688_v59, %s5887_s14  ;;  %v5495_v59 = vld [vmem:[%s8405_s3 + $0x80] sm:$0xff]   ;;  %5227 = vmatprep.subr.bf16.mxu0 %v5494_v58 }
 0x156   : > { %v1203_v18 = vpop.permute.xlu1 %1202  ;;  %5379 = vmatprep.subr.bf16.mxu1 %v5495_v59  ;;  %5228 = vmatpush3.bf16.msra.mxu0 %v5496_v63  ;;  %v2705_v58 = vld [vmem:[#allocation3 + $0x52] sm:$0xff] }
 0x157   : > { %v1205_v24 = vpop.permute.xlu0 %1204  ;;  %1251 = vst.msk [vmem:[#allocation4 + $0xa8] sm:$0xff] %vm1236_vm8, %v1203_v18  ;;  %5380 = vmatpush3.bf16.msra.mxu1 %v5495_v59  ;;  %5229 = vmatprep.subr.bf16.mxu0 %v5497_v22  ;;  %v5509_v59 = vld [vmem:[%s8405_s3 + $0x70] sm:$0xff]  }
 0x158   : > { %1252 = vst.msk [vmem:[#allocation4 + $0xb0] sm:$0xff] %vm302_vm2, %v1203_v18  ;;  %1254 = vst.msk [vmem:[#allocation4 + $0xc8] sm:$0xff] %vm302_vm2, %v1205_v24  ;;  %1722 = vrot.lane.b32.xlu1 %v6672_v12, %s5887_s14  ;;  %5381 = vmatprep.subr.bf16.mxu1 %v5498_v23 }
 0x159   : > { %1253 = vst.msk [vmem:[#allocation4 + $0xc0] sm:$0xff] %vm1236_vm8, %v1205_v24  ;;  %1724 = vrot.lane.b32.xlu0 %v6675_v14, %s5887_s14  ;;  %v1701_v24 = vpack.c.bf16 %v1683_v6, %v1682_v3  ;;  %v1914_v3 = vld [vmem:[#allocation3 + $0x22] sm:$0xff] }
 0x15a   : > { %v1207_v33 = vpop.permute.xlu1 %1206  ;;  %5230 = vmatpush3.bf16.msra.mxu0 %v5499_v29  ;;  %v2574_v29 = vld [vmem:[#allocation2 + $0x3a] sm:$0xff] }
 0x15b   : > { %v1209_v36 = vpop.permute.xlu0 %1208  ;;  %1255 = vst.msk [vmem:[#allocation4 + $0xd8] sm:$0xff] %vm1236_vm8, %v1207_v33  ;;  %5382 = vmatpush3.bf16.msra.mxu1 %v5498_v23 }
 0x15c   : > { %1256 = vst.msk [vmem:[#allocation4 + $0xe0] sm:$0xff] %vm302_vm2, %v1207_v33  ;;  %1258 = vst.msk [vmem:[#allocation4 + $0xf8] sm:$0xff] %vm302_vm2, %v1209_v36  ;;  %1726 = vrot.lane.b32.xlu1 %v6683_v25, %s5887_s14  ;;  %v1686_v33 = vld [vmem:[#allocation3 + $0x181] sm:$0xff]  ;;  %5383 = vmatprep.subr.bf16.mxu1 %v5501_v45 }
 0x15d   : > { %1257 = vst.msk [vmem:[#allocation4 + $0xf0] sm:$0xff] %vm1236_vm8, %v1209_v36  ;;  %1728 = vrot.lane.b32.xlu0 %v6687_v27, %s5887_s14  ;;  %v1784_v36 = vld [vmem:[#allocation2 + $0x1a] sm:$0xff]  ;;  %v1703_v30 = vpack.c.bf16 %v1687_v34, %v1686_v33 }
 0x15e   : > { %v1211_v32 = vpop.permute.xlu1 %1210  ;;  %v1816_v53 = vpack.c.bf16 %v1785_v40, %v1784_v36 }
 0x15f   : > { %v1213_v42 = vpop.permute.xlu0 %1212  ;;  %1259 = vst.msk [vmem:[#allocation4 + $0x108] sm:$0xff] %vm1236_vm8, %v1211_v32  ;;  %5384 = vmatpush3.bf16.msra.mxu1 %v5501_v45 }
 0x160   : > { %1260 = vst.msk [vmem:[#allocation4 + $0x110] sm:$0xff] %vm302_vm2, %v1211_v32  ;;  %1262 = vst.msk [vmem:[#allocation4 + $0x128] sm:$0xff] %vm302_vm2, %v1213_v42  ;;  %1730 = vrot.lane.b32.xlu1 %v6695_v38, %s5887_s14  ;;  %v5500_v32 = vld [vmem:[%s8405_s3 + $0x58] sm:$0xff]   ;;  %5385 = vmatprep.subr.bf16.mxu1 %v5504_v46 }
 0x161   : > { %1261 = vst.msk [vmem:[#allocation4 + $0x120] sm:$0xff] %vm1236_vm8, %v1213_v42  ;;  %1732 = vrot.lane.b32.xlu0 %v6699_v39, %s5887_s14  ;;  %v5502_v42 = vld [vmem:[%s8405_s3 + $0x18] sm:$0xff]   ;;  %5231 = vmatprep.subr.bf16.mxu0 %v5500_v32 }
 0x162   : > { %v1215_v62 = vpop.permute.xlu1 %1214  ;;  %5232 = vmatpush3.bf16.msra.mxu0 %v5502_v42  ;;  %v2707_v32 = vld [vmem:[#allocation3 + $0x6a] sm:$0xff] }
 0x163   : > { %v1217_v48 = vpop.permute.xlu0 %1216  ;;  %1263 = vst.msk [vmem:[#allocation4 + $0x138] sm:$0xff] %vm1236_vm8, %v1215_v62  ;;  %5233 = vmatprep.subr.bf16.mxu0 %v5503_v8  ;;  %5386 = vmatpush3.bf16.msra.mxu1 %v5504_v46 }
 0x164   : > { %1264 = vst.msk [vmem:[#allocation4 + $0x140] sm:$0xff] %vm302_vm2, %v1215_v62  ;;  %1266 = vst.msk [vmem:[#allocation4 + $0x158] sm:$0xff] %vm302_vm2, %v1217_v48  ;;  %1734 = vrot.lane.b32.xlu1 %v6707_v43, %s5887_s14 }
 0x165   : > { %1265 = vst.msk [vmem:[#allocation4 + $0x150] sm:$0xff] %vm1236_vm8, %v1217_v48  ;;  %1736 = vrot.lane.b32.xlu0 %v6711_v47, %s5887_s14  ;;  %v5505_v48 = vld [vmem:[%s8405_s3 + $0x20] sm:$0xff]  }
 0x166   : > { %v1219_v51 = vpop.permute.xlu1 %1218  ;;  %5234 = vmatpush3.bf16.msra.mxu0 %v5505_v48  ;;  %v2575_v48 = vld [vmem:[#allocation2 + $0x4a] sm:$0xff] }
 0x167   : > { %v1334_v55 = vpop.permute.xlu0 %1333  ;;  %1267 = vst.msk [vmem:[#allocation4 + $0x168] sm:$0xff] %vm1236_vm8, %v1219_v51  ;;  %5235 = vmatprep.subr.bf16.mxu0 %v5506_v13 }
 0x168   : > { %1268 = vst.msk [vmem:[#allocation4 + $0x170] sm:$0xff] %vm302_vm2, %v1219_v51  ;;  %1738 = vrot.lane.b32.xlu1 %v1697_v49, %s5887_s14  ;;  %v2703_v51 = vld [vmem:[#allocation3 + $0x3a] sm:$0xff] }
 0x169   : > { %1382 = vst.msk [vmem:[#allocation4] sm:$0xff] %vm1381_vm9, %v1334_v55  ;;  %1740 = vrot.lane.b32.xlu0 %v1698_v19, %s5887_s14  ;;  %v5507_v19 = vld [vmem:[%s8405_s3 + $0xa0] ss:$0 sps:$4 sm:$0x33]  }
 0x16a   : > { %v1336_v7 = vpop.permute.xlu1 %1335  ;;  %v3052_v52 = vsel %vm3050_vm10, %v5507_v19, 0  ;;  %v2704_v55 = vld [vmem:[#allocation3 + $0x4a] sm:$0xff]  ;;  %5431 = vmatprep.subr.msk.bf16.mxu1 %vm3050_vm10, %v5507_v19  ;;  %5236 = vmatpush3.bf16.msra.mxu0 %v5508_v50 }
 0x16b   : > { %v1338_v18 = vpop.permute.xlu0 %1337  ;;  %1383 = vst.msk [vmem:[#allocation4 + $0x18] sm:$0xff] %vm1381_vm9, %v1336_v7  ;;  %5388 = vmatpush3.bf16.msra.mxu1 %v3052_v52  ;;  %v6811_v63 = vpack.c.bf16 %v2705_v58, %v2704_v55  ;;  %5237 = vmatprep.subr.bf16.mxu0 %v5509_v59  ;;  %v2042_v7 = vld [vmem:[#allocation2 + $0x30] sm:$0xff]  ;;  %v2710_v52 = vld [vmem:[#allocation3 + $0x92] sm:$0xff]  ;;  %v2712_v58 = vld [vmem:[#allocation3 + $0xaa] sm:$0xff] }
 0x16c   : > { %1384 = vst.msk [vmem:[#allocation4 + $0x30] sm:$0xff] %vm1381_vm9, %v1338_v18  ;;  %1742 = vrot.lane.b32.xlu1 %v1699_v61, %s5887_s14  ;;  %v5510_v61 = vld [vmem:[%s8405_s3 + $0x30] sm:$0xff]   ;;  %v5512_v18 = vld [vmem:[%s8405_s3 + $0x38] sm:$0xff]   ;;  %v2074_v22 = vpack.c.bf16 %v2043_v15, %v2042_v7 }
 0x16d   : > { %1744 = vrot.lane.b32.xlu0 %v1700_v2, %s5887_s14  ;;  %v1913_v2 = vld [vmem:[#allocation3 + $0x1a] sm:$0xff] }
 0x16e   : > { %v1340_v35 = vpop.permute.xlu1 %1339  ;;  %5238 = vmatpush3.bf16.msra.mxu0 %v5510_v61  ;;  %v2047_v61 = vld [vmem:[#allocation2 + $0x68] sm:$0xff] }
 0x16f   : > { %v1342_v44 = vpop.permute.xlu0 %1341  ;;  %1385 = vst.msk [vmem:[#allocation4 + $0x48] sm:$0xff] %vm1381_vm9, %v1340_v35  ;;  %v2578_v7 = vld [vmem:[#allocation2 + $0x6a] sm:$0xff] }
 0x170   : > { %1386 = vst.msk [vmem:[#allocation4 + $0x60] sm:$0xff] %vm1381_vm9, %v1342_v44  ;;  %1746 = vrot.lane.b32.xlu1 %v1701_v24, %s5887_s14  ;;  %v2573_v24 = vld [vmem:[#allocation2 + $0x32] sm:$0xff] }
 0x171   : > { %1748 = vrot.lane.b32.xlu0 %v1702_v31, %s5887_s14  ;;  %v2605_v33 = vpack.c.bf16 %v2574_v29, %v2573_v24  ;;  %v2706_v44 = vld [vmem:[#allocation3 + $0x62] sm:$0xff]  ;;  %v2715_v24 = vld [vmem:[#allocation3 + $0xca] sm:$0xff] }
 0x172   : > { %v1344_v60 = vpop.permute.xlu1 %1343 }
 0x173   : > { %v1346_v62 = vpop.permute.xlu0 %1345  ;;  %1387 = vst.msk [vmem:[#allocation4 + $0x78] sm:$0xff] %vm1381_vm9, %v1344_v60 }
 0x174   : > { %1388 = vst.msk [vmem:[#allocation4 + $0x90] sm:$0xff] %vm1381_vm9, %v1346_v62  ;;  %1750 = vrot.lane.b32.xlu1 %v1703_v30, %s5887_s14  ;;  %v2708_v30 = vld [vmem:[#allocation3 + $0x7a] sm:$0xff] }
 0x175   : > { %1848 = vrot.lane.b32.xlu0 %v1816_v53, %s5894_s11  ;;  %v6844_v53 = vpack.c.bf16 %v2707_v32, %v2706_v44  ;;  %v2045_v62 = vld [vmem:[#allocation2 + $0x50] sm:$0xff]  ;;  %v2579_v32 = vld [vmem:[#allocation2 + $0x7a] sm:$0xff] }
 0x176   : > { %v1348_v9 = vpop.permute.xlu1 %1347 }
 0x177   : > { %v1350_v49 = vpop.permute.xlu0 %1349  ;;  %1389 = vst.msk [vmem:[#allocation4 + $0xa8] sm:$0xff] %vm1381_vm9, %v1348_v9  ;;  %v2576_v9 = vld [vmem:[#allocation2 + $0x52] sm:$0xff] }
 0x178   : > { %1390 = vst.msk [vmem:[#allocation4 + $0xc0] sm:$0xff] %vm1381_vm9, %v1350_v49  ;;  %2236 = vrot.lane.b32.xlu1 %v6559_v56, %s5891_s26  ;;  %v2606_v19 = vpack.c.bf16 %v2576_v9, %v2575_v48  ;;  %v2188_v48 = vld [vmem:[#allocation3 + $0xf0] sm:$0xff]  ;;  %v2189_v9 = vld [vmem:[#allocation3 + $0xf8] sm:$0xff] }
 0x179   : > { %2238 = vrot.lane.b32.xlu0 %v6562_v28, %s5891_s26  ;;  %v6804_v28 = vpack.c.bf16 %v2703_v51, %v2702_v26 }
 0x17a   : > { %v1352_v54 = vpop.permute.xlu1 %1351 }
 0x17b   : > { %v1354_v56 = vpop.permute.xlu0 %1353  ;;  %1391 = vst.msk [vmem:[#allocation4 + $0xd8] sm:$0xff] %vm1381_vm9, %v1352_v54  ;;  %v2711_v54 = vld [vmem:[#allocation3 + $0x9a] sm:$0xff] }
 0x17c   : > { %1392 = vst.msk [vmem:[#allocation4 + $0xf0] sm:$0xff] %vm1381_vm9, %v1354_v56  ;;  %2509 = vrot.lane.b32.xlu1 %v6672_v12, %s5888_s18  ;;  %v5511_v12 = vld [vmem:[%s8405_s3 + $0x78] sm:$0xff]   ;;  %v2713_v56 = vld [vmem:[#allocation3 + $0xb2] sm:$0xff] }
 0x17d   : > { %2511 = vrot.lane.b32.xlu0 %v6675_v14, %s5888_s18  ;;  %v1945_v14 = vpack.c.bf16 %v1914_v3, %v1913_v2  ;;  %5239 = vmatprep.subr.bf16.mxu0 %v5511_v12 }
 0x17e   : > { %v1356_v6 = vpop.permute.xlu1 %1355  ;;  %5240 = vmatpush3.bf16.msra.mxu0 %v5512_v18 }
 0x17f   : > { %v1358_v16 = vpop.permute.xlu0 %1357  ;;  %1393 = vst.msk [vmem:[#allocation4 + $0x108] sm:$0xff] %vm1381_vm9, %v1356_v6  ;;  %v2577_v6 = vld [vmem:[#allocation2 + $0x62] sm:$0xff] }
 0x180   : > { %1394 = vst.msk [vmem:[#allocation4 + $0x120] sm:$0xff] %vm1381_vm9, %v1358_v16  ;;  %2766 = vrot.lane.b32.xlu1 %v6804_v28, %s5887_s14  ;;  %v2607_v16 = vpack.c.bf16 %v2578_v7, %v2577_v6 }
 0x181   : > { %2768 = vrot.lane.b32.xlu0 %v6811_v63, %s5887_s14 }
 0x182   : > { %v1360_v23 = vpop.permute.xlu1 %1359 }
 0x183   : > { %v1362_v31 = vpop.permute.xlu0 %1361  ;;  %1395 = vst.msk [vmem:[#allocation4 + $0x138] sm:$0xff] %vm1381_vm9, %v1360_v23  ;;  %v2714_v23 = vld [vmem:[#allocation3 + $0xc2] sm:$0xff] }
 0x184   : > { %1396 = vst.msk [vmem:[#allocation4 + $0x150] sm:$0xff] %vm1381_vm9, %v1362_v31  ;;  %1977 = vrot.lane.b32.xlu1 %v1945_v14, %s5889_s19  ;;  %v5513_v14 = vld [vmem:[%s8405_s3 + $0x40] sm:$0xff]   ;;  %v2716_v31 = vld [vmem:[#allocation3 + $0xda] sm:$0xff] }
 0x185   : > { %2106 = vrot.lane.b32.xlu0 %v2074_v22, %s5895_s29  ;;  %5302 = vmatprep.subr.bf16.mxu1 %v5513_v14  ;;  %v2191_v14 = vld [vmem:[#allocation3 + $0x110] sm:$0xff] }
 0x186   : > { %v1364_v34 = vpop.permute.xlu1 %1363 }
 0x187   : > { %v1463_v35 = vpop.permute.xlu0 %1462  ;;  %1397 = vst.msk [vmem:[#allocation4 + $0x168] sm:$0xff] %vm1381_vm9, %v1364_v34  ;;  %v6915_v34 = vpack.c.bf16 %v2715_v24, %v2714_v23  ;;  %v2335_v23 = vld [vmem:[#allocation2 + $0x111] sm:$0xff] }
 0x188   : > { %1511 = vst.msk [vmem:[#allocation4 + $0x8] sm:$0xff] %vm1510_vm11, %v1463_v35  ;;  %2380 = vrot.lane.b32.xlu1 %v6615_v37, %s5896_s9  ;;  %v2709_v37 = vld [vmem:[#allocation3 + $0x82] sm:$0xff] }
 0x189   : > { %2637 = vrot.lane.b32.xlu0 %v2605_v33, %s5897_s12 }
 0x18a   : > { %v1465_v36 = vpop.permute.xlu1 %1464 }
 0x18b   : > { %v1467_v40 = vpop.permute.xlu0 %1466  ;;  %1512 = vst.msk [vmem:[#allocation4 + $0x20] sm:$0xff] %vm1510_vm11, %v1465_v36  ;;  %v2048_v36 = vld [vmem:[#allocation2 + $0x78] sm:$0xff] }
 0x18c   : > { %1513 = vst.msk [vmem:[#allocation4 + $0x38] sm:$0xff] %vm1510_vm11, %v1467_v40  ;;  %2240 = vrot.lane.b32.xlu1 %v6568_v0, %s5891_s26  ;;  %v6848_v0 = vpack.c.bf16 %v2709_v37, %v2708_v30  ;;  %v2049_v40 = vld [vmem:[#allocation2 + $0x80] sm:$0xff] }
 0x18d   : > { %2242 = vrot.lane.b32.xlu0 %v6572_v1, %s5891_s26  ;;  %v1800_v37 = vld [vmem:[#allocation2 + $0xda] sm:$0xff] }
 0x18e   : > { %v1469_v45 = vpop.permute.xlu1 %1468 }
 0x18f   : > { %v1471_v42 = vpop.permute.xlu0 %1470  ;;  %1514 = vst.msk [vmem:[#allocation4 + $0x50] sm:$0xff] %vm1510_vm11, %v1469_v45  ;;  %v2580_v45 = vld [vmem:[#allocation2 + $0x82] sm:$0xff] }
 0x190   : > { %1515 = vst.msk [vmem:[#allocation4 + $0x68] sm:$0xff] %vm1510_vm11, %v1471_v42  ;;  %2513 = vrot.lane.b32.xlu1 %v6683_v25, %s5888_s18  ;;  %v2044_v25 = vld [vmem:[#allocation2 + $0x48] sm:$0xff] }
 0x191   : > { %2515 = vrot.lane.b32.xlu0 %v6687_v27, %s5888_s18  ;;  %v2075_v27 = vpack.c.bf16 %v2045_v62, %v2044_v25  ;;  %v1801_v42 = vld [vmem:[#allocation2 + $0xe2] sm:$0xff] }
 0x192   : > { %v1473_v1 = vpop.permute.xlu1 %1472  ;;  %v6934_v25 = vpack.c.bf16 %v1801_v42, %v1800_v37  ;;  %v2583_v37 = vld [vmem:[#allocation2 + $0xaa] sm:$0xff]  ;;  %v2584_v42 = vld [vmem:[#allocation2 + $0xb2] sm:$0xff] }
 0x193   : > { %v1475_v60 = vpop.permute.xlu0 %1474  ;;  %1516 = vst.msk [vmem:[#allocation4 + $0x80] sm:$0xff] %vm1510_vm11, %v1473_v1 }
 0x194   : > { %1517 = vst.msk [vmem:[#allocation4 + $0x98] sm:$0xff] %vm1510_vm11, %v1475_v60  ;;  %2770 = vrot.lane.b32.xlu1 %v6844_v53, %s5887_s14  ;;  %v2608_v60 = vpack.c.bf16 %v2580_v45, %v2579_v32 }
 0x195   : > { %2772 = vrot.lane.b32.xlu0 %v6848_v0, %s5887_s14 }
 0x196   : > { %v1477_v8 = vpop.permute.xlu1 %1476 }
 0x197   : > { %v1479_v46 = vpop.permute.xlu0 %1478  ;;  %1518 = vst.msk [vmem:[#allocation4 + $0xb0] sm:$0xff] %vm1510_vm11, %v1477_v8  ;;  %v2059_v8 = vld [vmem:[#allocation2 + $0xf8] sm:$0xff] }
 0x198   : > { %1519 = vst.msk [vmem:[#allocation4 + $0xc8] sm:$0xff] %vm1510_vm11, %v1479_v46  ;;  %1850 = vrot.lane.b32.xlu1 %v2605_v33, %s5894_s11 }
 0x199   : > { %1979 = vrot.lane.b32.xlu0 %v6804_v28, %s5889_s19  ;;  %v6883_v28 = vpack.c.bf16 %v2713_v56, %v2712_v58  ;;  %v2051_v58 = vld [vmem:[#allocation2 + $0x98] sm:$0xff] }
 0x19a   : > { %v1481_v49 = vpop.permute.xlu1 %1480 }
 0x19b   : > { %v1483_v13 = vpop.permute.xlu0 %1482  ;;  %1520 = vst.msk [vmem:[#allocation4 + $0xe0] sm:$0xff] %vm1510_vm11, %v1481_v49 }
 0x19c   : > { %1521 = vst.msk [vmem:[#allocation4 + $0xf8] sm:$0xff] %vm1510_vm11, %v1483_v13  ;;  %2108 = vrot.lane.b32.xlu1 %v2075_v27, %s5895_s29  ;;  %v2212_v13 = vpack.c.bf16 %v2189_v9, %v2188_v48 }
 0x19d   : > { %2382 = vrot.lane.b32.xlu0 %v6618_v57, %s5896_s9  ;;  %v6877_v57 = vpack.c.bf16 %v2711_v54, %v2710_v52 }
 0x19e   : > { %v1485_v50 = vpop.permute.xlu1 %1484 }
 0x19f   : > { %v1487_v26 = vpop.permute.xlu0 %1486  ;;  %1522 = vst.msk [vmem:[#allocation4 + $0x110] sm:$0xff] %vm1510_vm11, %v1485_v50  ;;  %v2590_v50 = vld [vmem:[#allocation2 + $0xfa] sm:$0xff] }
 0x1a0   : > { %1523 = vst.msk [vmem:[#allocation4 + $0x128] sm:$0xff] %vm1510_vm11, %v1487_v26  ;;  %2639 = vrot.lane.b32.xlu1 %v2606_v19, %s5897_s12 }
 0x1a1   : > { %2244 = vrot.lane.b32.xlu0 %v6578_v10, %s5891_s26 }
 0x1a2   : > { %v1489_v51 = vpop.permute.xlu1 %1488 }
 0x1a3   : > { %v1491_v55 = vpop.permute.xlu0 %1490  ;;  %1524 = vst.msk [vmem:[#allocation4 + $0x140] sm:$0xff] %vm1510_vm11, %v1489_v51 }
 0x1a4   : > { %1525 = vst.msk [vmem:[#allocation4 + $0x158] sm:$0xff] %vm1510_vm11, %v1491_v55  ;;  %2246 = vrot.lane.b32.xlu1 %v6582_v11, %s5891_s26  ;;  %v2050_v55 = vld [vmem:[#allocation2 + $0x90] sm:$0xff] }
 0x1a5   : > { %2517 = vrot.lane.b32.xlu0 %v6695_v38, %s5888_s18  ;;  %v2046_v38 = vld [vmem:[#allocation2 + $0x60] sm:$0xff] }
 0x1a6   : > { %v1493_v10 = vpop.permute.xlu1 %1492  ;;  %v2076_v3 = vpack.c.bf16 %v2047_v61, %v2046_v38  ;;  %v2582_v38 = vld [vmem:[#allocation2 + $0x9a] sm:$0xff] }
 0x1a7   : > { %v1592_v59 = vpop.permute.xlu0 %1591  ;;  %1526 = vst.msk [vmem:[#allocation4 + $0x170] sm:$0xff] %vm1510_vm11, %v1493_v10  ;;  %v2078_v10 = vpack.c.bf16 %v2051_v58, %v2050_v55 }
 0x1a8   : > { %1640 = vst.msk [vmem:[#allocation4] sm:$0xff] %vm1639_vm12, %v1592_v59  ;;  %2519 = vrot.lane.b32.xlu1 %v6699_v39, %s5888_s18 }
 0x1a9   : > { %2774 = vrot.lane.b32.xlu0 %v6877_v57, %s5887_s14 }
 0x1aa   : > { %v1594_v11 = vpop.permute.xlu1 %1593 }
 0x1ab   : > { %v1596_v2 = vpop.permute.xlu0 %1595  ;;  %1641 = vst.msk [vmem:[#allocation4 + $0x18] sm:$0xff] %vm1639_vm12, %v1594_v11  ;;  %v2581_v11 = vld [vmem:[#allocation2 + $0x92] sm:$0xff] }
 0x1ac   : > { %1642 = vst.msk [vmem:[#allocation4 + $0x30] sm:$0xff] %vm1639_vm12, %v1596_v2  ;;  %2776 = vrot.lane.b32.xlu1 %v6883_v28, %s5887_s14 }
 0x1ad   : > { %1852 = vrot.lane.b32.xlu0 %v2606_v19, %s5894_s11  ;;  %v2589_v19 = vld [vmem:[#allocation2 + $0xf2] sm:$0xff] }
 0x1ae   : > { %v1598_v39 = vpop.permute.xlu1 %1597  ;;  %v2613_v52 = vpack.c.bf16 %v2590_v50, %v2589_v19  ;;  %v2193_v19 = vld [vmem:[#allocation3 + $0x128] sm:$0xff]  ;;  %v5514_v50 = vld [vmem:[%s8405_s3] sm:$0xff]  }
 0x1af   : > { %v1600_v15 = vpop.permute.xlu0 %1599  ;;  %1643 = vst.msk [vmem:[#allocation4 + $0x48] sm:$0xff] %vm1639_vm12, %v1598_v39  ;;  %v1932_v39 = vld [vmem:[#allocation3 + $0xfa] sm:$0xff] }
 0x1b0   : > { %1644 = vst.msk [vmem:[#allocation4 + $0x60] sm:$0xff] %vm1639_vm12, %v1600_v15  ;;  %1981 = vrot.lane.b32.xlu1 %v6811_v63, %s5889_s19  ;;  %v2060_v15 = vld [vmem:[#allocation2 + $0x108] sm:$0xff] }
 0x1b1   : > { %2110 = vrot.lane.b32.xlu0 %v2076_v3, %s5895_s29  ;;  %v1931_v3 = vld [vmem:[#allocation3 + $0xf2] sm:$0xff] }
 0x1b2   : > { %v1602_v12 = vpop.permute.xlu1 %1601  ;;  %v6964_v7 = vpack.c.bf16 %v1932_v39, %v1931_v3 }
 0x1b3   : > { %v1604_v18 = vpop.permute.xlu0 %1603  ;;  %1645 = vst.msk [vmem:[#allocation4 + $0x78] sm:$0xff] %vm1639_vm12, %v1602_v12  ;;  %v2190_v12 = vld [vmem:[#allocation3 + $0x108] sm:$0xff] }
 0x1b4   : > { %1646 = vst.msk [vmem:[#allocation4 + $0x90] sm:$0xff] %vm1639_vm12, %v1604_v18  ;;  %2384 = vrot.lane.b32.xlu1 %v6624_v4, %s5896_s9  ;;  %v2717_v4 = vld [vmem:[#allocation3 + $0xe2] sm:$0xff] }
 0x1b5   : > { %2641 = vrot.lane.b32.xlu0 %v2607_v16, %s5897_s12 }
 0x1b6   : > { %v1606_v63 = vpop.permute.xlu1 %1605 }
 0x1b7   : > { %v1608_v22 = vpop.permute.xlu0 %1607  ;;  %1647 = vst.msk [vmem:[#allocation4 + $0xa8] sm:$0xff] %vm1639_vm12, %v1606_v63 }
 0x1b8   : > { %1648 = vst.msk [vmem:[#allocation4 + $0xc0] sm:$0xff] %vm1639_vm12, %v1608_v22  ;;  %2248 = vrot.lane.b32.xlu1 %v6588_v20, %s5891_s26  ;;  %v2741_v20 = vpack.c.bf16 %v2717_v4, %v2716_v31  ;;  %v2334_v22 = vld [vmem:[#allocation2 + $0x109] sm:$0xff]  ;;  %v2592_v31 = vld [vmem:[#allocation2 + $0x112] sm:$0xff] }
 0x1b9   : > { %2250 = vrot.lane.b32.xlu0 %v6592_v21, %s5891_s26 }
 0x1ba   : > { %v1610_v29 = vpop.permute.xlu1 %1609 }
 0x1bb   : > { %v1612_v33 = vpop.permute.xlu0 %1611  ;;  %1649 = vst.msk [vmem:[#allocation4 + $0xd8] sm:$0xff] %vm1639_vm12, %v1610_v29  ;;  %v2591_v29 = vld [vmem:[#allocation2 + $0x10a] sm:$0xff] }
 0x1bc   : > { %1650 = vst.msk [vmem:[#allocation4 + $0xf0] sm:$0xff] %vm1639_vm12, %v1612_v33  ;;  %2521 = vrot.lane.b32.xlu1 %v6707_v43, %s5888_s18  ;;  %v2357_v33 = vpack.c.bf16 %v2335_v23, %v2334_v22  ;;  %v2329_v22 = vld [vmem:[#allocation2 + $0xc9] sm:$0xff]  ;;  %v5520_v23 = vld [vmem:[%s8405_s3 + $0x18] sm:$0xff]  }
 0x1bd   : > { %2523 = vrot.lane.b32.xlu0 %v6711_v47, %s5888_s18  ;;  %v2077_v47 = vpack.c.bf16 %v2049_v40, %v2048_v36  ;;  %v2052_v36 = vld [vmem:[#allocation2 + $0xa8] sm:$0xff]  ;;  %v2053_v40 = vld [vmem:[#allocation2 + $0xb0] sm:$0xff] }
 0x1be   : > { %v1614_v21 = vpop.permute.xlu1 %1613  ;;  %v2079_v45 = vpack.c.bf16 %v2053_v40, %v2052_v36  ;;  %v5522_v36 = vld [vmem:[%s8405_s3 + $0x20] sm:$0xff]  }
 0x1bf   : > { %v1616_v35 = vpop.permute.xlu0 %1615  ;;  %1651 = vst.msk [vmem:[#allocation4 + $0x108] sm:$0xff] %vm1639_vm12, %v1614_v21 }
 0x1c0   : > { %1652 = vst.msk [vmem:[#allocation4 + $0x120] sm:$0xff] %vm1639_vm12, %v1616_v35  ;;  %2778 = vrot.lane.b32.xlu1 %v6915_v34, %s5887_s14 }
 0x1c1   : > { %2780 = vrot.lane.b32.xlu0 %v2741_v20, %s5887_s14 }
 0x1c2   : > { %v1618_v43 = vpop.permute.xlu1 %1617 }
 0x1c3   : > { %v1620_v44 = vpop.permute.xlu0 %1619  ;;  %1653 = vst.msk [vmem:[#allocation4 + $0x138] sm:$0xff] %vm1639_vm12, %v1618_v43 }
 0x1c4   : > { %1654 = vst.msk [vmem:[#allocation4 + $0x150] sm:$0xff] %vm1639_vm12, %v1620_v44  ;;  %1854 = vrot.lane.b32.xlu1 %v2607_v16, %s5894_s11  ;;  %v2326_v44 = vld [vmem:[#allocation2 + $0xa9] sm:$0xff] }
 0x1c5   : > { %1983 = vrot.lane.b32.xlu0 %v6844_v53, %s5889_s19  ;;  %v2058_v53 = vld [vmem:[#allocation2 + $0xf0] sm:$0xff] }
 0x1c6   : > { %v1622_v30 = vpop.permute.xlu1 %1621  ;;  %v2082_v27 = vpack.c.bf16 %v2059_v8, %v2058_v53  ;;  %v1933_v53 = vld [vmem:[#allocation3 + $0x10a] sm:$0xff]  ;;  %v1934_v8 = vld [vmem:[#allocation3 + $0x112] sm:$0xff] }
 0x1c7   : > { %v1721_v1 = vpop.permute.xlu0 %1720  ;;  %1655 = vst.msk [vmem:[#allocation4 + $0x168] sm:$0xff] %vm1639_vm12, %v1622_v30  ;;  %v6998_v9 = vpack.c.bf16 %v1934_v8, %v1933_v53 }
 0x1c8   : > { %1768 = vst.msk [vmem:[#allocation4 + $0x8] sm:$0xff] %vm720_vm4, %v1721_v1  ;;  %2112 = vrot.lane.b32.xlu1 %v2077_v47, %s5895_s29  ;;  %v2327_v47 = vld [vmem:[#allocation2 + $0xb1] sm:$0xff] }
 0x1c9   : > { %2386 = vrot.lane.b32.xlu0 %v6628_v5, %s5896_s9  ;;  %v2353_v30 = vpack.c.bf16 %v2327_v47, %v2326_v44  ;;  %v1936_v44 = vld [vmem:[#allocation3 + $0x12a] sm:$0xff]  ;;  %v5523_v47 = vld [vmem:[%s8405_s3 + $0x68] sm:$0xff]  }
 0x1ca   : > { %v1723_v62 = vpop.permute.xlu1 %1722 }
 0x1cb   : > { %v1725_v46 = vpop.permute.xlu0 %1724  ;;  %1769 = vst.msk [vmem:[#allocation4 + $0x20] sm:$0xff] %vm720_vm4, %v1723_v62  ;;  %v6990_v62 = vpack.c.bf16 %v2584_v42, %v2583_v37  ;;  %v2065_v37 = vld [vmem:[#allocation2 + $0x140] sm:$0xff]  ;;  %v5524_v42 = vld [vmem:[%s8405_s3 + $0x28] sm:$0xff]  }
 0x1cc   : > { %1770 = vst.msk [vmem:[#allocation4 + $0x38] sm:$0xff] %vm720_vm4, %v1725_v46  ;;  %2643 = vrot.lane.b32.xlu1 %v2608_v60, %s5897_s12 }
 0x1cd   : > { %1864 = vrot.lane.b32.xlu0 %v6934_v25, %s5894_s11 }
 0x1ce   : > { %v1727_v49 = vpop.permute.xlu1 %1726 }
 0x1cf   : > { %v1729_v5 = vpop.permute.xlu0 %1728  ;;  %1771 = vst.msk [vmem:[#allocation4 + $0x50] sm:$0xff] %vm720_vm4, %v1727_v49  ;;  %v2336_v49 = vld [vmem:[#allocation2 + $0x121] sm:$0xff] }
 0x1d0   : > { %1772 = vst.msk [vmem:[#allocation4 + $0x68] sm:$0xff] %vm720_vm4, %v1729_v5  ;;  %1993 = vrot.lane.b32.xlu1 %v2741_v20, %s5889_s19  ;;  %v2614_v20 = vpack.c.bf16 %v2592_v31, %v2591_v29  ;;  %v2585_v29 = vld [vmem:[#allocation2 + $0xc2] sm:$0xff]  ;;  %v2586_v31 = vld [vmem:[#allocation2 + $0xca] sm:$0xff] }
 0x1d1   : > { %2122 = vrot.lane.b32.xlu0 %v2082_v27, %s5895_s29  ;;  %v2063_v27 = vld [vmem:[#allocation2 + $0x128] sm:$0xff] }
 0x1d2   : > { %v1731_v26 = vpop.permute.xlu1 %1730 }
 0x1d3   : > { %v1733_v51 = vpop.permute.xlu0 %1732  ;;  %1773 = vst.msk [vmem:[#allocation4 + $0x80] sm:$0xff] %vm720_vm4, %v1731_v26 }
 0x1d4   : > { %1774 = vst.msk [vmem:[#allocation4 + $0x98] sm:$0xff] %vm720_vm4, %v1733_v51  ;;  %2252 = vrot.lane.b32.xlu1 %v2212_v13, %s5891_s26  ;;  %v2192_v13 = vld [vmem:[#allocation3 + $0x120] sm:$0xff] }
 0x1d5   : > { %2396 = vrot.lane.b32.xlu0 %v6646_v41, %s5896_s9  ;;  %v2609_v41 = vpack.c.bf16 %v2582_v38, %v2581_v11  ;;  %v2594_v11 = vld [vmem:[#allocation2 + $0x12a] sm:$0xff] }
 0x1d6   : > { %v1735_v54 = vpop.permute.xlu1 %1734  ;;  %v5516_v38 = vld [vmem:[%s8405_s3 + $0x8] sm:$0xff]  }
 0x1d7   : > { %v1737_v56 = vpop.permute.xlu0 %1736  ;;  %1775 = vst.msk [vmem:[#allocation4 + $0xb0] sm:$0xff] %vm720_vm4, %v1735_v54  ;;  %v5515_v54 = vld [vmem:[%s8405_s3 + $0x48] sm:$0xff]  }
 0x1d8   : > { %1776 = vst.msk [vmem:[#allocation4 + $0xc8] sm:$0xff] %vm720_vm4, %v1737_v56  ;;  %2653 = vrot.lane.b32.xlu1 %v2613_v52, %s5897_s12  ;;  %v2214_v56 = vpack.c.bf16 %v2193_v19, %v2192_v13  ;;  %v2596_v13 = vld [vmem:[#allocation2 + $0x142] sm:$0xff]  ;;  %v5526_v19 = vld [vmem:[%s8405_s3 + $0x30] sm:$0xff]  }
 0x1d9   : > { %1856 = vrot.lane.b32.xlu0 %v2608_v60, %s5894_s11 }
 0x1da   : > { %v1739_v59 = vpop.permute.xlu1 %1738 }
 0x1db   : > { %v1741_v61 = vpop.permute.xlu0 %1740  ;;  %1777 = vst.msk [vmem:[#allocation4 + $0xe0] sm:$0xff] %vm720_vm4, %v1739_v59  ;;  %v2593_v59 = vld [vmem:[#allocation2 + $0x122] sm:$0xff] }
 0x1dc   : > { %1778 = vst.msk [vmem:[#allocation4 + $0xf8] sm:$0xff] %vm720_vm4, %v1741_v61  ;;  %1985 = vrot.lane.b32.xlu1 %v6848_v0, %s5889_s19  ;;  %v2061_v0 = vld [vmem:[#allocation2 + $0x110] sm:$0xff]  ;;  %v2615_v39 = vpack.c.bf16 %v2594_v11, %v2593_v59  ;;  %v2057_v59 = vld [vmem:[#allocation2 + $0xe0] sm:$0xff] }
 0x1dd   : > { %2114 = vrot.lane.b32.xlu0 %v2078_v10, %s5895_s29  ;;  %v2083_v63 = vpack.c.bf16 %v2061_v0, %v2060_v15  ;;  %v2054_v0 = vld [vmem:[#allocation2 + $0xc0] sm:$0xff] }
 0x1de   : > { %v1743_v2 = vpop.permute.xlu1 %1742 }
 0x1df   : > { %v1745_v6 = vpop.permute.xlu0 %1744  ;;  %1779 = vst.msk [vmem:[#allocation4 + $0x110] sm:$0xff] %vm720_vm4, %v1743_v2 }
 0x1e0   : > { %1780 = vst.msk [vmem:[#allocation4 + $0x128] sm:$0xff] %vm720_vm4, %v1745_v6  ;;  %2388 = vrot.lane.b32.xlu1 %v6634_v17, %s5896_s9  ;;  %v2213_v17 = vpack.c.bf16 %v2191_v14, %v2190_v12  ;;  %v5518_v6 = vld [vmem:[%s8405_s3 + $0x10] sm:$0xff]   ;;  %v5519_v12 = vld [vmem:[%s8405_s3 + $0x58] sm:$0xff]  }
 0x1e1   : > { %2645 = vrot.lane.b32.xlu0 %v2609_v41, %s5897_s12 }
 0x1e2   : > { %v1747_v16 = vpop.permute.xlu1 %1746 }
 0x1e3   : > { %v1749_v18 = vpop.permute.xlu0 %1748  ;;  %1781 = vst.msk [vmem:[#allocation4 + $0x140] sm:$0xff] %vm720_vm4, %v1747_v16  ;;  %v2055_v16 = vld [vmem:[#allocation2 + $0xc8] sm:$0xff] }
 0x1e4   : > { %1782 = vst.msk [vmem:[#allocation4 + $0x158] sm:$0xff] %vm720_vm4, %v1749_v18  ;;  %1866 = vrot.lane.b32.xlu1 %v2613_v52, %s5894_s11  ;;  %v2337_v52 = vld [vmem:[#allocation2 + $0x129] sm:$0xff] }
 0x1e5   : > { %1995 = vrot.lane.b32.xlu0 %v6964_v7, %s5889_s19  ;;  %v2358_v10 = vpack.c.bf16 %v2337_v52, %v2336_v49 }
 0x1e6   : > { %v1751_v24 = vpop.permute.xlu1 %1750 }
 0x1e7   : > { %v1849_v4 = vpop.permute.xlu0 %1848  ;;  %1783 = vst.msk [vmem:[#allocation4 + $0x170] sm:$0xff] %vm720_vm4, %v1751_v24 }
 0x1e8   : > { %1897 = vst.msk [vmem:[#allocation4] sm:$0xff] %vm1896_vm13, %v1849_v4  ;;  %2124 = vrot.lane.b32.xlu1 %v2083_v63, %s5895_s29  ;;  %v2080_v63 = vpack.c.bf16 %v2055_v16, %v2054_v0  ;;  %v5521_v4 = vld [vmem:[%s8405_s3 + $0x60] sm:$0xff]  }
 0x1e9   : > { %2254 = vrot.lane.b32.xlu0 %v2213_v17, %s5891_s26  ;;  %v2328_v17 = vld [vmem:[#allocation2 + $0xc1] sm:$0xff] }
 0x1ea   : > { %v2237_v21 = vpop.permute.xlu1 %2236  ;;  %v5529_v16 = vld [vmem:[%s8405_s3 + $0x80] sm:$0xff]  }
 0x1eb   : > { %v6975_v35 = vpop.permute.xlu0 %2238  ;;  %2285 = vst.msk [vmem:[#allocation4 + $0x10] sm:$0xff] %vm302_vm2, %v2237_v21  ;;  %5405 = vmatprep.subr.bf16.mxu0 %v5529_v16 }
 0x1ec   : > { %2287 = vst.msk [vmem:[#allocation4 + $0x28] sm:$0xff] %vm302_vm2, %v6975_v35  ;;  %2398 = vrot.lane.b32.xlu1 %v2357_v33, %s5896_s9 }
 0x1ed   : > { %2655 = vrot.lane.b32.xlu0 %v2614_v20, %s5897_s12 }
 0x1ee   : > { %v2510_v43 = vpop.permute.xlu1 %2509 }
 0x1ef   : > { %v2512_v32 = vpop.permute.xlu0 %2511  ;;  %2557 = vst.msk [vmem:[#allocation4 + $0x10] sm:$0xff] %vm1510_vm11, %v2510_v43  ;;  %v1935_v43 = vld [vmem:[#allocation3 + $0x122] sm:$0xff] }
 0x1f0   : > { %2558 = vst.msk [vmem:[#allocation4 + $0x28] sm:$0xff] %vm1510_vm11, %v2512_v32  ;;  %1858 = vrot.lane.b32.xlu1 %v2609_v41, %s5894_s11  ;;  %v5517_v41 = vld [vmem:[%s8405_s3 + $0x50] sm:$0xff]  }
 0x1f1   : > { %1987 = vrot.lane.b32.xlu0 %v6877_v57, %s5889_s19  ;;  %v2062_v57 = vld [vmem:[#allocation2 + $0x120] sm:$0xff] }
 0x1f2   : > { %v2767_v1 = vpop.permute.xlu1 %2766  ;;  %v2084_v5 = vpack.c.bf16 %v2063_v27, %v2062_v57  ;;  %v2338_v27 = vld [vmem:[#allocation2 + $0x139] sm:$0xff] }
 0x1f3   : > { %v2769_v60 = vpop.permute.xlu0 %2768  ;;  %2814 = vst.msk [vmem:[#allocation4 + $0x10] sm:$0xff] %vm720_vm4, %v2767_v1 }
 0x1f4   : > { %2815 = vst.msk [vmem:[#allocation4 + $0x28] sm:$0xff] %vm720_vm4, %v2769_v60  ;;  %2116 = vrot.lane.b32.xlu1 %v2079_v45, %s5895_s29  ;;  %v7067_v45 = vpack.c.bf16 %v1936_v44, %v1935_v43 }
 0x1f5   : > { %2390 = vrot.lane.b32.xlu0 %v2353_v30, %s5896_s9  ;;  %v2064_v30 = vld [vmem:[#allocation2 + $0x138] sm:$0xff] }
 0x1f6   : > { %v1978_v46 = vpop.permute.xlu1 %1977 }
 0x1f7   : > { %v2107_v48 = vpop.permute.xlu0 %2106  ;;  %2025 = vst.msk [vmem:[#allocation4 + $0x8] sm:$0xff] %vm978_vm6, %v1978_v46  ;;  %v2085_v46 = vpack.c.bf16 %v2065_v37, %v2064_v30  ;;  %v2461_v30 = vld [vmem:[#allocation3 + $0xf1] sm:$0xff]  ;;  %v2462_v37 = vld [vmem:[#allocation3 + $0xf9] sm:$0xff] }
 0x1f8   : > { %2155 = vst.msk [vmem:[#allocation4] sm:$0xff] %vm2154_vm14, %v2107_v48  ;;  %2647 = vrot.lane.b32.xlu1 %v6990_v62, %s5897_s12  ;;  %v2339_v48 = vld [vmem:[#allocation2 + $0x141] sm:$0xff] }
 0x1f9   : > { %2284 = vst.msk [vmem:[#allocation4 + $0x8] sm:$0xff] %vm1236_vm8, %v2237_v21  ;;  %1868 = vrot.lane.b32.xlu0 %v2614_v20, %s5894_s11  ;;  %v2354_v20 = vpack.c.bf16 %v2329_v22, %v2328_v17  ;;  %v7052_v21 = vpack.c.bf16 %v2586_v31, %v2585_v29  ;;  %v2359_v52 = vpack.c.bf16 %v2339_v48, %v2338_v27  ;;  %v2067_v17 = vld [vmem:[#allocation2 + $0x158] sm:$0xff]  ;;  %v5530_v22 = vld [vmem:[%s8405_s3 + $0x88] sm:$0xff]  }
 0x1fa   : > { %v2381_v26 = vpop.permute.xlu1 %2380  ;;  %v2833_v51 = vld [vmem:[#allocation4 + $0x10] sm:$0xff] }
 0x1fb   : > { %v2638_v55 = vpop.permute.xlu0 %2637  ;;  %2429 = vst.msk [vmem:[#allocation4] sm:$0xff] %vm2428_vm15, %v2381_v26  ;;  %5389 = vmatprep.mubr.msk.bf16.mxu1 %vm3025_vm1, %v2833_v51  ;;  %v2836_v58 = vld [vmem:[#allocation4 + $0x28] sm:$0xff]  ;;  %v5527_v26 = vld [vmem:[%s8405_s3 + $0x78] sm:$0xff]  }
 0x1fc   : > { %2686 = vst.msk [vmem:[#allocation4] sm:$0xff] %vm2685_vm3, %v2638_v55  ;;  %1997 = vrot.lane.b32.xlu1 %v6998_v9, %s5889_s19  ;;  %5390 = vmatmul.mubr.msk.bf16.vlgmr.msra.gmra.mrb[0].mxu1 %vm3025_vm1, %v2836_v58  ;;  %v5528_v58 = vld [vmem:[%s8405_s3 + $0x38] sm:$0xff]  }
 0x1fd   : > { %2126 = vrot.lane.b32.xlu0 %v2084_v5, %s5895_s29  ;;  %5303 = vmatpush3.bf16.msra.mxu1 %v5514_v50  ;;  %v2595_v5 = vld [vmem:[#allocation2 + $0x13a] sm:$0xff] }
 0x1fe   : > { %v7017_v61 = vpop.permute.xlu1 %2240  ;;  %5304 = vmatprep.subr.bf16.mxu1 %v5515_v54  ;;  %v2616_v54 = vpack.c.bf16 %v2596_v13, %v2595_v5 }
 0x1ff   : > { %v7022_v2 = vpop.permute.xlu0 %2242  ;;  %2289 = vst.msk [vmem:[#allocation4 + $0x40] sm:$0xff] %vm302_vm2, %v7017_v61 }
 0x200   : > { %v2832_v3 = vld [vmem:[#allocation4 + $0x8] sm:$0xff]  ;;  %2291 = vst.msk [vmem:[#allocation4 + $0x58] sm:$0xff] %vm302_vm2, %v7022_v2  ;;  %2256 = vrot.lane.b32.xlu1 %v2214_v56, %s5891_s26 }
 0x201   : > { %3086 = vmatprep.mubr.bf16.mxu0 %v2832_v3  ;;  %2400 = vrot.lane.b32.xlu0 %v2358_v10, %s5896_s9  ;;  %v2056_v10 = vld [vmem:[#allocation2 + $0xd8] sm:$0xff]  ;;  %v2331_v3 = vld [vmem:[#allocation2 + $0xe1] sm:$0xff] }
 0x202   : > { %5305 = vmatpush3.bf16.msra.mxu1 %v5516_v38  ;;  %v2514_v15 = vpop.permute.xlu1 %2513 }
 0x203   : > { %5306 = vmatprep.subr.bf16.mxu1 %v5517_v41  ;;  %v2516_v14 = vpop.permute.xlu0 %2515  ;;  %2559 = vst.msk [vmem:[#allocation4 + $0x40] sm:$0xff] %vm1510_vm11, %v2514_v15  ;;  %v2831_v18 = vld [vmem:[#allocation4] sm:$0xff] }
 0x204   : > { %2560 = vst.msk [vmem:[#allocation4 + $0x58] sm:$0xff] %vm1510_vm11, %v2516_v14  ;;  %2657 = vrot.lane.b32.xlu1 %v2615_v39, %s5897_s12  ;;  %3087 = vmatmul.mubr.bf16.vlgmr.msra.gmra.mrb[0].mxu0 %v2831_v18  ;;  %v2330_v41 = vld [vmem:[#allocation2 + $0xd9] sm:$0xff]  ;;  %v1937_v14 = vld [vmem:[#allocation3 + $0x13a] sm:$0xff] }
 0x205   : > { %1860 = vrot.lane.b32.xlu0 %v6990_v62, %s5894_s11  ;;  %v2195_v62 = vld [vmem:[#allocation3 + $0x140] sm:$0xff]  ;;  %v2355_v15 = vpack.c.bf16 %v2331_v3, %v2330_v41  ;;  %5406 = vmatpush3.bf16.msra.mxu0 %v5529_v16 }
 0x206   : > { %5307 = vmatpush3.bf16.msra.mxu1 %v5518_v6  ;;  %v2771_v24 = vpop.permute.xlu1 %2770  ;;  %v2081_v6 = vpack.c.bf16 %v2057_v59, %v2056_v10  ;;  %v1938_v18 = vld [vmem:[#allocation3 + $0x142] sm:$0xff]  ;;  %5407 = vmatprep.subr.bf16.mxu0 %v5530_v22  ;;  %v2342_v3 = vld [vmem:[#allocation2 + $0x169] sm:$0xff] }
 0x207   : > { %5308 = vmatprep.subr.bf16.mxu1 %v5519_v12  ;;  %v2773_v33 = vpop.permute.xlu0 %2772  ;;  %2816 = vst.msk [vmem:[#allocation4 + $0x40] sm:$0xff] %vm720_vm4, %v2771_v24  ;;  %v7128_v29 = vpack.c.bf16 %v1938_v18, %v1937_v14  ;;  %v2198_v59 = vld [vmem:[#allocation3 + $0x168] sm:$0xff] }
 0x208   : > { %2817 = vst.msk [vmem:[#allocation4 + $0x58] sm:$0xff] %vm720_vm4, %v2773_v33  ;;  %1989 = vrot.lane.b32.xlu1 %v6883_v28, %s5889_s19  ;;  %v2194_v28 = vld [vmem:[#allocation3 + $0x138] sm:$0xff]  ;;  %v2600_v16 = vld [vmem:[#allocation2 + $0x172] sm:$0xff] }
 0x209   : > { %2118 = vrot.lane.b32.xlu0 %v2080_v63, %s5895_s29  ;;  %v2215_v57 = vpack.c.bf16 %v2195_v62, %v2194_v28  ;;  %v2066_v63 = vld [vmem:[#allocation2 + $0x150] sm:$0xff]  ;;  %v2197_v33 = vld [vmem:[#allocation3 + $0x158] sm:$0xff]  ;;  %5408 = vmatpush3.bf16.msra.mxu0 %v5530_v22  ;;  %v2466_v18 = vld [vmem:[#allocation3 + $0x129] sm:$0xff] }
 0x20a   : > { %5309 = vmatpush3.bf16.msra.mxu1 %v5520_v23  ;;  %v1851_v40 = vpop.permute.xlu1 %1850  ;;  %v2086_v31 = vpack.c.bf16 %v2067_v17, %v2066_v63  ;;  %v2465_v14 = vld [vmem:[#allocation3 + $0x121] sm:$0xff] }
 0x20b   : > { %5310 = vmatprep.subr.bf16.mxu1 %v5521_v4  ;;  %v1980_v32 = vpop.permute.xlu0 %1979  ;;  %1898 = vst.msk [vmem:[#allocation4 + $0x18] sm:$0xff] %vm1896_vm13, %v1851_v40  ;;  %v2196_v4 = vld [vmem:[#allocation3 + $0x150] sm:$0xff]  ;;  %v2487_v22 = vpack.c.bf16 %v2466_v18, %v2465_v14 }
 0x20c   : > { %2026 = vst.msk [vmem:[#allocation4 + $0x20] sm:$0xff] %vm978_vm6, %v1980_v32  ;;  %2392 = vrot.lane.b32.xlu1 %v2354_v20, %s5896_s9  ;;  %v2340_v20 = vld [vmem:[#allocation2 + $0x151] sm:$0xff]  ;;  %v2341_v40 = vld [vmem:[#allocation2 + $0x159] sm:$0xff]  ;;  %v2216_v43 = vpack.c.bf16 %v2197_v33, %v2196_v4  ;;  %v2347_v14 = vld [vmem:[#allocation2 + $0x1a1] sm:$0xff] }
 0x20d   : > { %2286 = vst.msk [vmem:[#allocation4 + $0x20] sm:$0xff] %vm1236_vm8, %v6975_v35  ;;  %2649 = vrot.lane.b32.xlu0 %v7052_v21, %s5897_s12  ;;  %v5525_v35 = vld [vmem:[%s8405_s3 + $0x70] sm:$0xff]   ;;  %v2360_v44 = vpack.c.bf16 %v2341_v40, %v2340_v20  ;;  %v2598_v32 = vld [vmem:[#allocation2 + $0x15a] sm:$0xff] }
 0x20e   : > { %5311 = vmatpush3.bf16.msra.mxu1 %v5522_v36  ;;  %v2109_v1 = vpop.permute.xlu1 %2108  ;;  %v2839_v60 = vld [vmem:[#allocation4 + $0x40] sm:$0xff] }
 0x20f   : > { %5312 = vmatprep.subr.bf16.mxu1 %v5523_v47  ;;  %v2383_v53 = vpop.permute.xlu0 %2382  ;;  %2156 = vst.msk [vmem:[#allocation4 + $0x18] sm:$0xff] %vm2154_vm14, %v2109_v1  ;;  %5393 = vmatprep.mubr.msk.bf16.mxu1 %vm3025_vm1, %v2839_v60  ;;  %v2842_v8 = vld [vmem:[#allocation4 + $0x58] sm:$0xff] }
 0x210   : > { %2430 = vst.msk [vmem:[#allocation4 + $0x18] sm:$0xff] %vm2428_vm15, %v2383_v53  ;;  %1870 = vrot.lane.b32.xlu1 %v2615_v39, %s5894_s11  ;;  %5394 = vmatmul.mubr.msk.bf16.gmra.mrb[4].mxu1 %vm3025_vm1, %v2842_v8  ;;  %v2597_v47 = vld [vmem:[#allocation2 + $0x152] sm:$0xff]  ;;  %v2464_v8 = vld [vmem:[#allocation3 + $0x111] sm:$0xff] }
 0x211   : > { %1999 = vrot.lane.b32.xlu0 %v7067_v45, %s5889_s19  ;;  %v2617_v62 = vpack.c.bf16 %v2598_v32, %v2597_v47  ;;  %v2463_v53 = vld [vmem:[#allocation3 + $0x109] sm:$0xff] }
 0x212   : > { %5313 = vmatpush3.bf16.msra.mxu1 %v5524_v42  ;;  %v2640_v49 = vpop.permute.xlu1 %2639  ;;  %v5532_v42 = vld [vmem:[%s8405_s3 + $0x98] sm:$0xff]  }
 0x213   : > { %5314 = vmatprep.subr.bf16.mxu1 %v5525_v35  ;;  %v7085_v50 = vpop.permute.xlu0 %2244  ;;  %2687 = vst.msk [vmem:[#allocation4 + $0x18] sm:$0xff] %vm2685_vm3, %v2640_v49  ;;  %v2485_v35 = vpack.c.bf16 %v2462_v37, %v2461_v30  ;;  %v2486_v49 = vpack.c.bf16 %v2464_v8, %v2463_v53  ;;  %v1941_v40 = vld [vmem:[#allocation3 + $0x16a] sm:$0xff]  ;;  %v2200_v37 = vld [vmem:[#allocation3 + $0x180] sm:$0xff] }
 0x214   : > { %2293 = vst.msk [vmem:[#allocation4 + $0x70] sm:$0xff] %vm302_vm2, %v7085_v50  ;;  %2128 = vrot.lane.b32.xlu1 %v2085_v46, %s5895_s29  ;;  %v2835_v51 = vld [vmem:[#allocation4 + $0x20] sm:$0xff] }
 0x215   : > { %2258 = vrot.lane.b32.xlu0 %v2215_v57, %s5891_s26  ;;  %3094 = vmatprep.mubr.bf16.mxu0 %v2835_v51  ;;  %v5533_v57 = vld [vmem:[%s8405_s3 + $0xa0] ss:$0 sps:$4 sm:$0x33]   ;;  %v1940_v51 = vld [vmem:[#allocation3 + $0x15a] sm:$0xff] }
 0x216   : > { %v7095_v55 = vpop.permute.xlu1 %2246  ;;  %5315 = vmatpush3.bf16.msra.mxu1 %v5526_v19  ;;  %v4085_v5 = vsel %vm3050_vm10, %v5533_v57, 0 }
 0x217   : > { %v2518_v56 = vpop.permute.xlu0 %2517  ;;  %2295 = vst.msk [vmem:[#allocation4 + $0x88] sm:$0xff] %vm302_vm2, %v7095_v55  ;;  %5316 = vmatprep.subr.bf16.mxu1 %v5527_v26  ;;  %v1939_v26 = vld [vmem:[#allocation3 + $0x152] sm:$0xff] }
 0x218   : > { %2561 = vst.msk [vmem:[#allocation4 + $0x70] sm:$0xff] %vm1510_vm11, %v2518_v56  ;;  %2402 = vrot.lane.b32.xlu1 %v2359_v52, %s5896_s9  ;;  %v7171_v10 = vpack.c.bf16 %v1940_v51, %v1939_v26  ;;  %v2471_v26 = vld [vmem:[#allocation3 + $0x169] sm:$0xff]  ;;  %v2472_v51 = vld [vmem:[#allocation3 + $0x171] sm:$0xff] }
 0x219   : > { %2659 = vrot.lane.b32.xlu0 %v2616_v54, %s5897_s12 }
 0x21a   : > { %v2520_v11 = vpop.permute.xlu1 %2519  ;;  %v2834_v38 = vld [vmem:[#allocation4 + $0x18] sm:$0xff]  ;;  %5317 = vmatpush3.bf16.msra.mxu1 %v5528_v58  ;;  %v2069_v58 = vld [vmem:[#allocation2 + $0x170] sm:$0xff] }
 0x21b   : > { %v2775_v39 = vpop.permute.xlu0 %2774  ;;  %2562 = vst.msk [vmem:[#allocation4 + $0x88] sm:$0xff] %vm1510_vm11, %v2520_v11  ;;  %3095 = vmatmul.mubr.bf16.gmra.mrb[4].mxu0 %v2834_v38  ;;  %v2199_v11 = vld [vmem:[#allocation3 + $0x170] sm:$0xff] }
 0x21c   : > { %2818 = vst.msk [vmem:[#allocation4 + $0x70] sm:$0xff] %vm720_vm4, %v2775_v39  ;;  %1862 = vrot.lane.b32.xlu1 %v7052_v21, %s5894_s11  ;;  %v2343_v39 = vld [vmem:[#allocation2 + $0x171] sm:$0xff] }
 0x21d   : > { %1991 = vrot.lane.b32.xlu0 %v6915_v34, %s5889_s19 }
 0x21e   : > { %v2777_v0 = vpop.permute.xlu1 %2776 }
 0x21f   : > { %v1853_v12 = vpop.permute.xlu0 %1852  ;;  %2819 = vst.msk [vmem:[#allocation4 + $0x88] sm:$0xff] %vm720_vm4, %v2777_v0  ;;  %v2599_v0 = vld [vmem:[#allocation2 + $0x16a] sm:$0xff] }
 0x220   : > { %1899 = vst.msk [vmem:[#allocation4 + $0x30] sm:$0xff] %vm1896_vm13, %v1853_v12  ;;  %2120 = vrot.lane.b32.xlu1 %v2081_v6, %s5895_s29  ;;  %v2618_v17 = vpack.c.bf16 %v2600_v16, %v2599_v0  ;;  %v2202_v0 = vld [vmem:[#allocation3 + $0x198] sm:$0xff]  ;;  %v2203_v16 = vld [vmem:[#allocation3 + $0x1a0] sm:$0xff] }
 0x221   : > { %2394 = vrot.lane.b32.xlu0 %v2355_v15, %s5896_s9  ;;  %v2361_v15 = vpack.c.bf16 %v2343_v39, %v2342_v3  ;;  %v2072_v39 = vld [vmem:[#allocation2 + $0x198] sm:$0xff] }
 0x222   : > { %v1982_v34 = vpop.permute.xlu1 %1981 }
 0x223   : > { %v2111_v23 = vpop.permute.xlu0 %2110  ;;  %2027 = vst.msk [vmem:[#allocation4 + $0x38] sm:$0xff] %vm978_vm6, %v1982_v34  ;;  %v2845_v24 = vld [vmem:[#allocation4 + $0x70] sm:$0xff] }
 0x224   : > { %2157 = vst.msk [vmem:[#allocation4 + $0x30] sm:$0xff] %vm2154_vm14, %v2111_v23  ;;  %2651 = vrot.lane.b32.xlu1 %v6934_v25, %s5897_s12  ;;  %5397 = vmatprep.mubr.msk.bf16.mxu1 %vm3025_vm1, %v2845_v24  ;;  %v2467_v23 = vld [vmem:[#allocation3 + $0x139] sm:$0xff]  ;;  %v2468_v24 = vld [vmem:[#allocation3 + $0x141] sm:$0xff] }
 0x225   : > { %2288 = vst.msk [vmem:[#allocation4 + $0x38] sm:$0xff] %vm1236_vm8, %v7017_v61  ;;  %1872 = vrot.lane.b32.xlu0 %v2616_v54, %s5894_s11  ;;  %v5531_v61 = vld [vmem:[%s8405_s3 + $0x90] sm:$0xff]   ;;  %v2068_v54 = vld [vmem:[#allocation2 + $0x168] sm:$0xff]  ;;  %v2488_v33 = vpack.c.bf16 %v2468_v24, %v2467_v23 }
 0x226   : > { %v2385_v21 = vpop.permute.xlu1 %2384  ;;  %v2848_v36 = vld [vmem:[#allocation4 + $0x88] sm:$0xff]  ;;  %5409 = vmatprep.subr.bf16.mxu0 %v5531_v61 }
 0x227   : > { %v2642_v25 = vpop.permute.xlu0 %2641  ;;  %2431 = vst.msk [vmem:[#allocation4 + $0x30] sm:$0xff] %vm2428_vm15, %v2385_v21  ;;  %5398 = vmatmul.mubr.msk.bf16.gmra.mrb[8].mxu1 %vm3025_vm1, %v2848_v36  ;;  %5410 = vmatpush3.bf16.msra.mxu0 %v5531_v61  ;;  %v1942_v61 = vld [vmem:[#allocation3 + $0x172] sm:$0xff] }
 0x228   : > { %2688 = vst.msk [vmem:[#allocation4 + $0x30] sm:$0xff] %vm2685_vm3, %v2642_v25  ;;  %2001 = vrot.lane.b32.xlu1 %v7128_v29, %s5889_s19  ;;  %5411 = vmatprep.subr.bf16.mxu0 %v5532_v42  ;;  %v1959_v32 = vpack.c.bf16 %v1942_v61, %v1941_v40  ;;  %v2604_v23 = vld [vmem:[#allocation2 + $0x1a2] sm:$0xff]  ;;  %v2476_v40 = vld [vmem:[#allocation3 + $0x1a1] sm:$0xff] }
 0x229   : > { %2130 = vrot.lane.b32.xlu0 %v2086_v31, %s5895_s29 }
 0x22a   : > { %v7140_v28 = vpop.permute.xlu1 %2248 }
 0x22b   : > { %v7145_v1 = vpop.permute.xlu0 %2250  ;;  %2297 = vst.msk [vmem:[#allocation4 + $0xa0] sm:$0xff] %vm302_vm2, %v7140_v28  ;;  %5412 = vmatpush3.bf16.msra.mxu0 %v5532_v42  ;;  %v2201_v42 = vld [vmem:[#allocation3 + $0x188] sm:$0xff] }
 0x22c   : > { %v2838_v60 = vld [vmem:[#allocation4 + $0x38] sm:$0xff]  ;;  %2299 = vst.msk [vmem:[#allocation4 + $0xb8] sm:$0xff] %vm302_vm2, %v7145_v1  ;;  %2260 = vrot.lane.b32.xlu1 %v2216_v43, %s5891_s26  ;;  %5432 = vmatprep.subr.msk.bf16.mxu0 %vm3050_vm10, %v5533_v57  ;;  %v2070_v43 = vld [vmem:[#allocation2 + $0x180] sm:$0xff]  ;;  %v2602_v57 = vld [vmem:[#allocation2 + $0x18a] sm:$0xff] }
 0x22d   : > { %3102 = vmatprep.mubr.bf16.mxu0 %v2838_v60  ;;  %2404 = vrot.lane.b32.xlu0 %v2360_v44, %s5896_s9  ;;  %v2071_v44 = vld [vmem:[#allocation2 + $0x188] sm:$0xff] }
 0x22e   : > { %v2522_v46 = vpop.permute.xlu1 %2521  ;;  %v2088_v30 = vpack.c.bf16 %v2071_v44, %v2070_v43 }
 0x22f   : > { %v2524_v27 = vpop.permute.xlu0 %2523  ;;  %2563 = vst.msk [vmem:[#allocation4 + $0xa0] sm:$0xff] %vm1510_vm11, %v2522_v46  ;;  %v2837_v48 = vld [vmem:[#allocation4 + $0x30] sm:$0xff]  ;;  %5414 = vmatpush3.bf16.msra.mxu0 %v4085_v5  ;;  %v2601_v46 = vld [vmem:[#allocation2 + $0x182] sm:$0xff] }
 0x230   : > { %2564 = vst.msk [vmem:[#allocation4 + $0xb8] sm:$0xff] %vm1510_vm11, %v2524_v27  ;;  %2661 = vrot.lane.b32.xlu1 %v2617_v62, %s5897_s12  ;;  %3103 = vmatmul.mubr.bf16.gmra.mrb[8].mxu0 %v2837_v48  ;;  %v2470_v5 = vld [vmem:[#allocation3 + $0x159] sm:$0xff] }
 0x231   : > { %2525 = vrot.lane.b32.xlu0 %v2485_v35, %s5888_s18  ;;  %v2345_v35 = vld [vmem:[#allocation2 + $0x189] sm:$0xff] }
 0x232   : > { %v2779_v13 = vpop.permute.xlu1 %2778 }
 0x233   : > { %v2781_v19 = vpop.permute.xlu0 %2780  ;;  %2820 = vst.msk [vmem:[#allocation4 + $0xa0] sm:$0xff] %vm720_vm4, %v2779_v13 }
 0x234   : > { %2821 = vst.msk [vmem:[#allocation4 + $0xb8] sm:$0xff] %vm720_vm4, %v2781_v19  ;;  %2527 = vrot.lane.b32.xlu1 %v2486_v49, %s5888_s18  ;;  %v2469_v49 = vld [vmem:[#allocation3 + $0x151] sm:$0xff] }
 0x235   : > { %2782 = vrot.lane.b32.xlu0 %v6964_v7, %s5887_s14  ;;  %v2087_v7 = vpack.c.bf16 %v2069_v58, %v2068_v54  ;;  %v2489_v19 = vpack.c.bf16 %v2470_v5, %v2469_v49 }
 0x236   : > { %v1855_v52 = vpop.permute.xlu1 %1854 }
 0x237   : > { %v1984_v56 = vpop.permute.xlu0 %1983  ;;  %1900 = vst.msk [vmem:[#allocation4 + $0x48] sm:$0xff] %vm1896_vm13, %v1855_v52 }
 0x238   : > { %2028 = vst.msk [vmem:[#allocation4 + $0x50] sm:$0xff] %vm978_vm6, %v1984_v56  ;;  %2784 = vrot.lane.b32.xlu1 %v6998_v9, %s5887_s14  ;;  %v2490_v56 = vpack.c.bf16 %v2472_v51, %v2471_v26 }
 0x239   : > { %2290 = vst.msk [vmem:[#allocation4 + $0x50] sm:$0xff] %vm1236_vm8, %v7022_v2  ;;  %1874 = vrot.lane.b32.xlu0 %v2617_v62, %s5894_s11  ;;  %v2217_v2 = vpack.c.bf16 %v2199_v11, %v2198_v59  ;;  %v2344_v62 = vld [vmem:[#allocation2 + $0x181] sm:$0xff] }
 0x23a   : > { %v2113_v38 = vpop.permute.xlu1 %2112  ;;  %v2851_v41 = vld [vmem:[#allocation4 + $0xa0] sm:$0xff]  ;;  %v2362_v8 = vpack.c.bf16 %v2345_v35, %v2344_v62 }
 0x23b   : > { %v2387_v6 = vpop.permute.xlu0 %2386  ;;  %2158 = vst.msk [vmem:[#allocation4 + $0x48] sm:$0xff] %vm2154_vm14, %v2113_v38  ;;  %5401 = vmatprep.mubr.msk.bf16.mxu1 %vm3025_vm1, %v2851_v41  ;;  %v2854_v9 = vld [vmem:[#allocation4 + $0xb8] sm:$0xff] }
 0x23c   : > { %2432 = vst.msk [vmem:[#allocation4 + $0x48] sm:$0xff] %vm2428_vm15, %v2387_v6  ;;  %2003 = vrot.lane.b32.xlu1 %v7171_v10, %s5889_s19  ;;  %5402 = vmatmul.mubr.msk.bf16.gmra.mrb[12].mxu1 %vm3025_vm1, %v2854_v9  ;;  %v1943_v38 = vld [vmem:[#allocation3 + $0x182] sm:$0xff]  ;;  %v1944_v41 = vld [vmem:[#allocation3 + $0x18a] sm:$0xff] }
 0x23d   : > { %2132 = vrot.lane.b32.xlu0 %v2087_v7, %s5895_s29  ;;  %v2073_v6 = vld [vmem:[#allocation2 + $0x1a0] sm:$0xff] }
 0x23e   : > { %v2644_v12 = vpop.permute.xlu1 %2643 }
 0x23f   : > { %v1865_v34 = vpop.permute.xlu0 %1864  ;;  %2689 = vst.msk [vmem:[#allocation4 + $0x48] sm:$0xff] %vm2685_vm3, %v2644_v12 }
 0x240   : > { %1905 = vst.msk [vmem:[#allocation4 + $0xc0] sm:$0xff] %vm1896_vm13, %v1865_v34  ;;  %2262 = vrot.lane.b32.xlu1 %v2217_v2, %s5891_s26  ;;  %v2841_v63 = vld [vmem:[#allocation4 + $0x50] sm:$0xff]  ;;  %v1960_v2 = vpack.c.bf16 %v1944_v41, %v1943_v38 }
 0x241   : > { %3110 = vmatprep.mubr.bf16.mxu0 %v2841_v63  ;;  %2406 = vrot.lane.b32.xlu0 %v2361_v15, %s5896_s9  ;;  %v2089_v15 = vpack.c.bf16 %v2073_v6, %v2072_v39  ;;  %v2219_v63 = vpack.c.bf16 %v2203_v16, %v2202_v0 }
 0x242   : > { %v1994_v31 = vpop.permute.xlu1 %1993 }
 0x243   : > { %v2123_v4 = vpop.permute.xlu0 %2122  ;;  %2033 = vst.msk [vmem:[#allocation4 + $0xc8] sm:$0xff] %vm978_vm6, %v1994_v31  ;;  %v2473_v31 = vld [vmem:[#allocation3 + $0x181] sm:$0xff] }
 0x244   : > { %2163 = vst.msk [vmem:[#allocation4 + $0xc0] sm:$0xff] %vm2154_vm14, %v2123_v4  ;;  %2663 = vrot.lane.b32.xlu1 %v2618_v17, %s5897_s12  ;;  %v2474_v4 = vld [vmem:[#allocation3 + $0x189] sm:$0xff] }
 0x245   : > { %2529 = vrot.lane.b32.xlu0 %v2487_v22, %s5888_s18  ;;  %v2603_v22 = vld [vmem:[#allocation2 + $0x19a] sm:$0xff] }
 0x246   : > { %v2253_v20 = vpop.permute.xlu1 %2252  ;;  %v2840_v21 = vld [vmem:[#allocation4 + $0x48] sm:$0xff] }
 0x247   : > { %v2397_v36 = vpop.permute.xlu0 %2396  ;;  %2300 = vst.msk [vmem:[#allocation4 + $0xc8] sm:$0xff] %vm1236_vm8, %v2253_v20  ;;  %3111 = vmatmul.mubr.bf16.gmra.mrb[12].mxu0 %v2840_v21  ;;  %v2620_v21 = vpack.c.bf16 %v2604_v23, %v2603_v22 }
 0x248   : > { %2301 = vst.msk [vmem:[#allocation4 + $0xd0] sm:$0xff] %vm302_vm2, %v2253_v20  ;;  %2531 = vrot.lane.b32.xlu1 %v2488_v33, %s5888_s18 }
 0x249   : > { %2437 = vst.msk [vmem:[#allocation4 + $0xc0] sm:$0xff] %vm2428_vm15, %v2397_v36  ;;  %2786 = vrot.lane.b32.xlu0 %v7067_v45, %s5887_s14  ;;  %v2475_v36 = vld [vmem:[#allocation3 + $0x199] sm:$0xff] }
 0x24a   : > { %v2654_v25 = vpop.permute.xlu1 %2653  ;;  %v2492_v44 = vpack.c.bf16 %v2476_v40, %v2475_v36 }
 0x24b   : > { %v1857_v47 = vpop.permute.xlu0 %1856  ;;  %2694 = vst.msk [vmem:[#allocation4 + $0xc0] sm:$0xff] %vm2685_vm3, %v2654_v25 }
 0x24c   : > { %1901 = vst.msk [vmem:[#allocation4 + $0x60] sm:$0xff] %vm1896_vm13, %v1857_v47  ;;  %2788 = vrot.lane.b32.xlu1 %v7128_v29, %s5887_s14  ;;  %v2218_v29 = vpack.c.bf16 %v2201_v42, %v2200_v37  ;;  %v2732_v47 = vld [vmem:[#allocation3 + $0x19a] sm:$0xff] }
 0x24d   : > { %1876 = vrot.lane.b32.xlu0 %v2618_v17, %s5894_s11 }
 0x24e   : > { %v1986_v45 = vpop.permute.xlu1 %1985  ;;  %v3873_v60 = vld [vmem:[#allocation4 + $0xc8] sm:$0xff] }
 0x24f   : > { %v2115_v53 = vpop.permute.xlu0 %2114  ;;  %2029 = vst.msk [vmem:[#allocation4 + $0x68] sm:$0xff] %vm978_vm6, %v1986_v45  ;;  %4119 = vmatprep.mubr.bf16.mxu1 %v3873_v60 }
 0x250   : > { %2159 = vst.msk [vmem:[#allocation4 + $0x60] sm:$0xff] %vm2154_vm14, %v2115_v53  ;;  %2005 = vrot.lane.b32.xlu1 %v1959_v32, %s5889_s19 }
 0x251   : > { %2292 = vst.msk [vmem:[#allocation4 + $0x68] sm:$0xff] %vm1236_vm8, %v7085_v50  ;;  %2134 = vrot.lane.b32.xlu0 %v2088_v30, %s5895_s29  ;;  %v2619_v50 = vpack.c.bf16 %v2602_v57, %v2601_v46 }
 0x252   : > { %v2389_v27 = vpop.permute.xlu1 %2388  ;;  %v3872_v48 = vld [vmem:[#allocation4 + $0xc0] sm:$0xff] }
 0x253   : > { %v2646_v13 = vpop.permute.xlu0 %2645  ;;  %2433 = vst.msk [vmem:[#allocation4 + $0x60] sm:$0xff] %vm2428_vm15, %v2389_v27  ;;  %4120 = vmatmul.mubr.bf16.vlgmr.msra.gmra.mrb[16].mxu1 %v3872_v48 }
 0x254   : > { %2690 = vst.msk [vmem:[#allocation4 + $0x60] sm:$0xff] %vm2685_vm3, %v2646_v13  ;;  %2264 = vrot.lane.b32.xlu1 %v2218_v29, %s5891_s26 }
 0x255   : > { %2408 = vrot.lane.b32.xlu0 %v2362_v8, %s5896_s9 }
 0x256   : > { %v1867_v52 = vpop.permute.xlu1 %1866 }
 0x257   : > { %v1996_v54 = vpop.permute.xlu0 %1995  ;;  %1906 = vst.msk [vmem:[#allocation4 + $0xd8] sm:$0xff] %vm1896_vm13, %v1867_v52 }
 0x258   : > { %v2844_v58 = vld [vmem:[#allocation4 + $0x68] sm:$0xff]  ;;  %2034 = vst.msk [vmem:[#allocation4 + $0xe0] sm:$0xff] %vm978_vm6, %v1996_v54  ;;  %2665 = vrot.lane.b32.xlu1 %v2619_v50, %s5897_s12 }
 0x259   : > { %3118 = vmatprep.mubr.bf16.mxu0 %v2844_v58  ;;  %2533 = vrot.lane.b32.xlu0 %v2489_v19, %s5888_s18 }
 0x25a   : > { %v2125_v7 = vpop.permute.xlu1 %2124 }
 0x25b   : > { %v2255_v59 = vpop.permute.xlu0 %2254  ;;  %2164 = vst.msk [vmem:[#allocation4 + $0xd8] sm:$0xff] %vm2154_vm14, %v2125_v7  ;;  %v2843_v11 = vld [vmem:[#allocation4 + $0x60] sm:$0xff] }
 0x25c   : > { %2302 = vst.msk [vmem:[#allocation4 + $0xe0] sm:$0xff] %vm1236_vm8, %v2255_v59  ;;  %3119 = vmatmul.mubr.bf16.gmra.mrb[16].mxu0 %v2843_v11  ;;  %2535 = vrot.lane.b32.xlu1 %v2490_v56, %s5888_s18 }
 0x25d   : > { %2303 = vst.msk [vmem:[#allocation4 + $0xe8] sm:$0xff] %vm302_vm2, %v2255_v59  ;;  %2790 = vrot.lane.b32.xlu0 %v7171_v10, %s5887_s14  ;;  %v2346_v10 = vld [vmem:[#allocation2 + $0x199] sm:$0xff] }
 0x25e   : > { %v2399_v3 = vpop.permute.xlu1 %2398  ;;  %v2363_v17 = vpack.c.bf16 %v2347_v14, %v2346_v10 }
 0x25f   : > { %v2656_v9 = vpop.permute.xlu0 %2655  ;;  %2438 = vst.msk [vmem:[#allocation4 + $0xd8] sm:$0xff] %vm2428_vm15, %v2399_v3 }
 0x260   : > { %2695 = vst.msk [vmem:[#allocation4 + $0xd8] sm:$0xff] %vm2685_vm3, %v2656_v9  ;;  %2792 = vrot.lane.b32.xlu1 %v1959_v32, %s5887_s14  ;;  %v2733_v32 = vld [vmem:[#allocation3 + $0x1a2] sm:$0xff] }
 0x261   : > { %1878 = vrot.lane.b32.xlu0 %v2619_v50, %s5894_s11  ;;  %s7245_s11 = scalar_lea.vmem %s8404_s2, %s6206_s10  ;;  %v2749_v42 = vpack.c.bf16 %v2733_v32, %v2732_v47 }
 0x262   : > { %v1859_v12 = vpop.permute.xlu1 %1858  ;;  %v3360_v62 = vld [vmem:[%s7245_s11] sm:$0xff]  ;;  %v3361_v53 = vld [vmem:[%s7245_s11 + $0x8] sm:$0xff]  ;;  %v3362_v8 = vld [vmem:[%s7245_s11 + $0x10] sm:$0xff] }
 0x263   : > { %v1988_v18 = vpop.permute.xlu0 %1987  ;;  %1902 = vst.msk [vmem:[#allocation4 + $0x78] sm:$0xff] %vm1896_vm13, %v1859_v12  ;;  %v3876_v34 = vld [vmem:[#allocation4 + $0xe0] sm:$0xff]  ;;  %v3363_v57 = vld [vmem:[%s7245_s11 + $0x18] sm:$0xff]  ;;  %v3365_v13 = vld [vmem:[%s7245_s11 + $0x28] sm:$0xff] }
 0x264   : > { %2030 = vst.msk [vmem:[#allocation4 + $0x80] sm:$0xff] %vm978_vm6, %v1988_v18  ;;  %4127 = vmatprep.mubr.bf16.mxu1 %v3876_v34  ;;  %2007 = vrot.lane.b32.xlu1 %v1960_v2, %s5889_s19  ;;  %v3364_v49 = vld [vmem:[%s7245_s11 + $0x20] sm:$0xff]  ;;  %v3366_v26 = vld [vmem:[%s7245_s11 + $0x30] sm:$0xff]  ;;  %v3369_v7 = vld [vmem:[%s7245_s11 + $0x48] sm:$0xff] }
 0x265   : > { %2294 = vst.msk [vmem:[#allocation4 + $0x80] sm:$0xff] %vm1236_vm8, %v7095_v55  ;;  %2136 = vrot.lane.b32.xlu0 %v2089_v15, %s5895_s29  ;;  %v2491_v55 = vpack.c.bf16 %v2474_v4, %v2473_v31  ;;  %v3368_v54 = vld [vmem:[%s7245_s11 + $0x40] sm:$0xff]  ;;  %v3370_v11 = vld [vmem:[%s7245_s11 + $0x50] sm:$0xff]  ;;  %v3371_v3 = vld [vmem:[%s7245_s11 + $0x58] sm:$0xff]  ;;  %s7852_s29 = sand.u32 1, %s5876_s22  }
 0x266   : > { %v2117_v24 = vpop.permute.xlu1 %2116  ;;  %v3372_v6 = vld [vmem:[%s7245_s11 + $0x60] sm:$0xff]  ;;  %v3374_v0 = vld [vmem:[%s7245_s11 + $0x70] sm:$0xff]  ;;  %v3375_v10 = vld [vmem:[%s7245_s11 + $0x78] sm:$0xff] }
 0x267   : > { %v2391_v33 = vpop.permute.xlu0 %2390  ;;  %2160 = vst.msk [vmem:[#allocation4 + $0x78] sm:$0xff] %vm2154_vm14, %v2117_v24  ;;  %v3875_v20 = vld [vmem:[#allocation4 + $0xd8] sm:$0xff] }
 0x268   : > { %2434 = vst.msk [vmem:[#allocation4 + $0x78] sm:$0xff] %vm2428_vm15, %v2391_v33  ;;  %4128 = vmatmul.mubr.bf16.gmra.mrb[20].mxu1 %v3875_v20  ;;  %2266 = vrot.lane.b32.xlu1 %v2219_v63, %s5891_s26 }
 0x269   : > { %2410 = vrot.lane.b32.xlu0 %v2363_v17, %s5896_s9  ;;  %s5065_s9 = sshll.u32 %s7852_s29, 8 }
 0x26a   : > { %v2648_v61 = vpop.permute.xlu1 %2647  ;;  %s7873_s16 = scalar_lea.vmem [#allocation7], %s5065_s9  ;;  %s8109_s28 = scalar_lea.vmem [#allocation5], %s5065_s9 }
 0x26b   : > { %v1869_v25 = vpop.permute.xlu0 %1868  ;;  %2691 = vst.msk [vmem:[#allocation4 + $0x78] sm:$0xff] %vm2685_vm3, %v2648_v61  ;;  %s4943_s13 = sshll.u32 %s7873_s16, 4  ;;  %s8285_s13 = int_to_ptr.vmem [resolvable:$true] %s4943_s13 }
 0x26c   : > { %1907 = vst.msk [vmem:[#allocation4 + $0xf0] sm:$0xff] %vm1896_vm13, %v1869_v25  ;;  %v2847_v43 = vld [vmem:[#allocation4 + $0x80] sm:$0xff]  ;;  %2667 = vrot.lane.b32.xlu1 %v2620_v21, %s5897_s12  ;;  %s5790_s10 = scalar_lea.vmem %s8285_s13, 4096 }
 0x26d   : > { %3126 = vmatprep.mubr.bf16.mxu0 %v2847_v43  ;;  %2537 = vrot.lane.b32.xlu0 %v2491_v55, %s5888_s18  ;;  %p5791_p11 = scmp.ne.s32.totalorder %s8285_s13, %s5790_s10 }
 0x26e   : > { %v1998_v30 = vpop.permute.xlu1 %1997 }
 0x26f   : > { %v2127_v37 = vpop.permute.xlu0 %2126  ;;  %2035 = vst.msk [vmem:[#allocation4 + $0xf8] sm:$0xff] %vm978_vm6, %v1998_v30  ;;  %p5792_p12 = pnand %p5791_p11, %p5976_p5 }
 0x270   : > { %2165 = vst.msk [vmem:[#allocation4 + $0xf0] sm:$0xff] %vm2154_vm14, %v2127_v37  ;;  %2539 = vrot.lane.b32.xlu1 %v2492_v44, %s5888_s18  ;;  %s5898_s18 = smov 96  }
 0x271   : > { %2794 = vrot.lane.b32.xlu0 %v1960_v2, %s5887_s14  ;;  %v3373_v2 = vld [vmem:[%s7245_s11 + $0x68] sm:$0xff]  ;;  %p5793_p13 = pneg %p5792_p12 }
 0x272   : > { %v2257_v45 = vpop.permute.xlu1 %2256  ;;  %v2846_v60 = vld [vmem:[#allocation4 + $0x78] sm:$0xff] }
 0x273   : > { %v2401_v35 = vpop.permute.xlu0 %2400  ;;  %2304 = vst.msk [vmem:[#allocation4 + $0xf8] sm:$0xff] %vm1236_vm8, %v2257_v45  ;;  %3127 = vmatmul.mubr.bf16.gmra.mrb[20].mxu0 %v2846_v60 }
 0x274   : > { %2305 = vst.msk [vmem:[#allocation4 + $0x100] sm:$0xff] %vm302_vm2, %v2257_v45  ;;  %2796 = vrot.lane.b32.xlu1 %v2749_v42, %s5887_s14  ;;  %s5900_s14 = smov [#allocation7]  }
 0x275   : > { %2439 = vst.msk [vmem:[#allocation4 + $0xf0] sm:$0xff] %vm2428_vm15, %v2401_v35  ;;  %3392 = vrot.lane.b32.xlu0 %v3360_v62, %s5897_s12 }
 0x276   : > { %v2658_v29 = vpop.permute.xlu1 %2657 }
 0x277   : > { %v1861_v46 = vpop.permute.xlu0 %1860  ;;  %2696 = vst.msk [vmem:[#allocation4 + $0xf0] sm:$0xff] %vm2685_vm3, %v2658_v29 }
 0x278   : > { %1903 = vst.msk [vmem:[#allocation4 + $0x90] sm:$0xff] %vm1896_vm13, %v1861_v46  ;;  %3394 = vrot.lane.b32.xlu1 %v3361_v53, %s5897_s12 }
 0x279   : > { %3396 = vrot.lane.b32.xlu0 %v3362_v8, %s5897_s12 }
 0x27a   : > { %v1990_v27 = vpop.permute.xlu1 %1989  ;;  %v3879_v48 = vld [vmem:[#allocation4 + $0xf8] sm:$0xff] }
 0x27b   : > { %v2119_v5 = vpop.permute.xlu0 %2118  ;;  %2031 = vst.msk [vmem:[#allocation4 + $0x98] sm:$0xff] %vm978_vm6, %v1990_v27  ;;  %4135 = vmatprep.mubr.bf16.mxu1 %v3879_v48 }
 0x27c   : > { %2161 = vst.msk [vmem:[#allocation4 + $0x90] sm:$0xff] %vm2154_vm14, %v2119_v5  ;;  %3398 = vrot.lane.b32.xlu1 %v3363_v57, %s5897_s12 }
 0x27d   : > { %2296 = vst.msk [vmem:[#allocation4 + $0x98] sm:$0xff] %vm1236_vm8, %v7140_v28  ;;  %3400 = vrot.lane.b32.xlu0 %v3364_v49, %s5897_s12  ;;  %v3367_v28 = vld [vmem:[%s7245_s11 + $0x38] sm:$0xff] }
 0x27e   : > { %v2393_v50 = vpop.permute.xlu1 %2392  ;;  %v3878_v19 = vld [vmem:[#allocation4 + $0xf0] sm:$0xff] }
 0x27f   : > { %v2650_v51 = vpop.permute.xlu0 %2649  ;;  %2435 = vst.msk [vmem:[#allocation4 + $0x90] sm:$0xff] %vm2428_vm15, %v2393_v50  ;;  %4136 = vmatmul.mubr.bf16.gmra.mrb[24].mxu1 %v3878_v19 }
 0x280   : > { %2692 = vst.msk [vmem:[#allocation4 + $0x90] sm:$0xff] %vm2685_vm3, %v2650_v51  ;;  %3402 = vrot.lane.b32.xlu1 %v3365_v13, %s5897_s12 }
 0x281   : > { %3404 = vrot.lane.b32.xlu0 %v3366_v26, %s5897_s12 }
 0x282   : > { %v1871_v52 = vpop.permute.xlu1 %1870 }
 0x283   : > { %v2000_v58 = vpop.permute.xlu0 %1999  ;;  %1908 = vst.msk [vmem:[#allocation4 + $0x108] sm:$0xff] %vm1896_vm13, %v1871_v52 }
 0x284   : > { %v2850_v56 = vld [vmem:[#allocation4 + $0x98] sm:$0xff]  ;;  %2036 = vst.msk [vmem:[#allocation4 + $0x110] sm:$0xff] %vm978_vm6, %v2000_v58  ;;  %3406 = vrot.lane.b32.xlu1 %v3367_v28, %s5897_s12 }
 0x285   : > { %3134 = vmatprep.mubr.bf16.mxu0 %v2850_v56  ;;  %3408 = vrot.lane.b32.xlu0 %v3368_v54, %s5897_s12  ;;  %v7354_v56 = vld [vmem:[%s8406_s4] ss:$0 sm:$0xff] }
 0x286   : > { %v2129_v59 = vpop.permute.xlu1 %2128 }
 0x287   : > { %v2259_v38 = vpop.permute.xlu0 %2258  ;;  %2166 = vst.msk [vmem:[#allocation4 + $0x108] sm:$0xff] %vm2154_vm14, %v2129_v59  ;;  %v2849_v41 = vld [vmem:[#allocation4 + $0x90] sm:$0xff] }
 0x288   : > { %2306 = vst.msk [vmem:[#allocation4 + $0x110] sm:$0xff] %vm1236_vm8, %v2259_v38  ;;  %3135 = vmatmul.mubr.bf16.gmra.mrb[24].mxu0 %v2849_v41  ;;  %3410 = vrot.lane.b32.xlu1 %v3369_v7, %s5897_s12 }
 0x289   : > { %2307 = vst.msk [vmem:[#allocation4 + $0x118] sm:$0xff] %vm302_vm2, %v2259_v38  ;;  %3412 = vrot.lane.b32.xlu0 %v3370_v11, %s5897_s12 }
 0x28a   : > { %v2403_v39 = vpop.permute.xlu1 %2402 }
 0x28b   : > { %v2660_v9 = vpop.permute.xlu0 %2659  ;;  %2440 = vst.msk [vmem:[#allocation4 + $0x108] sm:$0xff] %vm2428_vm15, %v2403_v39 }
 0x28c   : > { %2697 = vst.msk [vmem:[#allocation4 + $0x108] sm:$0xff] %vm2685_vm3, %v2660_v9  ;;  %3414 = vrot.lane.b32.xlu1 %v3371_v3, %s5897_s12 }
 0x28d   : > { %3416 = vrot.lane.b32.xlu0 %v3372_v6, %s5897_s12 }
 0x28e   : > { %v1863_v15 = vpop.permute.xlu1 %1862 }
 0x28f   : > { %v1992_v16 = vpop.permute.xlu0 %1991  ;;  %1904 = vst.msk [vmem:[#allocation4 + $0xa8] sm:$0xff] %vm1896_vm13, %v1863_v15  ;;  %v3882_v12 = vld [vmem:[#allocation4 + $0x110] sm:$0xff] }
 0x290   : > { %2032 = vst.msk [vmem:[#allocation4 + $0xb0] sm:$0xff] %vm978_vm6, %v1992_v16  ;;  %4143 = vmatprep.mubr.bf16.mxu1 %v3882_v12  ;;  %3418 = vrot.lane.b32.xlu1 %v3373_v2, %s5897_s12 }
 0x291   : > { %2298 = vst.msk [vmem:[#allocation4 + $0xb0] sm:$0xff] %vm1236_vm8, %v7145_v1  ;;  %3420 = vrot.lane.b32.xlu0 %v3374_v0, %s5897_s12 }
 0x292   : > { %v2121_v14 = vpop.permute.xlu1 %2120 }
 0x293   : > { %2162 = vst.msk [vmem:[#allocation4 + $0xa8] sm:$0xff] %vm2154_vm14, %v2121_v14  ;;  %v3881_v18 = vld [vmem:[#allocation4 + $0x108] sm:$0xff]  ;;  %v2395_v34 = vpop.permute.xlu0 %2394 }
 0x294   : > { %4144 = vmatmul.mubr.bf16.gmra.mrb[28].mxu1 %v3881_v18  ;;  %2436 = vst.msk [vmem:[#allocation4 + $0xa8] sm:$0xff] %vm2428_vm15, %v2395_v34  ;;  %3422 = vrot.lane.b32.xlu1 %v3375_v10, %s5897_s12 }
 0x296   : > { %v2652_v63 = vpop.permute.xlu1 %2651 }
 0x297   : > { %2693 = vst.msk [vmem:[#allocation4 + $0xa8] sm:$0xff] %vm2685_vm3, %v2652_v63  ;;  %v1873_v17 = vpop.permute.xlu0 %1872 }
 0x298   : > { %v2853_v22 = vld [vmem:[#allocation4 + $0xb0] sm:$0xff]  ;;  %1909 = vst.msk [vmem:[#allocation4 + $0x120] sm:$0xff] %vm1896_vm13, %v1873_v17 }
 0x299   : > { %3142 = vmatprep.mubr.bf16.mxu0 %v2853_v22 }
 0x29a   : > { %v2002_v1 = vpop.permute.xlu1 %2001 }
 0x29b   : > { %2037 = vst.msk [vmem:[#allocation4 + $0x128] sm:$0xff] %vm978_vm6, %v2002_v1  ;;  %v2131_v23 = vpop.permute.xlu0 %2130 }
 0x29c   : > { %2167 = vst.msk [vmem:[#allocation4 + $0x120] sm:$0xff] %vm2154_vm14, %v2131_v23 }
 0x29e   : > { %v2261_v24 = vpop.permute.xlu1 %2260  ;;  %v2852_v31 = vld [vmem:[#allocation4 + $0xa8] sm:$0xff] }
 0x29f   : > { %2308 = vst.msk [vmem:[#allocation4 + $0x128] sm:$0xff] %vm1236_vm8, %v2261_v24  ;;  %3143 = vmatmul.mubr.bf16.gmra.mrb[28].mxu0 %v2852_v31  ;;  %v2405_v4 = vpop.permute.xlu0 %2404 }
 0x2a0   : > { %2309 = vst.msk [vmem:[#allocation4 + $0x130] sm:$0xff] %vm302_vm2, %v2261_v24 }
 0x2a1   : > { %2441 = vst.msk [vmem:[#allocation4 + $0x120] sm:$0xff] %vm2428_vm15, %v2405_v4 }
 0x2a2   : > { %v2662_v33 = vpop.permute.xlu1 %2661 }
 0x2a3   : > { %2698 = vst.msk [vmem:[#allocation4 + $0x120] sm:$0xff] %vm2685_vm3, %v2662_v33  ;;  %v2526_v20 = vpop.permute.xlu0 %2525 }
 0x2a4   : > { %2565 = vst.msk [vmem:[#allocation4 + $0xd0] sm:$0xff] %vm1510_vm11, %v2526_v20 }
 0x2a6   : > { %v2528_v21 = vpop.permute.xlu1 %2527  ;;  %v3885_v1 = vld [vmem:[#allocation4 + $0x128] sm:$0xff] }
 0x2a7   : > { %2566 = vst.msk [vmem:[#allocation4 + $0xe8] sm:$0xff] %vm1510_vm11, %v2528_v21  ;;  %v2783_v55 = vpop.permute.xlu0 %2782  ;;  %4151 = vmatprep.mubr.bf16.mxu1 %v3885_v1 }
 0x2a8   : > { %2822 = vst.msk [vmem:[#allocation4 + $0xd0] sm:$0xff] %vm720_vm4, %v2783_v55 }
 0x2aa   : > { %v2785_v36 = vpop.permute.xlu1 %2784  ;;  %v3884_v23 = vld [vmem:[#allocation4 + $0x120] sm:$0xff] }
 0x2ab   : > { %2823 = vst.msk [vmem:[#allocation4 + $0xe8] sm:$0xff] %vm720_vm4, %v2785_v36  ;;  %v1875_v40 = vpop.permute.xlu0 %1874  ;;  %4152 = vmatmul.mubr.bf16.gmra.mrb[32].mxu1 %v3884_v23 }
 0x2ac   : > { %1910 = vst.msk [vmem:[#allocation4 + $0x138] sm:$0xff] %vm1896_vm13, %v1875_v40 }
 0x2ae   : > { %v2004_v61 = vpop.permute.xlu1 %2003 }
 0x2af   : > { %2038 = vst.msk [vmem:[#allocation4 + $0x140] sm:$0xff] %vm978_vm6, %v2004_v61  ;;  %v2133_v25 = vpop.permute.xlu0 %2132  ;;  %v3874_v43 = vld [vmem:[#allocation4 + $0xd0] sm:$0xff] }
 0x2b0   : > { %2168 = vst.msk [vmem:[#allocation4 + $0x138] sm:$0xff] %vm2154_vm14, %v2133_v25  ;;  %5415 = vmatprep.mubr.msk.bf16.mxu0 %vm3025_vm1, %v3874_v43 }
 0x2b2   : > { %v2263_v44 = vpop.permute.xlu1 %2262  ;;  %v3877_v47 = vld [vmem:[#allocation4 + $0xe8] sm:$0xff] }
 0x2b3   : > { %2310 = vst.msk [vmem:[#allocation4 + $0x140] sm:$0xff] %vm1236_vm8, %v2263_v44  ;;  %5416 = vmatmul.mubr.msk.bf16.vlgmr.msra.gmra.mrb[32].mxu0 %vm3025_vm1, %v3877_v47  ;;  %v2407_v32 = vpop.permute.xlu0 %2406 }
 0x2b4   : > { %2311 = vst.msk [vmem:[#allocation4 + $0x148] sm:$0xff] %vm302_vm2, %v2263_v44 }
 0x2b5   : > { %2442 = vst.msk [vmem:[#allocation4 + $0x138] sm:$0xff] %vm2428_vm15, %v2407_v32 }
 0x2b6   : > { %v2664_v30 = vpop.permute.xlu1 %2663 }
 0x2b7   : > { %2699 = vst.msk [vmem:[#allocation4 + $0x138] sm:$0xff] %vm2685_vm3, %v2664_v30  ;;  %v2530_v37 = vpop.permute.xlu0 %2529 }
 0x2b8   : > { %2567 = vst.msk [vmem:[#allocation4 + $0x100] sm:$0xff] %vm1510_vm11, %v2530_v37 }
 0x2ba   : > { %v2532_v42 = vpop.permute.xlu1 %2531 }
 0x2bb   : > { %2568 = vst.msk [vmem:[#allocation4 + $0x118] sm:$0xff] %vm1510_vm11, %v2532_v42  ;;  %v2787_v45 = vpop.permute.xlu0 %2786  ;;  %v3888_v42 = vld [vmem:[#allocation4 + $0x140] sm:$0xff] }
 0x2bc   : > { %2824 = vst.msk [vmem:[#allocation4 + $0x100] sm:$0xff] %vm720_vm4, %v2787_v45  ;;  %4159 = vmatprep.mubr.bf16.mxu1 %v3888_v42 }
 0x2be   : > { %v2789_v60 = vpop.permute.xlu1 %2788  ;;  %v3887_v45 = vld [vmem:[#allocation4 + $0x138] sm:$0xff] }
 0x2bf   : > { %2825 = vst.msk [vmem:[#allocation4 + $0x118] sm:$0xff] %vm720_vm4, %v2789_v60  ;;  %v1877_v62 = vpop.permute.xlu0 %1876  ;;  %4160 = vmatmul.mubr.bf16.gmra.mrb[36].mxu1 %v3887_v45 }
 0x2c0   : > { %1911 = vst.msk [vmem:[#allocation4 + $0x150] sm:$0xff] %vm1896_vm13, %v1877_v62 }
 0x2c2   : > { %v2006_v35 = vpop.permute.xlu1 %2005 }
 0x2c3   : > { %v3880_v53 = vld [vmem:[#allocation4 + $0x100] sm:$0xff]  ;;  %2039 = vst.msk [vmem:[#allocation4 + $0x158] sm:$0xff] %vm978_vm6, %v2006_v35  ;;  %v2135_v29 = vpop.permute.xlu0 %2134 }
 0x2c4   : > { %5419 = vmatprep.mubr.msk.bf16.mxu0 %vm3025_vm1, %v3880_v53  ;;  %2169 = vst.msk [vmem:[#allocation4 + $0x150] sm:$0xff] %vm2154_vm14, %v2135_v29 }
 0x2c6   : > { %v3883_v8 = vld [vmem:[#allocation4 + $0x118] sm:$0xff]  ;;  %v2265_v46 = vpop.permute.xlu1 %2264 }
 0x2c7   : > { %5420 = vmatmul.mubr.msk.bf16.gmra.mrb[36].mxu0 %vm3025_vm1, %v3883_v8  ;;  %2312 = vst.msk [vmem:[#allocation4 + $0x158] sm:$0xff] %vm1236_vm8, %v2265_v46  ;;  %v2409_v57 = vpop.permute.xlu0 %2408 }
 0x2c8   : > { %2313 = vst.msk [vmem:[#allocation4 + $0x160] sm:$0xff] %vm302_vm2, %v2265_v46 }
 0x2c9   : > { %2443 = vst.msk [vmem:[#allocation4 + $0x150] sm:$0xff] %vm2428_vm15, %v2409_v57 }
 0x2ca   : > { %v2666_v27 = vpop.permute.xlu1 %2665 }
 0x2cb   : > { %2700 = vst.msk [vmem:[#allocation4 + $0x150] sm:$0xff] %vm2685_vm3, %v2666_v27  ;;  %v2534_v48 = vpop.permute.xlu0 %2533 }
 0x2cc   : > { %2569 = vst.msk [vmem:[#allocation4 + $0x130] sm:$0xff] %vm1510_vm11, %v2534_v48 }
 0x2ce   : > { %v2536_v49 = vpop.permute.xlu1 %2535 }
 0x2cf   : > { %v7342_v5 = vpop.f32.mrb[0].mxu1  ;;  %2570 = vst.msk [vmem:[#allocation4 + $0x148] sm:$0xff] %vm1510_vm11, %v2536_v49  ;;  %v2791_v13 = vpop.permute.xlu0 %2790 }
 0x2d0   : > { %v3185_v50 = vpop.f32.mrb[1].mxu1  ;;  %2826 = vst.msk [vmem:[#allocation4 + $0x130] sm:$0xff] %vm720_vm4, %v2791_v13 }
 0x2d1   : > { %v7346_v19 = vpop.f32.mrb[2].mxu1 }
 0x2d2   : > { %v3188_v26 = vpop.f32.mrb[3].mxu1  ;;  %v2793_v51 = vpop.permute.xlu1 %2792 }
 0x2d3   : > { %2827 = vst.msk [vmem:[#allocation4 + $0x148] sm:$0xff] %vm720_vm4, %v2793_v51  ;;  %v1879_v28 = vpop.permute.xlu0 %1878 }
 0x2d4   : > { %1912 = vst.msk [vmem:[#allocation4 + $0x168] sm:$0xff] %vm1896_vm13, %v1879_v28  ;;  %v3891_v28 = vld [vmem:[#allocation4 + $0x158] sm:$0xff] }
 0x2d5   : > { %4167 = vmatprep.mubr.bf16.mxu1 %v3891_v28 }
 0x2d6   : > { %v2008_v52 = vpop.permute.xlu1 %2007 }
 0x2d7   : > { %v5241_v54 = vpop.f32.mrb[0].mxu0  ;;  %2040 = vst.msk [vmem:[#allocation4 + $0x170] sm:$0xff] %vm978_vm6, %v2008_v52  ;;  %v2137_v58 = vpop.permute.xlu0 %2136  ;;  %v3886_v4 = vld [vmem:[#allocation4 + $0x130] sm:$0xff] }
 0x2d8   : > { %v5242_v7 = vpop.f32.mrb[1].mxu0  ;;  %2170 = vst.msk [vmem:[#allocation4 + $0x168] sm:$0xff] %vm2154_vm14, %v2137_v58  ;;  %5423 = vmatprep.mubr.msk.bf16.mxu0 %vm3025_vm1, %v3886_v4 }
 0x2d9   : > { %v5243_v59 = vadd.f32 %v5242_v7, %v5241_v54  ;;  %v5244_v11 = vpop.f32.mrb[2].mxu0  ;;  %v3890_v54 = vld [vmem:[#allocation4 + $0x150] sm:$0xff] }
 0x2da   : > { %v5245_v38 = vpop.f32.mrb[3].mxu0  ;;  %v2267_v41 = vpop.permute.xlu1 %2266  ;;  %v3889_v20 = vld [vmem:[#allocation4 + $0x148] sm:$0xff]  ;;  %4168 = vmatmul.mubr.bf16.gmra.mrb[40].mxu1 %v3890_v54 }
 0x2db   : > { %v3089_v3 = vadd.f32 %v5243_v59, %v7354_v56  ;;  %v5246_v39 = vadd.f32 %v5245_v38, %v5244_v11  ;;  %2314 = vst.msk [vmem:[#allocation4 + $0x170] sm:$0xff] %vm1236_vm8, %v2267_v41  ;;  %v2411_v6 = vpop.permute.xlu0 %2410  ;;  %5424 = vmatmul.mubr.msk.bf16.gmra.mrb[40].mxu0 %vm3025_vm1, %v3889_v20 }
 0x2dc   : > { %2315 = vst.msk [vmem:[#allocation4 + $0x178] sm:$0xff] %vm302_vm2, %v2267_v41 }
 0x2dd   : > { %2444 = vst.msk [vmem:[#allocation4 + $0x168] sm:$0xff] %vm2428_vm15, %v2411_v6  ;;  %v7361_v9 = vadd.f32 %v3185_v50, %v3089_v3  ;;  %v3092_v2 = vadd.f32 %v5246_v39, %v7354_v56 }
 0x2de   : > { %v2668_v15 = vpop.permute.xlu1 %2667 }
 0x2df   : > { %5534 = vtanh.f32 %v7361_v9  ;;  %v7365_v0 = vadd.f32 %v3188_v26, %v3092_v2  ;;  %2701 = vst.msk [vmem:[#allocation4 + $0x168] sm:$0xff] %vm2685_vm3, %v2668_v15  ;;  %v2538_v16 = vpop.permute.xlu0 %2537 }
 0x2e0   : > { %2571 = vst.msk [vmem:[#allocation4 + $0x160] sm:$0xff] %vm1510_vm11, %v2538_v16 }
 0x2e1   : > { %5536 = vtanh.f32 %v7365_v0 }
 0x2e2   : > { %v2540_v12 = vpop.permute.xlu1 %2539  ;;  %v3894_v1 = vld [vmem:[#allocation4 + $0x170] sm:$0xff] }
 0x2e3   : > { %v7370_v10 = vpop.f32.mrb[4].mxu1  ;;  %2572 = vst.msk [vmem:[#allocation4 + $0x178] sm:$0xff] %vm1510_vm11, %v2540_v12  ;;  %v2795_v14 = vpop.permute.xlu0 %2794  ;;  %4175 = vmatprep.mubr.bf16.mxu1 %v3894_v1 }
 0x2e4   : > { %v3201_v18 = vpop.f32.mrb[5].mxu1  ;;  %2828 = vst.msk [vmem:[#allocation4 + $0x160] sm:$0xff] %vm720_vm4, %v2795_v14 }
 0x2e5   : > { %v7374_v34 = vpop.f32.mrb[6].mxu1 }
 0x2e6   : > { %v3204_v63 = vpop.f32.mrb[7].mxu1  ;;  %v2797_v17 = vpop.permute.xlu1 %2796  ;;  %v3893_v23 = vld [vmem:[#allocation4 + $0x168] sm:$0xff] }
 0x2e7   : > { %2829 = vst.msk [vmem:[#allocation4 + $0x178] sm:$0xff] %vm720_vm4, %v2797_v17  ;;  %4176 = vmatmul.mubr.bf16.gmra.mrb[44].mxu1 %v3893_v23 }
 0x2e9   : > { %v5535_v22 = vpop.eup %5534 }
 0x2ea   : > { %3472 = vrot.lane.b32.xlu0 %v5535_v22, %s5897_s12 }
 0x2eb   : > { %v5537_v24 = vpop.eup %5536  ;;  %v3892_v59 = vld [vmem:[#allocation4 + $0x160] sm:$0xff] }
 0x2ec   : > { %3474 = vrot.lane.b32.xlu1 %v5537_v24, %s5897_s12  ;;  %5427 = vmatprep.mubr.msk.bf16.mxu0 %vm3025_vm1, %v3892_v59 }
 0x2ee   : > { %v5247_v31 = vpop.f32.mrb[4].mxu0  ;;  %v3895_v41 = vld [vmem:[#allocation4 + $0x178] sm:$0xff] }
 0x2ef   : > { %v5248_v33 = vpop.f32.mrb[5].mxu0  ;;  %5428 = vmatmul.mubr.msk.bf16.gmra.mrb[44].mxu0 %vm3025_vm1, %v3895_v41 }
 0x2f0   : > { %v5249_v21 = vadd.f32 %v5248_v33, %v5247_v31  ;;  %v5250_v55 = vpop.f32.mrb[6].mxu0 }
 0x2f1   : > { %v5251_v36 = vpop.f32.mrb[7].mxu0 }
 0x2f2   : > { %v3097_v40 = vadd.f32 %v5249_v21, %v7354_v56  ;;  %v5252_v61 = vadd.f32 %v5251_v36, %v5250_v55 }
 0x2f4   : > { %v7383_v25 = vadd.f32 %v7342_v5, %v3097_v40  ;;  %v3100_v43 = vadd.f32 %v5252_v61, %v7354_v56 }
 0x2f6   : > { %5538 = vtanh.f32 %v7383_v25  ;;  %v7388_v44 = vadd.f32 %v7346_v19, %v3100_v43 }
 0x2f8   : > { %5540 = vtanh.f32 %v7388_v44 }
 0x2fa   : > { %v7391_v47 = vpop.f32.mrb[8].mxu1 }
 0x2fb   : > { %v7393_v32 = vpop.f32.mrb[9].mxu1 }
 0x2fc   : > { %v7395_v30 = vpop.f32.mrb[10].mxu1 }
 0x2fd   : > { %v7397_v37 = vpop.f32.mrb[11].mxu1 }
 0x300   : > { %v5539_v60 = vpop.eup %5538 }
 0x301   : > { %3476 = vrot.lane.b32.xlu0 %v5539_v60, %s5897_s12 }
 0x302   : > { %v5541_v62 = vpop.eup %5540 }
 0x303   : > { %v5253_v35 = vpop.f32.mrb[8].mxu0  ;;  %3478 = vrot.lane.b32.xlu1 %v5541_v62, %s5897_s12 }
 0x304   : > { %v5254_v53 = vpop.f32.mrb[9].mxu0 }
 0x305   : > { %v5255_v29 = vadd.f32 %v5254_v53, %v5253_v35  ;;  %v5256_v8 = vpop.f32.mrb[10].mxu0 }
 0x306   : > { %v5257_v46 = vpop.f32.mrb[11].mxu0 }
 0x307   : > { %v3105_v57 = vadd.f32 %v5255_v29, %v7354_v56  ;;  %v5258_v27 = vadd.f32 %v5257_v46, %v5256_v8 }
 0x309   : > { %v7402_v48 = vadd.f32 %v3201_v18, %v3105_v57  ;;  %v3108_v49 = vadd.f32 %v5258_v27, %v7354_v56 }
 0x30b   : > { %5542 = vtanh.f32 %v7402_v48  ;;  %v7406_v5 = vadd.f32 %v3204_v63, %v3108_v49 }
 0x30d   : > { %5544 = vtanh.f32 %v7406_v5 }
 0x30f   : > { %v7409_v13 = vpop.f32.mrb[12].mxu1 }
 0x310   : > { %v7411_v50 = vpop.f32.mrb[13].mxu1 }
 0x311   : > { %v7413_v19 = vpop.f32.mrb[14].mxu1 }
 0x312   : > { %v7415_v26 = vpop.f32.mrb[15].mxu1 }
 0x315   : > { %v5543_v51 = vpop.eup %5542 }
 0x316   : > { %3480 = vrot.lane.b32.xlu0 %v5543_v51, %s5897_s12 }
 0x317   : > { %v5545_v52 = vpop.eup %5544 }
 0x318   : > { %3482 = vrot.lane.b32.xlu1 %v5545_v52, %s5897_s12 }
 0x31a   : > { %v5259_v58 = vpop.f32.mrb[12].mxu0 }
 0x31b   : > { %v5260_v7 = vpop.f32.mrb[13].mxu0 }
 0x31c   : > { %v5261_v11 = vadd.f32 %v5260_v7, %v5259_v58  ;;  %v5262_v38 = vpop.f32.mrb[14].mxu0 }
 0x31d   : > { %v5263_v3 = vpop.f32.mrb[15].mxu0 }
 0x31e   : > { %v3113_v39 = vadd.f32 %v5261_v11, %v7354_v56  ;;  %v5264_v6 = vadd.f32 %v5263_v3, %v5262_v38 }
 0x320   : > { %v7423_v2 = vadd.f32 %v7370_v10, %v3113_v39  ;;  %v3116_v15 = vadd.f32 %v5264_v6, %v7354_v56  ;;  %v7468_v39 = vpop.permute.xlu0 %3392 }
 0x322   : > { %5546 = vtanh.f32 %v7423_v2  ;;  %v7428_v16 = vadd.f32 %v7374_v34, %v3116_v15 }
 0x324   : > { %5548 = vtanh.f32 %v7428_v16  ;;  %v7474_v1 = vpop.permute.xlu0 %3396 }
 0x326   : > { %v5318_v12 = vpop.f32.mrb[16].mxu1 }
 0x327   : > { %v5319_v14 = vpop.f32.mrb[17].mxu1 }
 0x328   : > { %v7431_v18 = vadd.f32 %v5319_v14, %v5318_v12  ;;  %v5321_v63 = vpop.f32.mrb[18].mxu1  ;;  %v7471_v14 = vpop.permute.xlu1 %3394 }
 0x329   : > { %v5322_v17 = vpop.f32.mrb[19].mxu1 }
 0x32a   : > { %v7433_v22 = vadd.f32 %v5322_v17, %v5321_v63 }
 0x32c   : > { %v5547_v10 = vpop.eup %5546 }
 0x32d   : > { %3484 = vrot.lane.b32.xlu0 %v5547_v10, %s5897_s12 }
 0x32e   : > { %v5549_v24 = vpop.eup %5548 }
 0x32f   : > { %v5265_v34 = vpop.f32.mrb[16].mxu0  ;;  %3486 = vrot.lane.b32.xlu1 %v5549_v24, %s5897_s12  ;;  %v7480_v24 = vpop.permute.xlu1 %3398 }
 0x330   : > { %v5266_v31 = vpop.f32.mrb[17].mxu0 }
 0x331   : > { %v5267_v4 = vadd.f32 %v5266_v31, %v5265_v34  ;;  %v5268_v33 = vpop.f32.mrb[18].mxu0  ;;  %v7486_v31 = vpop.permute.xlu0 %3400 }
 0x332   : > { %v5269_v20 = vpop.f32.mrb[19].mxu0 }
 0x333   : > { %v3121_v21 = vadd.f32 %v5267_v4, %v7354_v56  ;;  %v5270_v55 = vadd.f32 %v5269_v20, %v5268_v33  ;;  %v5103_v4 = vmul.f32 -1.442695, %v7361_v9  ;;  %v7490_v33 = vpop.permute.xlu1 %3402 }
 0x335   : > { %v7439_v36 = vadd.f32 %v7393_v32, %v3121_v21  ;;  %v3124_v40 = vadd.f32 %v5270_v55, %v7354_v56 }
 0x337   : > { %5550 = vtanh.f32 %v7439_v36  ;;  %v7444_v61 = vadd.f32 %v7397_v37, %v3124_v40 }
 0x339   : > { %5552 = vtanh.f32 %v7444_v61 }
 0x33b   : > { %v5324_v43 = vpop.f32.mrb[20].mxu1 }
 0x33c   : > { %v5325_v42 = vpop.f32.mrb[21].mxu1 }
 0x33d   : > { %v7447_v45 = vadd.f32 %v5325_v42, %v5324_v43  ;;  %v5327_v60 = vpop.f32.mrb[22].mxu1  ;;  %v5104_v43 = vmul.f32 -1.442695, %v7365_v0 }
 0x33e   : > { %v5328_v62 = vpop.f32.mrb[23].mxu1 }
 0x33f   : > { %v7449_v35 = vadd.f32 %v5328_v62, %v5327_v60  ;;  %v7498_v60 = vpop.permute.xlu1 %3406 }
 0x341   : > { %v5551_v53 = vpop.eup %5550 }
 0x342   : > { %3488 = vrot.lane.b32.xlu0 %v5551_v53, %s5897_s12 }
 0x343   : > { %v5553_v32 = vpop.eup %5552  ;;  %v7507_v0 = vpop.permute.xlu1 %3410 }
 0x344   : > { %3490 = vrot.lane.b32.xlu1 %v5553_v32, %s5897_s12  ;;  %v5106_v32 = vmul.f32 -1.442695, %v7388_v44 }
 0x346   : > { %v5271_v29 = vpop.f32.mrb[20].mxu0 }
 0x347   : > { %v5272_v8 = vpop.f32.mrb[21].mxu0 }
 0x348   : > { %v5273_v37 = vadd.f32 %v5272_v8, %v5271_v29  ;;  %v5274_v46 = vpop.f32.mrb[22].mxu0  ;;  %v5107_v29 = vmul.f32 -1.442695, %v7402_v48  ;;  %v7513_v48 = vpop.permute.xlu1 %3414 }
 0x349   : > { %v5275_v57 = vpop.f32.mrb[23].mxu0 }
 0x34a   : > { %v3129_v27 = vadd.f32 %v5273_v37, %v7354_v56  ;;  %v5276_v49 = vadd.f32 %v5275_v57, %v5274_v46 }
 0x34c   : > { %v7455_v51 = vadd.f32 %v7391_v47, %v3129_v27  ;;  %v3132_v28 = vadd.f32 %v5276_v49, %v7354_v56 }
 0x34e   : > { %5554 = vtanh.f32 %v7455_v51  ;;  %v7460_v52 = vadd.f32 %v7395_v30, %v3132_v28 }
 0x350   : > { %5556 = vtanh.f32 %v7460_v52 }
 0x352   : > { %v5330_v54 = vpop.f32.mrb[24].mxu1 }
 0x353   : > { %v5331_v58 = vpop.f32.mrb[25].mxu1 }
 0x354   : > { %v7463_v7 = vadd.f32 %v5331_v58, %v5330_v54  ;;  %v5333_v59 = vpop.f32.mrb[26].mxu1 }
 0x355   : > { %v5334_v11 = vpop.f32.mrb[27].mxu1 }
 0x356   : > { %v7465_v38 = vadd.f32 %v5334_v11, %v5333_v59 }
 0x358   : > { %v5555_v41 = vpop.eup %5554 }
 0x359   : > { %3492 = vrot.lane.b32.xlu0 %v5555_v41, %s5897_s12 }
 0x35a   : > { %v5557_v47 = vpop.eup %5556 }
 0x35b   : > { %v5277_v3 = vpop.f32.mrb[24].mxu0  ;;  %3494 = vrot.lane.b32.xlu1 %v5557_v47, %s5897_s12 }
 0x35c   : > { %v5278_v30 = vpop.f32.mrb[25].mxu0 }
 0x35d   : > { %v5279_v6 = vadd.f32 %v5278_v30, %v5277_v3  ;;  %v5280_v15 = vpop.f32.mrb[26].mxu0 }
 0x35e   : > { %v5281_v12 = vpop.f32.mrb[27].mxu0 }
 0x35f   : > { %v3137_v63 = vadd.f32 %v5279_v6, %v7354_v56  ;;  %v5282_v17 = vadd.f32 %v5281_v12, %v5280_v15  ;;  %v7526_v12 = vpop.permute.xlu1 %3418 }
 0x361   : > { %v7477_v10 = vadd.f32 %v7411_v50, %v3137_v63  ;;  %v3140_v23 = vadd.f32 %v5282_v17, %v7354_v56  ;;  %v7492_v50 = vpop.permute.xlu0 %3404 }
 0x363   : > { %5558 = vtanh.f32 %v7477_v10  ;;  %v7484_v34 = vadd.f32 %v7415_v26, %v3140_v23  ;;  %v5105_v26 = vmul.f32 -1.442695, %v7383_v25  ;;  %v5108_v25 = vmul.f32 -1.442695, %v7406_v5 }
 0x365   : > { %5560 = vtanh.f32 %v7484_v34  ;;  %v7502_v9 = vpop.permute.xlu0 %3408 }
 0x366   : > { %5562 = vpow2.f32 %v5103_v4 }
 0x367   : > { %v5336_v20 = vpop.f32.mrb[28].mxu1  ;;  %5564 = vpow2.f32 %v5104_v43  ;;  %v5110_v43 = vmul.f32 -1.442695, %v7428_v16 }
 0x368   : > { %v5337_v21 = vpop.f32.mrb[29].mxu1  ;;  %5566 = vpow2.f32 %v5105_v26 }
 0x369   : > { %v7494_v55 = vadd.f32 %v5337_v21, %v5336_v20  ;;  %v5339_v40 = vpop.f32.mrb[30].mxu1  ;;  %5568 = vpow2.f32 %v5106_v32  ;;  %v7511_v37 = vpop.permute.xlu0 %3412  ;;  %v5109_v21 = vmul.f32 -1.442695, %v7423_v2  ;;  %v4122_v2 = vadd.f32 %v7431_v18, %v7354_v56 }
 0x36a   : > { %v5340_v42 = vpop.f32.mrb[31].mxu1  ;;  %5570 = vpow2.f32 %v5107_v29  ;;  %v4125_v18 = vadd.f32 %v7433_v22, %v7354_v56 }
 0x36b   : > { %v7500_v62 = vadd.f32 %v5340_v42, %v5339_v40  ;;  %5572 = vpow2.f32 %v5108_v25 }
 0x36d   : > { %v5559_v53 = vpop.eup %5558  ;;  %v7516_v5 = vpop.permute.xlu0 %3416 }
 0x36e   : > { %3496 = vrot.lane.b32.xlu0 %v5559_v53, %s5897_s12  ;;  %v4130_v53 = vadd.f32 %v7447_v45, %v7354_v56 }
 0x36f   : > { %v5561_v8 = vpop.eup %5560 }
 0x370   : > { %3498 = vrot.lane.b32.xlu1 %v5561_v8, %s5897_s12  ;;  %v5563_v49 = vpop.eup %5562 }
 0x371   : > { %v5565_v59 = vpop.eup %5564  ;;  %v3296_v11 = vadd.f32 1.0, %v5563_v49 }
 0x372   : > { %v5283_v46 = vpop.f32.mrb[28].mxu0  ;;  %v5567_v3 = vpop.eup %5566  ;;  %v3297_v15 = vadd.f32 1.0, %v5565_v59 }
 0x373   : > { %v5284_v57 = vpop.f32.mrb[29].mxu0  ;;  %v5569_v6 = vpop.eup %5568  ;;  %v3298_v17 = vadd.f32 1.0, %v5567_v3 }
 0x374   : > { %v5285_v44 = vadd.f32 %v5284_v57, %v5283_v46  ;;  %v5286_v27 = vpop.f32.mrb[30].mxu0  ;;  %v5571_v63 = vpop.eup %5570  ;;  %v3299_v23 = vadd.f32 1.0, %v5569_v6 }
 0x375   : > { %v5287_v28 = vpop.f32.mrb[31].mxu0  ;;  %v5573_v4 = vpop.eup %5572  ;;  %v3300_v20 = vadd.f32 1.0, %v5571_v63 }
 0x376   : > { %v3145_v54 = vadd.f32 %v5285_v44, %v7354_v56  ;;  %v5288_v58 = vadd.f32 %v5287_v28, %v5286_v27  ;;  %v3301_v40 = vadd.f32 1.0, %v5573_v4  ;;  %v4133_v44 = vadd.f32 %v7449_v35, %v7354_v56 }
 0x378   : > { %v7519_v41 = vadd.f32 %v7409_v13, %v3145_v54  ;;  %v3148_v47 = vadd.f32 %v5288_v58, %v7354_v56  ;;  %v7529_v13 = vpop.permute.xlu0 %3420 }
 0x37a   : > { %5574 = vtanh.f32 %v7519_v41  ;;  %v7524_v30 = vadd.f32 %v7413_v19, %v3148_v47  ;;  %v7532_v19 = vpop.permute.xlu1 %3422 }
 0x37b   : > { %5576 = vrcp.f32 %v3296_v11 }
 0x37c   : > { %5578 = vtanh.f32 %v7524_v30  ;;  %v3473_v26 = vpop.permute.xlu0 %3472 }
 0x37d   : > { %5580 = vrcp.f32 %v3297_v15 }
 0x37e   : > { %5582 = vrcp.f32 %v3298_v17  ;;  %v3475_v16 = vpop.permute.xlu1 %3474 }
 0x37f   : > { %5584 = vrcp.f32 %v3299_v23 }
 0x380   : > { %5586 = vrcp.f32 %v3300_v20  ;;  %v3477_v27 = vpop.permute.xlu0 %3476 }
 0x381   : > { %5588 = vpow2.f32 %v5109_v21 }
 0x382   : > { %5590 = vrcp.f32 %v3301_v40  ;;  %v3479_v3 = vpop.permute.xlu1 %3478 }
 0x383   : > { %5592 = vpow2.f32 %v5110_v43 }
 0x384   : > { %v5575_v42 = vpop.eup %5574 }
 0x385   : > { %3500 = vrot.lane.b32.xlu0 %v5575_v42, %s5897_s12  ;;  %v7538_v32 = vpop.eup %5576 }
 0x386   : > { %v5417_v29 = vpop.f32.mrb[32].mxu0  ;;  %v5579_v8 = vpop.eup %5578  ;;  %v3520_v25 = vmul.f32 %v7538_v32, %v3473_v26  ;;  %v5111_v26 = vmul.f32 -1.442695, %v7439_v36 }
 0x387   : > { %v7543_v46 = vadd.f32 %v5417_v29, %v4130_v53  ;;  %v4218_v57 = vpop.f32.mrb[33].mxu0  ;;  %3502 = vrot.lane.b32.xlu1 %v5579_v8, %s5897_s12  ;;  %v7552_v28 = vpop.eup %5580  ;;  %v5112_v53 = vmul.f32 -1.442695, %v7444_v61  ;;  %v4146_v29 = vadd.f32 %v7494_v55, %v7354_v56  ;;  %v4138_v8 = vadd.f32 %v7463_v7, %v7354_v56 }
 0x388   : > { %v7547_v45 = vadd.f32 %v4218_v57, %v4122_v2  ;;  %v5418_v49 = vpop.f32.mrb[34].mxu0  ;;  %v7557_v59 = vpop.eup %5582  ;;  %v3521_v35 = vmul.f32 %v7552_v28, %v3475_v16  ;;  %v4149_v57 = vadd.f32 %v7500_v62, %v7354_v56  ;;  %v4141_v61 = vadd.f32 %v7465_v38, %v7354_v56 }
 0x389   : > { %v7554_v54 = vadd.f32 %v5418_v49, %v4133_v44  ;;  %v4221_v58 = vpop.f32.mrb[35].mxu0  ;;  %3552 = vrot.lane.b32.xlu0 %v3520_v25, %s5897_s12  ;;  %v3522_v47 = vmul.f32 %v7557_v59, %v3477_v27  ;;  %v7563_v6 = vpop.eup %5584 }
 0x38a   : > { %v7560_v11 = vadd.f32 %v4221_v58, %v4125_v18  ;;  %v3481_v15 = vpop.permute.xlu0 %3480  ;;  %v7566_v22 = vpop.eup %5586  ;;  %v3523_v17 = vmul.f32 %v7563_v6, %v3479_v3 }
 0x38b   : > { %3554 = vrot.lane.b32.xlu1 %v3521_v35, %s5897_s12  ;;  %v5589_v63 = vpop.eup %5588  ;;  %v3524_v23 = vmul.f32 %v7566_v22, %v3481_v15  ;;  %v3483_v4 = vpop.permute.xlu1 %3482 }
 0x38c   : > { %v7571_v20 = vpop.eup %5590  ;;  %v3302_v40 = vadd.f32 1.0, %v5589_v63 }
 0x38d   : > { %3556 = vrot.lane.b32.xlu0 %v3522_v47, %s5897_s12  ;;  %v5593_v21 = vpop.eup %5592  ;;  %v3525_v43 = vmul.f32 %v7571_v20, %v3483_v4 }
 0x38e   : > { %v3303_v42 = vadd.f32 1.0, %v5593_v21  ;;  %5594 = vrcp.f32 %v3302_v40 }
 0x38f   : > { %3558 = vrot.lane.b32.xlu1 %v3523_v17, %s5897_s12  ;;  %v5113_v17 = vmul.f32 -1.442695, %v7455_v51 }
 0x390   : > { %5596 = vrcp.f32 %v3303_v42 }
 0x391   : > { %3560 = vrot.lane.b32.xlu0 %v3524_v23, %s5897_s12  ;;  %5598 = vpow2.f32 %v5111_v26  ;;  %v5114_v23 = vmul.f32 -1.442695, %v7460_v52  ;;  %v5342_v52 = vpop.f32.mrb[32].mxu1 }
 0x392   : > { %5600 = vpow2.f32 %v5112_v53 }
 0x393   : > { %3562 = vrot.lane.b32.xlu1 %v3525_v43, %s5897_s12 }
 0x398   : > { %v7595_v18 = vpop.eup %5594 }
 0x39a   : > { %v5421_v2 = vpop.f32.mrb[36].mxu0  ;;  %v7598_v35 = vpop.eup %5596 }
 0x39b   : > { %v7583_v25 = vadd.f32 %v5421_v2, %v4146_v29  ;;  %v4234_v16 = vpop.f32.mrb[37].mxu0  ;;  %v5599_v47 = vpop.eup %5598 }
 0x39c   : > { %v7587_v44 = vadd.f32 %v4234_v16, %v4138_v8  ;;  %v5422_v36 = vpop.f32.mrb[38].mxu0  ;;  %v5601_v38 = vpop.eup %5600  ;;  %v3304_v15 = vadd.f32 1.0, %v5599_v47  ;;  %v5115_v16 = vmul.f32 -1.442695, %v7477_v10 }
 0x39d   : > { %v7591_v27 = vadd.f32 %v5422_v36, %v4149_v57  ;;  %v4237_v55 = vpop.f32.mrb[39].mxu0  ;;  %v3305_v63 = vadd.f32 1.0, %v5601_v38  ;;  %v5343_v8 = vpop.f32.mrb[33].mxu1 }
 0x39e   : > { %v7593_v49 = vadd.f32 %v4237_v55, %v4141_v61  ;;  %5602 = vrcp.f32 %v3304_v15  ;;  %v5344_v57 = vadd.f32 %v5343_v8, %v5342_v52  ;;  %v5345_v36 = vpop.f32.mrb[34].mxu1 }
 0x39f   : > { %v3485_v7 = vpop.permute.xlu0 %3484  ;;  %5604 = vrcp.f32 %v3305_v63  ;;  %v5346_v61 = vpop.f32.mrb[35].mxu1 }
 0x3a0   : > { %v3526_v58 = vmul.f32 %v7595_v18, %v3485_v7  ;;  %5606 = vpow2.f32 %v5113_v17  ;;  %v5116_v7 = vmul.f32 -1.442695, %v7484_v34 }
 0x3a1   : > { %v3487_v62 = vpop.permute.xlu1 %3486  ;;  %5608 = vpow2.f32 %v5114_v23 }
 0x3a2   : > { %3564 = vrot.lane.b32.xlu0 %v3526_v58, %s5897_s12  ;;  %v3527_v3 = vmul.f32 %v7598_v35, %v3487_v62  ;;  %v5347_v58 = vadd.f32 %v5346_v61, %v5345_v36  ;;  %v4154_v62 = vadd.f32 %v5344_v57, %v7354_v56 }
 0x3a4   : > { %3566 = vrot.lane.b32.xlu1 %v3527_v3, %s5897_s12  ;;  %v4157_v3 = vadd.f32 %v5347_v58, %v7354_v56 }
 0x3a8   : > { %v7605_v4 = vpop.eup %5602 }
 0x3a9   : > { %v7608_v43 = vpop.eup %5604 }
 0x3aa   : > { %v5607_v53 = vpop.eup %5606 }
 0x3ab   : > { %v5609_v51 = vpop.eup %5608  ;;  %v3306_v29 = vadd.f32 1.0, %v5607_v53 }
 0x3ac   : > { %v3307_v2 = vadd.f32 1.0, %v5609_v51 }
 0x3ad   : > { %5610 = vrcp.f32 %v3306_v29  ;;  %v5348_v29 = vpop.f32.mrb[36].mxu1 }
 0x3ae   : > { %v5425_v55 = vpop.f32.mrb[40].mxu0  ;;  %5612 = vrcp.f32 %v3307_v2  ;;  %v5349_v52 = vpop.f32.mrb[37].mxu1 }
 0x3af   : > { %5614 = vpow2.f32 %v5115_v16  ;;  %v4250_v47 = vpop.f32.mrb[41].mxu0  ;;  %v5350_v8 = vadd.f32 %v5349_v52, %v5348_v29  ;;  %v5351_v16 = vpop.f32.mrb[38].mxu1 }
 0x3b0   : > { %v5426_v38 = vpop.f32.mrb[42].mxu0  ;;  %5616 = vpow2.f32 %v5116_v7  ;;  %v7617_v15 = vadd.f32 %v4250_v47, %v4154_v62  ;;  %v5352_v57 = vpop.f32.mrb[39].mxu1  ;;  %v5117_v7 = vmul.f32 -1.442695, %v7519_v41  ;;  %v5118_v47 = vmul.f32 -1.442695, %v7524_v30 }
 0x3b1   : > { %v4253_v63 = vpop.f32.mrb[43].mxu0  ;;  %v4162_v36 = vadd.f32 %v5350_v8, %v7354_v56  ;;  %v5353_v61 = vadd.f32 %v5352_v57, %v5351_v16 }
 0x3b2   : > { %v7619_v10 = vadd.f32 %v4253_v63, %v4157_v3 }
 0x3b3   : > { %v7631_v58 = vadd.f32 %v5425_v55, %v4162_v36  ;;  %v4165_v62 = vadd.f32 %v5353_v61, %v7354_v56 }
 0x3b4   : > { %v3489_v21 = vpop.permute.xlu0 %3488 }
 0x3b5   : > { %v3528_v40 = vmul.f32 %v7605_v4, %v3489_v21  ;;  %v7635_v3 = vadd.f32 %v5426_v38, %v4165_v62 }
 0x3b6   : > { %v3491_v42 = vpop.permute.xlu1 %3490 }
 0x3b7   : > { %3568 = vrot.lane.b32.xlu0 %v3528_v40, %s5897_s12  ;;  %v3529_v26 = vmul.f32 %v7608_v43, %v3491_v42  ;;  %v7621_v17 = vpop.eup %5610 }
 0x3b8   : > { %v7624_v34 = vpop.eup %5612 }
 0x3b9   : > { %3570 = vrot.lane.b32.xlu1 %v3529_v26, %s5897_s12  ;;  %v5615_v42 = vpop.eup %5614 }
 0x3ba   : > { %v5617_v53 = vpop.eup %5616  ;;  %v3308_v51 = vadd.f32 1.0, %v5615_v42 }
 0x3bb   : > { %v3309_v2 = vadd.f32 1.0, %v5617_v53  ;;  %v5354_v53 = vpop.f32.mrb[40].mxu1 }
 0x3bc   : > { %5618 = vrcp.f32 %v3308_v51  ;;  %v5355_v51 = vpop.f32.mrb[41].mxu1 }
 0x3bd   : > { %5620 = vrcp.f32 %v3309_v2  ;;  %v5356_v29 = vadd.f32 %v5355_v51, %v5354_v53  ;;  %v5357_v52 = vpop.f32.mrb[42].mxu1 }
 0x3be   : > { %5622 = vpow2.f32 %v5117_v7  ;;  %v5358_v2 = vpop.f32.mrb[43].mxu1 }
 0x3bf   : > { %5624 = vpow2.f32 %v5118_v47  ;;  %v5359_v8 = vadd.f32 %v5358_v2, %v5357_v52  ;;  %v4170_v57 = vadd.f32 %v5356_v29, %v7354_v56  ;;  %v3441_v29 = vmul.f32 %v7552_v28, %v7471_v14 }
 0x3c0   : > { %v3442_v52 = vmul.f32 %v7557_v59, %v7474_v1 }
 0x3c1   : > { %v4173_v62 = vadd.f32 %v5359_v8, %v7354_v56 }
 0x3c2   : > { %v5429_v16 = vpop.f32.mrb[44].mxu0 }
 0x3c3   : > { %v4266_v36 = vpop.f32.mrb[45].mxu0 }
 0x3c4   : > { %v7646_v61 = vadd.f32 %v4266_v36, %v4170_v57  ;;  %v5430_v7 = vpop.f32.mrb[46].mxu0  ;;  %v5360_v36 = vpop.f32.mrb[44].mxu1 }
 0x3c5   : > { %v4269_v47 = vpop.f32.mrb[47].mxu0  ;;  %v5361_v14 = vpop.f32.mrb[45].mxu1 }
 0x3c6   : > { %v7637_v63 = vpop.eup %5618 }
 0x3cb   : > { %v3493_v23 = vpop.permute.xlu0 %3492 }
 0x3cc   : > { %v3530_v21 = vmul.f32 %v7621_v17, %v3493_v23 }
 0x3cd   : > { %v3495_v40 = vpop.permute.xlu1 %3494 }
 0x3ce   : > { %3572 = vrot.lane.b32.xlu0 %v3530_v21, %s5897_s12  ;;  %v3531_v26 = vmul.f32 %v7624_v34, %v3495_v40  ;;  %v7640_v40 = vpop.eup %5620 }
 0x3cf   : > { %v5623_v55 = vpop.eup %5622 }
 0x3d0   : > { %3574 = vrot.lane.b32.xlu1 %v3531_v26, %s5897_s12  ;;  %v5625_v30 = vpop.eup %5624  ;;  %v3310_v38 = vadd.f32 1.0, %v5623_v55 }
 0x3d1   : > { %v3311_v26 = vadd.f32 1.0, %v5625_v30  ;;  %v3440_v30 = vmul.f32 %v7538_v32, %v7468_v39 }
 0x3d2   : > { %5626 = vrcp.f32 %v3310_v38 }
 0x3d3   : > { %5628 = vrcp.f32 %v3311_v26 }
 0x3e0   : > { %v3497_v23 = vpop.permute.xlu0 %3496 }
 0x3e1   : > { %v3532_v21 = vmul.f32 %v7637_v63, %v3497_v23  ;;  %v7649_v23 = vadd.f32 %v4269_v47, %v4173_v62  ;;  %v3443_v62 = vmul.f32 %v7563_v6, %v7480_v24  ;;  %v3444_v47 = vmul.f32 %v7566_v22, %v7486_v31 }
 0x3e2   : > { %v3499_v42 = vpop.permute.xlu1 %3498 }
 0x3e3   : > { %3576 = vrot.lane.b32.xlu0 %v3532_v21, %s5897_s12  ;;  %v3533_v41 = vmul.f32 %v7640_v40, %v3499_v42  ;;  %v7651_v21 = vpop.eup %5626 }
 0x3e4   : > { %v7654_v55 = vpop.eup %5628 }
 0x3e5   : > { %3578 = vrot.lane.b32.xlu1 %v3533_v41, %s5897_s12 }
 0x3f7   : > { %v3501_v42 = vpop.permute.xlu0 %3500 }
 0x3f8   : > { %v3534_v41 = vmul.f32 %v7651_v21, %v3501_v42  ;;  %v5362_v42 = vadd.f32 %v5361_v14, %v5360_v36 }
 0x3f9   : > { %v3503_v38 = vpop.permute.xlu1 %3502 }
 0x3fa   : > { %3580 = vrot.lane.b32.xlu0 %v3534_v41, %s5897_s12  ;;  %v3535_v26 = vmul.f32 %v7654_v55, %v3503_v38  ;;  %v5363_v41 = vpop.f32.mrb[46].mxu1 }
 0x3fb   : > { %v3553_v53 = vpop.permute.xlu0 %3552 }
 0x3fc   : > { %v7660_v51 = vadd.f32 %v3553_v53, %v3440_v30  ;;  %3582 = vrot.lane.b32.xlu1 %v3535_v26, %s5897_s12  ;;  %v5364_v26 = vpop.f32.mrb[47].mxu1 }
 0x3fd   : > { %v3555_v2 = vpop.permute.xlu1 %3554  ;;  %v5365_v24 = vadd.f32 %v5364_v26, %v5363_v41 }
 0x3fe   : > { %5630 = vtanh.f32 %v7660_v51  ;;  %v7668_v39 = vadd.f32 %v3555_v2, %v3441_v29  ;;  %v4178_v29 = vadd.f32 %v5362_v42, %v7354_v56 }
 0x3ff   : > { %v3557_v8 = vpop.permute.xlu0 %3556 }
 0x400   : > { %v7670_v57 = vadd.f32 %v3557_v8, %v3442_v52  ;;  %5632 = vtanh.f32 %v7668_v39  ;;  %v3445_v52 = vmul.f32 %v7571_v20, %v7490_v33  ;;  %v7687_v2 = vadd.f32 %v5429_v16, %v4178_v29 }
 0x401   : > { %v3559_v1 = vpop.permute.xlu1 %3558  ;;  %v4181_v8 = vadd.f32 %v5365_v24, %v7354_v56 }
 0x402   : > { %5634 = vtanh.f32 %v7670_v57  ;;  %v7678_v30 = vadd.f32 %v3559_v1, %v3443_v62 }
 0x403   : > { %v3561_v38 = vpop.permute.xlu0 %3560  ;;  %v7692_v14 = vadd.f32 %v5430_v7, %v4181_v8  ;;  %v3446_v7 = vmul.f32 %v7595_v18, %v7492_v50  ;;  %v3448_v50 = vmul.f32 %v7605_v4, %v7502_v9  ;;  %v3450_v9 = vmul.f32 %v7621_v17, %v7511_v37 }
 0x404   : > { %v7680_v53 = vadd.f32 %v3561_v38, %v3444_v47  ;;  %5636 = vtanh.f32 %v7678_v30  ;;  %v3447_v38 = vmul.f32 %v7598_v35, %v7498_v60  ;;  %v3449_v60 = vmul.f32 %v7608_v43, %v7507_v0 }
 0x405   : > { %v3563_v31 = vpop.permute.xlu1 %3562  ;;  %v3451_v0 = vmul.f32 %v7624_v34, %v7513_v48  ;;  %v3452_v37 = vmul.f32 %v7637_v63, %v7516_v5 }
 0x406   : > { %5638 = vtanh.f32 %v7680_v53  ;;  %v7690_v36 = vadd.f32 %v3563_v31, %v3445_v52 }
 0x408   : > { %v5631_v62 = vpop.eup %5630  ;;  %5640 = vtanh.f32 %v7690_v36 }
 0x409   : > { %3648 = vrot.lane.b32.xlu0 %v5631_v62, %s5897_s12 }
 0x40a   : > { %v5633_v47 = vpop.eup %5632 }
 0x40b   : > { %3650 = vrot.lane.b32.xlu1 %v5633_v47, %s5897_s12 }
 0x40c   : > { %v5635_v33 = vpop.eup %5634 }
 0x40d   : > { %3652 = vrot.lane.b32.xlu0 %v5635_v33, %s5897_s12 }
 0x40e   : > { %v5637_v1 = vpop.eup %5636 }
 0x40f   : > { %3654 = vrot.lane.b32.xlu1 %v5637_v1, %s5897_s12 }
 0x410   : > { %v5639_v16 = vpop.eup %5638 }
 0x411   : > { %3656 = vrot.lane.b32.xlu0 %v5639_v16, %s5897_s12 }
 0x412   : > { %v5641_v56 = vpop.eup %5640 }
 0x413   : > { %3658 = vrot.lane.b32.xlu1 %v5641_v56, %s5897_s12 }
 0x414   : > { %v3565_v42 = vpop.permute.xlu0 %3564 }
 0x415   : > { %v7703_v41 = vadd.f32 %v3565_v42, %v3446_v7 }
 0x416   : > { %v3567_v26 = vpop.permute.xlu1 %3566 }
 0x417   : > { %5642 = vtanh.f32 %v7703_v41  ;;  %v7708_v29 = vadd.f32 %v3567_v26, %v3447_v38 }
 0x419   : > { %5644 = vtanh.f32 %v7708_v29 }
 0x421   : > { %v5643_v24 = vpop.eup %5642 }
 0x422   : > { %3660 = vrot.lane.b32.xlu0 %v5643_v24, %s5897_s12 }
 0x423   : > { %v5645_v52 = vpop.eup %5644 }
 0x424   : > { %3662 = vrot.lane.b32.xlu1 %v5645_v52, %s5897_s12  ;;  %v3453_v52 = vmul.f32 %v7640_v40, %v7526_v12  ;;  %v3454_v12 = vmul.f32 %v7651_v21, %v7529_v13 }
 0x429   : > { %v3569_v31 = vpop.permute.xlu0 %3568 }
 0x42a   : > { %v7715_v8 = vadd.f32 %v3569_v31, %v3448_v50 }
 0x42b   : > { %v3571_v62 = vpop.permute.xlu1 %3570 }
 0x42c   : > { %5646 = vtanh.f32 %v7715_v8  ;;  %v7720_v47 = vadd.f32 %v3571_v62, %v3449_v60 }
 0x42e   : > { %5648 = vtanh.f32 %v7720_v47 }
 0x436   : > { %v5647_v33 = vpop.eup %5646 }
 0x437   : > { %3664 = vrot.lane.b32.xlu0 %v5647_v33, %s5897_s12  ;;  %v3455_v33 = vmul.f32 %v7654_v55, %v7532_v19 }
 0x438   : > { %v5649_v1 = vpop.eup %5648 }
 0x439   : > { %3666 = vrot.lane.b32.xlu1 %v5649_v1, %s5897_s12 }
 0x440   : > { %v3573_v16 = vpop.permute.xlu0 %3572 }
 0x441   : > { %v7727_v56 = vadd.f32 %v3573_v16, %v3450_v9 }
 0x442   : > { %v3575_v7 = vpop.permute.xlu1 %3574 }
 0x443   : > { %5650 = vtanh.f32 %v7727_v56  ;;  %v7732_v42 = vadd.f32 %v3575_v7, %v3451_v0 }
 0x445   : > { %5652 = vtanh.f32 %v7732_v42 }
 0x44d   : > { %v5651_v38 = vpop.eup %5650 }
 0x44e   : > { %3668 = vrot.lane.b32.xlu0 %v5651_v38, %s5897_s12 }
 0x44f   : > { %v5653_v26 = vpop.eup %5652 }
 0x450   : > { %3670 = vrot.lane.b32.xlu1 %v5653_v26, %s5897_s12 }
 0x452   : > { %3728 = vrot.lane.b32.xlu0 %v7660_v51, %s5898_s18 }
 0x454   : > { %3730 = vrot.lane.b32.xlu1 %v7668_v39, %s5898_s18 }
 0x455   : > { %v3577_v48 = vpop.permute.xlu0 %3576 }
 0x456   : > { %v7743_v24 = vadd.f32 %v3577_v48, %v3452_v37 }
 0x457   : > { %v3579_v50 = vpop.permute.xlu1 %3578 }
 0x458   : > { %5654 = vtanh.f32 %v7743_v24  ;;  %v7748_v31 = vadd.f32 %v3579_v50, %v3453_v52 }
 0x45a   : > { %5656 = vtanh.f32 %v7748_v31 }
 0x45b   : > { %5658 = vtanh.f32 %v7547_v45 }
 0x462   : > { %v5655_v51 = vpop.eup %5654 }
 0x463   : > { %3672 = vrot.lane.b32.xlu0 %v5655_v51, %s5897_s12 }
 0x464   : > { %v5657_v5 = vpop.eup %5656 }
 0x465   : > { %3674 = vrot.lane.b32.xlu1 %v5657_v5, %s5897_s12  ;;  %v5659_v39 = vpop.eup %5658 }
 0x467   : > { %3732 = vrot.lane.b32.xlu0 %v7670_v57, %s5898_s18 }
 0x469   : > { %4506 = vrot.lane.b32.xlu1 %v5659_v39, %s5897_s12 }
 0x46c   : > { %v3581_v60 = vpop.permute.xlu0 %3580 }
 0x46d   : > { %v7759_v62 = vadd.f32 %v3581_v60, %v3454_v12 }
 0x46e   : > { %v3583_v1 = vpop.permute.xlu1 %3582 }
 0x46f   : > { %5660 = vtanh.f32 %v7759_v62  ;;  %v7764_v9 = vadd.f32 %v3583_v1, %v3455_v33 }
 0x471   : > { %5662 = vtanh.f32 %v7764_v9 }
 0x472   : > { %5664 = vtanh.f32 %v7560_v11 }
 0x473   : > { %5666 = vtanh.f32 %v7543_v46 }
 0x474   : > { %5668 = vtanh.f32 %v7554_v54 }
 0x475   : > { %5670 = vtanh.f32 %v7587_v44 }
 0x476   : > { %5672 = vtanh.f32 %v7593_v49 }
 0x477   : > { %5674 = vtanh.f32 %v7583_v25 }
 0x478   : > { %5676 = vtanh.f32 %v7591_v27 }
 0x479   : > { %v5661_v13 = vpop.eup %5660  ;;  %5678 = vtanh.f32 %v7617_v15 }
 0x47a   : > { %3676 = vrot.lane.b32.xlu0 %v5661_v13, %s5897_s12  ;;  %5680 = vtanh.f32 %v7619_v10  ;;  %v5169_v13 = vld [vmem:[%s7245_s11 + $0xa8] sm:$0xff] }
 0x47b   : > { %v5663_v19 = vpop.eup %5662  ;;  %5682 = vtanh.f32 %v7631_v58  ;;  %v7811_v33 = vpop.permute.xlu0 %3648 }
 0x47c   : > { %v5665_v57 = vpop.eup %5664  ;;  %3678 = vrot.lane.b32.xlu1 %v5663_v19, %s5897_s12  ;;  %5684 = vtanh.f32 %v7635_v3 }
 0x47d   : > { %v5667_v16 = vpop.eup %5666  ;;  %5686 = vtanh.f32 %v7646_v61 }
 0x47e   : > { %4508 = vrot.lane.b32.xlu0 %v5665_v57, %s5897_s12  ;;  %v5669_v0 = vpop.eup %5668  ;;  %5688 = vtanh.f32 %v7649_v23  ;;  %v5170_v57 = vld [vmem:[%s7245_s11 + $0xb0] sm:$0xff] }
 0x47f   : > { %v5671_v7 = vpop.eup %5670  ;;  %5690 = vtanh.f32 %v7687_v2 }
 0x480   : > { %4510 = vrot.lane.b32.xlu1 %v5667_v16, %s5897_s12  ;;  %v5673_v38 = vpop.eup %5672  ;;  %5692 = vtanh.f32 %v7692_v14 }
 0x481   : > { %v5675_v26 = vpop.eup %5674 }
 0x482   : > { %4512 = vrot.lane.b32.xlu0 %v5669_v0, %s5897_s12  ;;  %v5677_v37 = vpop.eup %5676 }
 0x483   : > { %v5679_v48 = vpop.eup %5678 }
 0x484   : > { %4514 = vrot.lane.b32.xlu1 %v5671_v7, %s5897_s12  ;;  %v5681_v52 = vpop.eup %5680  ;;  %v5172_v7 = vld [vmem:[%s7245_s11 + $0xc0] sm:$0xff] }
 0x485   : > { %v5683_v50 = vpop.eup %5682 }
 0x486   : > { %4516 = vrot.lane.b32.xlu0 %v5673_v38, %s5897_s12  ;;  %v5685_v51 = vpop.eup %5684 }
 0x487   : > { %v5687_v5 = vpop.eup %5686 }
 0x488   : > { %4518 = vrot.lane.b32.xlu1 %v5675_v26, %s5897_s12  ;;  %v5689_v39 = vpop.eup %5688  ;;  %v5173_v26 = vld [vmem:[%s7245_s11 + $0xc8] sm:$0xff] }
 0x489   : > { %v5691_v12 = vpop.eup %5690 }
 0x48a   : > { %4520 = vrot.lane.b32.xlu0 %v5677_v37, %s5897_s12  ;;  %v5693_v60 = vpop.eup %5692 }
 0x48c   : > { %4522 = vrot.lane.b32.xlu1 %v5679_v48, %s5897_s12  ;;  %v5174_v48 = vld [vmem:[%s7245_s11 + $0xd0] sm:$0xff] }
 0x48e   : > { %4524 = vrot.lane.b32.xlu0 %v5681_v52, %s5897_s12  ;;  %v5175_v52 = vld [vmem:[%s7245_s11 + $0xd8] sm:$0xff] }
 0x490   : > { %4526 = vrot.lane.b32.xlu1 %v5683_v50, %s5897_s12 }
 0x492   : > { %4528 = vrot.lane.b32.xlu0 %v5685_v51, %s5897_s12  ;;  %v5176_v51 = vld [vmem:[%s7245_s11 + $0xe0] sm:$0xff] }
 0x494   : > { %4530 = vrot.lane.b32.xlu1 %v5687_v5, %s5897_s12 }
 0x496   : > { %4532 = vrot.lane.b32.xlu0 %v5689_v39, %s5897_s12  ;;  %v5177_v39 = vld [vmem:[%s7245_s11 + $0xe8] sm:$0xff] }
 0x498   : > { %4534 = vrot.lane.b32.xlu1 %v5691_v12, %s5897_s12  ;;  %v5178_v12 = vld [vmem:[%s7245_s11 + $0xf0] sm:$0xff] }
 0x49a   : > { %4536 = vrot.lane.b32.xlu0 %v5693_v60, %s5897_s12  ;;  %v5149_v60 = vmul.f32 -1.442695, %v7560_v11 }
 0x49c   : > { %3734 = vrot.lane.b32.xlu1 %v7678_v30, %s5898_s18  ;;  %v7817_v30 = vpop.permute.xlu1 %3650 }
 0x49e   : > { %3736 = vrot.lane.b32.xlu0 %v7680_v53, %s5898_s18  ;;  %v7821_v53 = vpop.permute.xlu0 %3652 }
 0x4a0   : > { %3738 = vrot.lane.b32.xlu1 %v7690_v36, %s5898_s18  ;;  %v7825_v36 = vpop.permute.xlu1 %3654 }
 0x4a2   : > { %3740 = vrot.lane.b32.xlu0 %v7703_v41, %s5898_s18  ;;  %v5164_v41 = vld [vmem:[%s7245_s11 + $0x80] sm:$0xff] }
 0x4a4   : > { %3742 = vrot.lane.b32.xlu1 %v7708_v29, %s5898_s18  ;;  %v7832_v29 = vpop.permute.xlu0 %3656 }
 0x4a6   : > { %3744 = vrot.lane.b32.xlu0 %v7715_v8, %s5898_s18  ;;  %v5165_v8 = vld [vmem:[%s7245_s11 + $0x88] sm:$0xff] }
 0x4a8   : > { %3746 = vrot.lane.b32.xlu1 %v7720_v47, %s5898_s18  ;;  %v7838_v47 = vpop.permute.xlu1 %3658 }
 0x4aa   : > { %3748 = vrot.lane.b32.xlu0 %v7727_v56, %s5898_s18  ;;  %v5166_v56 = vld [vmem:[%s7245_s11 + $0x90] sm:$0xff] }
 0x4ac   : > { %3750 = vrot.lane.b32.xlu1 %v7732_v42, %s5898_s18  ;;  %v7841_v42 = vpop.permute.xlu0 %3660 }
 0x4ae   : > { %3752 = vrot.lane.b32.xlu0 %v7743_v24, %s5898_s18  ;;  %v5167_v24 = vld [vmem:[%s7245_s11 + $0x98] sm:$0xff] }
 0x4b0   : > { %3754 = vrot.lane.b32.xlu1 %v7748_v31, %s5898_s18  ;;  %v7846_v31 = vpop.permute.xlu1 %3662  ;;  %v7849_v1 = vpop.permute.xlu0 %3664 }
 0x4b2   : > { %3756 = vrot.lane.b32.xlu0 %v7759_v62, %s5898_s18  ;;  %v5168_v62 = vld [vmem:[%s7245_s11 + $0xa0] sm:$0xff] }
 0x4b4   : > { %3758 = vrot.lane.b32.xlu1 %v7764_v9, %s5898_s18  ;;  %v5148_v9 = vmul.f32 -1.442695, %v7547_v45  ;;  %v7858_v19 = vpop.permute.xlu1 %3666  ;;  %v5171_v45 = vld [vmem:[%s7245_s11 + $0xb8] sm:$0xff] }
 0x4b6   : > { %4426 = vrot.lane.b32.xlu0 %v5164_v41, %s5897_s12  ;;  %5694 = vpow2.f32 %v5148_v9  ;;  %v5150_v41 = vmul.f32 -1.442695, %v7543_v46  ;;  %v5153_v46 = vmul.f32 -1.442695, %v7593_v49  ;;  %v5156_v49 = vmul.f32 -1.442695, %v7617_v15 }
 0x4b7   : > { %v5160_v15 = vmul.f32 -1.442695, %v7646_v61 }
 0x4b8   : > { %4428 = vrot.lane.b32.xlu1 %v5165_v8, %s5897_s12  ;;  %v5179_v8 = vld [vmem:[%s7245_s11 + $0xf8] sm:$0xff]  ;;  %s4914_s11 = scalar_lea.sflag [#allocation8], %s7852_s29 }
 0x4ba   : > { %4430 = vrot.lane.b32.xlu0 %v5166_v56, %s5897_s12  ;;  %v5151_v56 = vmul.f32 -1.442695, %v7554_v54 }
 0x4bc   : > { %4432 = vrot.lane.b32.xlu1 %v5167_v24, %s5897_s12 }
 0x4be   : > { %4434 = vrot.lane.b32.xlu0 %v5168_v62, %s5897_s12  ;;  %v5152_v62 = vmul.f32 -1.442695, %v7587_v44 }
 0x4c0   : > { %v7862_v16 = vpop.permute.xlu0 %3668  ;;  %4436 = vrot.lane.b32.xlu1 %v5169_v13, %s5897_s12  ;;  %v5695_v50 = vpop.eup %5694  ;;  %v5154_v13 = vmul.f32 -1.442695, %v7583_v25  ;;  %v5157_v25 = vmul.f32 -1.442695, %v7619_v10  ;;  %v5161_v10 = vmul.f32 -1.442695, %v7649_v23 }
 0x4c1   : > { %v4329_v5 = vadd.f32 1.0, %v5695_v50  ;;  %v5159_v50 = vmul.f32 -1.442695, %v7635_v3 }
 0x4c2   : > { %4438 = vrot.lane.b32.xlu0 %v5170_v57, %s5897_s12  ;;  %v7867_v0 = vpop.permute.xlu1 %3670 }
 0x4c3   : > { %5696 = vrcp.f32 %v4329_v5 }
 0x4c4   : > { %v3729_v38 = vpop.permute.xlu0 %3728  ;;  %4440 = vrot.lane.b32.xlu1 %v5171_v45, %s5897_s12  ;;  %5698 = vpow2.f32 %v5149_v60  ;;  %v5155_v45 = vmul.f32 -1.442695, %v7591_v27  ;;  %v5158_v27 = vmul.f32 -1.442695, %v7631_v58  ;;  %v5162_v58 = vmul.f32 -1.442695, %v7687_v2 }
 0x4c5   : > { %3776 = vst.msk [vmem:[%s7873_s16] sm:$0xff] %vm358_vm0, %v3729_v38  ;;  %5700 = vpow2.f32 %v5150_v41 }
 0x4c6   : > { %4442 = vrot.lane.b32.xlu0 %v5172_v7, %s5897_s12  ;;  %v3731_v37 = vpop.permute.xlu1 %3730  ;;  %5702 = vpow2.f32 %v5151_v56  ;;  %v5163_v56 = vmul.f32 -1.442695, %v7692_v14 }
 0x4c7   : > { %3777 = vst.msk [vmem:[%s7873_s16 + $0x8] sm:$0xff] %vm358_vm0, %v3731_v37  ;;  %5704 = vpow2.f32 %v5152_v62 }
 0x4c8   : > { %4444 = vrot.lane.b32.xlu1 %v5173_v26, %s5897_s12  ;;  %5706 = vpow2.f32 %v5153_v46 }
 0x4c9   : > { %5708 = vpow2.f32 %v5154_v13 }
 0x4ca   : > { %4446 = vrot.lane.b32.xlu0 %v5174_v48, %s5897_s12  ;;  %5710 = vpow2.f32 %v5155_v45 }
 0x4cb   : > { %5712 = vpow2.f32 %v5156_v49 }
 0x4cc   : > { %4448 = vrot.lane.b32.xlu1 %v5175_v52, %s5897_s12  ;;  %5714 = vpow2.f32 %v5157_v25 }
 0x4cd   : > { %v7906_v54 = vpop.eup %5696 }
 0x4ce   : > { %4450 = vrot.lane.b32.xlu0 %v5176_v51, %s5897_s12  ;;  %v5699_v44 = vpop.eup %5698 }
 0x4cf   : > { %v5701_v38 = vpop.eup %5700  ;;  %v4330_v26 = vadd.f32 1.0, %v5699_v44 }
 0x4d0   : > { %4452 = vrot.lane.b32.xlu1 %v5177_v39, %s5897_s12  ;;  %v5703_v37 = vpop.eup %5702  ;;  %v4331_v48 = vadd.f32 1.0, %v5701_v38 }
 0x4d1   : > { %v5705_v52 = vpop.eup %5704  ;;  %v4332_v51 = vadd.f32 1.0, %v5703_v37  ;;  %5716 = vrcp.f32 %v4330_v26 }
 0x4d2   : > { %4454 = vrot.lane.b32.xlu0 %v5178_v12, %s5897_s12  ;;  %v5707_v5 = vpop.eup %5706  ;;  %5718 = vrcp.f32 %v4331_v48  ;;  %v4333_v39 = vadd.f32 1.0, %v5705_v52 }
 0x4d3   : > { %v5709_v12 = vpop.eup %5708  ;;  %5720 = vpow2.f32 %v5158_v27  ;;  %v4334_v60 = vadd.f32 1.0, %v5707_v5 }
 0x4d4   : > { %4456 = vrot.lane.b32.xlu1 %v5179_v8, %s5897_s12  ;;  %5722 = vpow2.f32 %v5159_v50  ;;  %v5711_v41 = vpop.eup %5710  ;;  %v4335_v8 = vadd.f32 1.0, %v5709_v12 }
 0x4d5   : > { %v7897_v24 = vpop.permute.xlu0 %3672  ;;  %5724 = vrcp.f32 %v4332_v51  ;;  %v5713_v62 = vpop.eup %5712  ;;  %v4336_v46 = vadd.f32 1.0, %v5711_v41 }
 0x4d6   : > { %5726 = vrcp.f32 %v4333_v39  ;;  %v5715_v61 = vpop.eup %5714  ;;  %v4337_v45 = vadd.f32 1.0, %v5713_v62 }
 0x4d7   : > { %v7900_v11 = vpop.permute.xlu1 %3674  ;;  %5728 = vpow2.f32 %v5160_v15  ;;  %v4338_v14 = vadd.f32 1.0, %v5715_v61 }
 0x4d8   : > { %5730 = vpow2.f32 %v5161_v10 }
 0x4d9   : > { %v3733_v9 = vpop.permute.xlu0 %3732  ;;  %5732 = vrcp.f32 %v4334_v60 }
 0x4da   : > { %3778 = vst.msk [vmem:[%s7873_s16 + $0x10] sm:$0xff] %vm358_vm0, %v3733_v9  ;;  %5734 = vrcp.f32 %v4335_v8 }
 0x4db   : > { %v4507_v57 = vpop.permute.xlu1 %4506  ;;  %v7923_v23 = vpop.eup %5716  ;;  %5736 = vpow2.f32 %v5162_v58 }
 0x4dc   : > { %v4554_v7 = vmul.f32 %v7906_v54, %v4507_v57  ;;  %v7925_v57 = vpop.eup %5718  ;;  %5738 = vpow2.f32 %v5163_v56 }
 0x4dd   : > { %5740 = vrcp.f32 %v4336_v46 }
 0x4de   : > { %4586 = vrot.lane.b32.xlu0 %v4554_v7, %s5897_s12  ;;  %v5721_v7 = vpop.eup %5720  ;;  %5742 = vrcp.f32 %v4337_v45 }
 0x4df   : > { %v5723_v44 = vpop.eup %5722  ;;  %v4339_v48 = vadd.f32 1.0, %v5721_v7  ;;  %5744 = vrcp.f32 %v4338_v14 }
 0x4e0   : > { %v7929_v49 = vpop.eup %5724  ;;  %v4340_v50 = vadd.f32 1.0, %v5723_v44 }
 0x4e1   : > { %v7932_v37 = vpop.eup %5726  ;;  %5746 = vrcp.f32 %v4339_v48 }
 0x4e2   : > { %v5729_v27 = vpop.eup %5728  ;;  %5748 = vrcp.f32 %v4340_v50 }
 0x4e3   : > { %v5731_v51 = vpop.eup %5730  ;;  %v4341_v60 = vadd.f32 1.0, %v5729_v27 }
 0x4e4   : > { %v7937_v39 = vpop.eup %5732  ;;  %v4342_v58 = vadd.f32 1.0, %v5731_v51 }
 0x4e5   : > { %8412 = vst [vmem:[#allocation11_spill] sm:$0xff] %v7937_v39  ;;  %v7940_v10 = vpop.eup %5734  ;;  %5750 = vrcp.f32 %v4341_v60 }
 0x4e6   : > { %v5737_v8 = vpop.eup %5736  ;;  %5752 = vrcp.f32 %v4342_v58 }
 0x4e7   : > { %v5739_v56 = vpop.eup %5738  ;;  %v4343_v45 = vadd.f32 1.0, %v5737_v8 }
 0x4e8   : > { %v7945_v46 = vpop.eup %5740  ;;  %v4344_v7 = vadd.f32 1.0, %v5739_v56 }
 0x4e9   : > { %v7950_v14 = vpop.eup %5742  ;;  %5754 = vrcp.f32 %v4343_v45 }
 0x4ea   : > { %5756 = vrcp.f32 %v4344_v7 }
 0x4ec   : > { %v7918_v3 = vpop.permute.xlu0 %3676 }
 0x4ee   : > { %v7921_v9 = vpop.permute.xlu1 %3678 }
 0x4f0   : > { %v4509_v13 = vpop.permute.xlu0 %4508 }
 0x4f1   : > { %v4555_v2 = vmul.f32 %v7923_v23, %v4509_v13 }
 0x4f2   : > { %v4511_v38 = vpop.permute.xlu1 %4510 }
 0x4f3   : > { %4588 = vrot.lane.b32.xlu1 %v4555_v2, %s5897_s12  ;;  %v4556_v25 = vmul.f32 %v7925_v57, %v4511_v38  ;;  %v7953_v38 = vpop.eup %5744 }
 0x4f4   : > { %v4513_v26 = vpop.permute.xlu0 %4512 }
 0x4f5   : > { %v4557_v52 = vmul.f32 %v7929_v49, %v4513_v26  ;;  %4590 = vrot.lane.b32.xlu0 %v4556_v25, %s5897_s12 }
 0x4f6   : > { %v4515_v5 = vpop.permute.xlu1 %4514 }
 0x4f7   : > { %4592 = vrot.lane.b32.xlu1 %v4557_v52, %s5897_s12  ;;  %v4558_v12 = vmul.f32 %v7932_v37, %v4515_v5  ;;  %v7958_v52 = vpop.eup %5746 }
 0x4f8   : > { %v4517_v15 = vpop.permute.xlu0 %4516  ;;  %v7961_v50 = vpop.eup %5748 }
 0x4f9   : > { %v4559_v41 = vmul.f32 %v7937_v39, %v4517_v15  ;;  %4594 = vrot.lane.b32.xlu0 %v4558_v12, %s5897_s12  ;;  %v7966_v15 = vpop.eup %5750 }
 0x4fa   : > { %v4519_v62 = vpop.permute.xlu1 %4518 }
 0x4fb   : > { %4596 = vrot.lane.b32.xlu1 %v4559_v41, %s5897_s12  ;;  %v4560_v61 = vmul.f32 %v7940_v10, %v4519_v62  ;;  %v7969_v41 = vpop.eup %5752 }
 0x4fc   : > { %v4521_v13 = vpop.permute.xlu0 %4520  ;;  %v7974_v62 = vpop.eup %5754 }
 0x4fd   : > { %v4561_v2 = vmul.f32 %v7945_v46, %v4521_v13  ;;  %4598 = vrot.lane.b32.xlu0 %v4560_v61, %s5897_s12  ;;  %v7977_v13 = vpop.eup %5756 }
 0x4fe   : > { %v4523_v44 = vpop.permute.xlu1 %4522 }
 0x4ff   : > { %4600 = vrot.lane.b32.xlu1 %v4561_v2, %s5897_s12  ;;  %v4562_v25 = vmul.f32 %v7950_v14, %v4523_v44 }
 0x500   : > { %v4525_v26 = vpop.permute.xlu0 %4524 }
 0x501   : > { %v4563_v48 = vmul.f32 %v7953_v38, %v4525_v26  ;;  %4602 = vrot.lane.b32.xlu0 %v4562_v25, %s5897_s12  ;;  %v3696_v25 = vmul.f32 %v7538_v32, %v7811_v33  ;;  %v3698_v32 = vmul.f32 %v7557_v59, %v7821_v53  ;;  %v3700_v59 = vmul.f32 %v7566_v22, %v7832_v29 }
 0x502   : > { %v4527_v27 = vpop.permute.xlu1 %4526 }
 0x503   : > { %4604 = vrot.lane.b32.xlu1 %v4563_v48, %s5897_s12  ;;  %v4564_v51 = vmul.f32 %v7958_v52, %v4527_v27  ;;  %v3697_v48 = vmul.f32 %v7552_v28, %v7817_v30  ;;  %v3699_v28 = vmul.f32 %v7563_v6, %v7825_v36 }
 0x504   : > { %v4529_v5 = vpop.permute.xlu0 %4528 }
 0x505   : > { %v4565_v12 = vmul.f32 %v7961_v50, %v4529_v5  ;;  %4606 = vrot.lane.b32.xlu0 %v4564_v51, %s5897_s12 }
 0x506   : > { %v4531_v60 = vpop.permute.xlu1 %4530 }
 0x507   : > { %4608 = vrot.lane.b32.xlu1 %v4565_v12, %s5897_s12  ;;  %v4566_v8 = vmul.f32 %v7966_v15, %v4531_v60 }
 0x508   : > { %v4533_v58 = vpop.permute.xlu0 %4532 }
 0x509   : > { %v4567_v56 = vmul.f32 %v7969_v41, %v4533_v58  ;;  %4610 = vrot.lane.b32.xlu0 %v4566_v8, %s5897_s12 }
 0x50a   : > { %v4535_v61 = vpop.permute.xlu1 %4534 }
 0x50b   : > { %4612 = vrot.lane.b32.xlu1 %v4567_v56, %s5897_s12  ;;  %v4568_v45 = vmul.f32 %v7974_v62, %v4535_v61 }
 0x50c   : > { %v4537_v2 = vpop.permute.xlu0 %4536 }
 0x50d   : > { %v4569_v7 = vmul.f32 %v7977_v13, %v4537_v2  ;;  %4614 = vrot.lane.b32.xlu0 %v4568_v45, %s5897_s12 }
 0x50e   : > { %v3735_v44 = vpop.permute.xlu1 %3734 }
 0x50f   : > { %4616 = vrot.lane.b32.xlu1 %v4569_v7, %s5897_s12  ;;  %3779 = vst.msk [vmem:[%s7873_s16 + $0x18] sm:$0xff] %vm358_vm0, %v3735_v44 }
 0x510   : > { %v3737_v26 = vpop.permute.xlu0 %3736 }
 0x511   : > { %3780 = vst.msk [vmem:[%s7873_s16 + $0x20] sm:$0xff] %vm358_vm0, %v3737_v26  ;;  %3808 = vrot.lane.b32.xlu0 %v3696_v25, %s5899_s17 }
 0x512   : > { %v3739_v27 = vpop.permute.xlu1 %3738 }
 0x513   : > { %3810 = vrot.lane.b32.xlu1 %v3697_v48, %s5899_s17  ;;  %3781 = vst.msk [vmem:[%s7873_s16 + $0x28] sm:$0xff] %vm358_vm0, %v3739_v27 }
 0x514   : > { %v3741_v33 = vpop.permute.xlu0 %3740 }
 0x515   : > { %3782 = vst.msk [vmem:[%s7873_s16 + $0x30] sm:$0xff] %vm358_vm0, %v3741_v33  ;;  %3812 = vrot.lane.b32.xlu0 %v3698_v32, %s5899_s17 }
 0x516   : > { %v3743_v30 = vpop.permute.xlu1 %3742 }
 0x517   : > { %3814 = vrot.lane.b32.xlu1 %v3699_v28, %s5899_s17  ;;  %3783 = vst.msk [vmem:[%s7873_s16 + $0x38] sm:$0xff] %vm358_vm0, %v3743_v30 }
 0x518   : > { %v3745_v53 = vpop.permute.xlu0 %3744 }
 0x519   : > { %3784 = vst.msk [vmem:[%s7873_s16 + $0x40] sm:$0xff] %vm358_vm0, %v3745_v53  ;;  %3816 = vrot.lane.b32.xlu0 %v3700_v59, %s5899_s17 }
 0x51a   : > { %v3747_v6 = vpop.permute.xlu1 %3746 }
 0x51b   : > { %3785 = vst.msk [vmem:[%s7873_s16 + $0x48] sm:$0xff] %vm358_vm0, %v3747_v6 }
 0x51c   : > { %v3749_v36 = vpop.permute.xlu0 %3748 }
 0x51d   : > { %3786 = vst.msk [vmem:[%s7873_s16 + $0x50] sm:$0xff] %vm358_vm0, %v3749_v36 }
 0x51e   : > { %v3751_v51 = vpop.permute.xlu1 %3750 }
 0x51f   : > { %3787 = vst.msk [vmem:[%s7873_s16 + $0x58] sm:$0xff] %vm358_vm0, %v3751_v51 }
 0x520   : > { %v3753_v5 = vpop.permute.xlu0 %3752 }
 0x521   : > { %3788 = vst.msk [vmem:[%s7873_s16 + $0x60] sm:$0xff] %vm358_vm0, %v3753_v5 }
 0x522   : > { %v3755_v22 = vpop.permute.xlu1 %3754 }
 0x523   : > { %3789 = vst.msk [vmem:[%s7873_s16 + $0x68] sm:$0xff] %vm358_vm0, %v3755_v22 }
 0x524   : > { %v3757_v29 = vpop.permute.xlu0 %3756 }
 0x525   : > { %3790 = vst.msk [vmem:[%s7873_s16 + $0x70] sm:$0xff] %vm358_vm0, %v3757_v29 }
 0x526   : > { %v3759_v12 = vpop.permute.xlu1 %3758 }
 0x527   : > { %3791 = vst.msk [vmem:[%s7873_s16 + $0x78] sm:$0xff] %vm358_vm0, %v3759_v12 }
 0x528   : > { %v4427_v60 = vpop.permute.xlu0 %4426 }
 0x529   : > { %v4474_v32 = vmul.f32 %v7906_v54, %v4427_v60 }
 0x52a   : > { %v4429_v61 = vpop.permute.xlu1 %4428 }
 0x52b   : > { %v4475_v36 = vmul.f32 %v7923_v23, %v4429_v61 }
 0x52c   : > { %v4431_v8 = vpop.permute.xlu0 %4430 }
 0x52d   : > { %v4476_v22 = vmul.f32 %v7925_v57, %v4431_v8 }
 0x52e   : > { %v4433_v2 = vpop.permute.xlu1 %4432 }
 0x52f   : > { %v4477_v29 = vmul.f32 %v7929_v49, %v4433_v2 }
 0x530   : > { %v4435_v58 = vpop.permute.xlu0 %4434 }
 0x532   : > { %v4437_v44 = vpop.permute.xlu1 %4436 }
 0x533   : > { %v4479_v61 = vmul.f32 %v7937_v39, %v4437_v44 }
 0x534   : > { %v4439_v56 = vpop.permute.xlu0 %4438 }
 0x536   : > { %v4441_v26 = vpop.permute.xlu1 %4440 }
 0x538   : > { %v4443_v45 = vpop.permute.xlu0 %4442 }
 0x53a   : > { %v4445_v27 = vpop.permute.xlu1 %4444 }
 0x53c   : > { %v4447_v7 = vpop.permute.xlu0 %4446 }
 0x53e   : > { %v4449_v30 = vpop.permute.xlu1 %4448 }
 0x540   : > { %v8024_v25 = vpop.permute.xlu0 %4450 }
 0x542   : > { %v4453_v59 = vpop.permute.xlu1 %4452 }
 0x544   : > { %v8026_v48 = vpop.permute.xlu0 %4454 }
 0x546   : > { %v8033_v6 = vpop.permute.xlu1 %4456 }
 0x550   : > { %v4587_v33 = vpop.permute.xlu0 %4586 }
 0x551   : > { %v8029_v28 = vadd.f32 %v4587_v33, %v4474_v32 }
 0x553   : > { %5758 = vtanh.f32 %v8029_v28 }
 0x55d   : > { %v5759_v53 = vpop.eup %5758 }
 0x55e   : > { %4682 = vrot.lane.b32.xlu1 %v5759_v53, %s5897_s12  ;;  %v4478_v53 = vmul.f32 %v7932_v37, %v4435_v58 }
 0x565   : > { %v4589_v51 = vpop.permute.xlu1 %4588 }
 0x566   : > { %v8036_v5 = vadd.f32 %v4589_v51, %v4475_v36 }
 0x567   : > { %v4591_v12 = vpop.permute.xlu0 %4590 }
 0x568   : > { %5760 = vtanh.f32 %v8036_v5  ;;  %v8041_v60 = vadd.f32 %v4591_v12, %v4476_v22  ;;  %v4480_v22 = vmul.f32 %v7940_v10, %v4439_v56  ;;  %v4483_v56 = vmul.f32 %v7953_v38, %v4445_v27 }
 0x569   : > { %v4593_v32 = vpop.permute.xlu1 %4592  ;;  %v4485_v27 = vmul.f32 %v7961_v50, %v4449_v30  ;;  %v4487_v30 = vmul.f32 %v7969_v41, %v4453_v59  ;;  %v4489_v59 = vmul.f32 %v7977_v13, %v8033_v6 }
 0x56a   : > { %v8043_v33 = vadd.f32 %v4593_v32, %v4477_v29  ;;  %5762 = vtanh.f32 %v8041_v60  ;;  %v4481_v29 = vmul.f32 %v7945_v46, %v4441_v26 }
 0x56b   : > { %v4595_v36 = vpop.permute.xlu0 %4594 }
 0x56c   : > { %5764 = vtanh.f32 %v8043_v33  ;;  %v8049_v8 = vadd.f32 %v4595_v36, %v4478_v53  ;;  %v4482_v53 = vmul.f32 %v7950_v14, %v4443_v45  ;;  %v4484_v45 = vmul.f32 %v7958_v52, %v4447_v7 }
 0x56d   : > { %v4597_v2 = vpop.permute.xlu1 %4596  ;;  %v4486_v7 = vmul.f32 %v7966_v15, %v8024_v25  ;;  %v4488_v25 = vmul.f32 %v7974_v62, %v8026_v48 }
 0x56e   : > { %v8051_v51 = vadd.f32 %v4597_v2, %v4479_v61  ;;  %5766 = vtanh.f32 %v8049_v8 }
 0x56f   : > { %v4599_v58 = vpop.permute.xlu0 %4598 }
 0x570   : > { %5768 = vtanh.f32 %v8051_v51  ;;  %v8057_v12 = vadd.f32 %v4599_v58, %v4480_v22 }
 0x571   : > { %v4601_v44 = vpop.permute.xlu1 %4600 }
 0x572   : > { %v5761_v32 = vpop.eup %5760  ;;  %v8059_v39 = vadd.f32 %v4601_v44, %v4481_v29  ;;  %5770 = vtanh.f32 %v8057_v12 }
 0x573   : > { %4684 = vrot.lane.b32.xlu0 %v5761_v32, %s5897_s12  ;;  %v4603_v26 = vpop.permute.xlu0 %4602 }
 0x574   : > { %5772 = vtanh.f32 %v8059_v39  ;;  %v5763_v61 = vpop.eup %5762  ;;  %v8066_v36 = vadd.f32 %v4603_v26, %v4482_v53 }
 0x575   : > { %v4605_v2 = vpop.permute.xlu1 %4604  ;;  %4686 = vrot.lane.b32.xlu1 %v5763_v61, %s5897_s12 }
 0x576   : > { %v5765_v22 = vpop.eup %5764  ;;  %v8068_v58 = vadd.f32 %v4605_v2, %v4483_v56  ;;  %5774 = vtanh.f32 %v8066_v36 }
 0x577   : > { %4688 = vrot.lane.b32.xlu0 %v5765_v22, %s5897_s12  ;;  %v4607_v29 = vpop.permute.xlu0 %4606 }
 0x578   : > { %5776 = vtanh.f32 %v8068_v58  ;;  %v5767_v44 = vpop.eup %5766  ;;  %v8076_v32 = vadd.f32 %v4607_v29, %v4484_v45 }
 0x579   : > { %v4609_v53 = vpop.permute.xlu1 %4608  ;;  %4690 = vrot.lane.b32.xlu1 %v5767_v44, %s5897_s12 }
 0x57a   : > { %v5769_v26 = vpop.eup %5768  ;;  %v8078_v56 = vadd.f32 %v4609_v53, %v4485_v27  ;;  %5778 = vtanh.f32 %v8076_v32 }
 0x57b   : > { %4692 = vrot.lane.b32.xlu0 %v5769_v26, %s5897_s12  ;;  %v4611_v61 = vpop.permute.xlu0 %4610 }
 0x57c   : > { %5780 = vtanh.f32 %v8078_v56  ;;  %v5771_v2 = vpop.eup %5770  ;;  %v8087_v22 = vadd.f32 %v4611_v61, %v4486_v7 }
 0x57d   : > { %v4613_v45 = vpop.permute.xlu1 %4612  ;;  %4694 = vrot.lane.b32.xlu1 %v5771_v2, %s5897_s12 }
 0x57e   : > { %v5773_v27 = vpop.eup %5772  ;;  %v8089_v29 = vadd.f32 %v4613_v45, %v4487_v30  ;;  %5782 = vtanh.f32 %v8087_v22 }
 0x57f   : > { %4696 = vrot.lane.b32.xlu0 %v5773_v27, %s5897_s12  ;;  %v4615_v44 = vpop.permute.xlu0 %4614 }
 0x580   : > { %5784 = vtanh.f32 %v8089_v29  ;;  %v5775_v53 = vpop.eup %5774  ;;  %v8099_v26 = vadd.f32 %v4615_v44, %v4488_v25 }
 0x581   : > { %v4617_v7 = vpop.permute.xlu1 %4616  ;;  %4698 = vrot.lane.b32.xlu1 %v5775_v53, %s5897_s12 }
 0x582   : > { %v5777_v30 = vpop.eup %5776  ;;  %v8101_v61 = vadd.f32 %v4617_v7, %v4489_v59  ;;  %5786 = vtanh.f32 %v8099_v26 }
 0x583   : > { %4700 = vrot.lane.b32.xlu0 %v5777_v30, %s5897_s12  ;;  %v3809_v48 = vpop.permute.xlu0 %3808 }
 0x584   : > { %5788 = vtanh.f32 %v8101_v61  ;;  %v5779_v6 = vpop.eup %5778  ;;  %3856 = vst.msk [vmem:[%s8109_s28] sm:$0xff] %vm358_vm0, %v3809_v48  ;;  %v3701_v48 = vmul.f32 %v7571_v20, %v7838_v47  ;;  %v3705_v20 = vmul.f32 %v7608_v43, %v7858_v19  ;;  %v3709_v43 = vmul.f32 %v7640_v40, %v7900_v11 }
 0x585   : > { %v3811_v2 = vpop.permute.xlu1 %3810  ;;  %4702 = vrot.lane.b32.xlu1 %v5779_v6, %s5897_s12  ;;  %v3702_v6 = vmul.f32 %v7595_v18, %v7841_v42  ;;  %v3706_v18 = vmul.f32 %v7621_v17, %v7862_v16  ;;  %v3710_v17 = vmul.f32 %v7651_v21, %v7918_v3 }
 0x586   : > { %v5781_v45 = vpop.eup %5780  ;;  %3857 = vst.msk [vmem:[%s8109_s28 + $0x8] sm:$0xff] %vm358_vm0, %v3811_v2  ;;  %v3703_v2 = vmul.f32 %v7598_v35, %v7846_v31  ;;  %v3707_v35 = vmul.f32 %v7624_v34, %v7867_v0  ;;  %v3711_v34 = vmul.f32 %v7654_v55, %v7921_v9 }
 0x587   : > { %4704 = vrot.lane.b32.xlu0 %v5781_v45, %s5897_s12  ;;  %v3813_v27 = vpop.permute.xlu0 %3812  ;;  %v3704_v45 = vmul.f32 %v7605_v4, %v7849_v1  ;;  %v3708_v4 = vmul.f32 %v7637_v63, %v7897_v24  ;;  %v8413_v24 = vld [vmem:[#allocation11_spill] sm:$0xff] }
 0x588   : > { %v5783_v25 = vpop.eup %5782  ;;  %3858 = vst.msk [vmem:[%s8109_s28 + $0x10] sm:$0xff] %vm358_vm0, %v3813_v27 }
 0x589   : > { %v3815_v59 = vpop.permute.xlu1 %3814  ;;  %4706 = vrot.lane.b32.xlu1 %v5783_v25, %s5897_s12 }
 0x58a   : > { %v5785_v44 = vpop.eup %5784  ;;  %3859 = vst.msk [vmem:[%s8109_s28 + $0x18] sm:$0xff] %vm358_vm0, %v3815_v59 }
 0x58b   : > { %4708 = vrot.lane.b32.xlu0 %v5785_v44, %s5897_s12  ;;  %v3817_v53 = vpop.permute.xlu0 %3816 }
 0x58c   : > { %v5787_v7 = vpop.eup %5786  ;;  %3860 = vst.msk [vmem:[%s8109_s28 + $0x20] sm:$0xff] %vm358_vm0, %v3817_v53 }
 0x58d   : > { %4710 = vrot.lane.b32.xlu1 %v5787_v7, %s5897_s12 }
 0x58e   : > { %v5789_v30 = vpop.eup %5788 }
 0x58f   : > { %4712 = vrot.lane.b32.xlu0 %v5789_v30, %s5897_s12  ;;  %s5223_s12 = sshll.u32 %s5959_s25, 12 }
 0x590   : > { %s8283_s26 = scalar_lea.hbm %s8408_s6, %s5223_s12 }
 0x591   : > { %3818 = vrot.lane.b32.xlu1 %v3701_v48, %s5899_s17 }
 0x593   : > { %3820 = vrot.lane.b32.xlu0 %v3702_v6, %s5899_s17 }
 0x595   : > { %3822 = vrot.lane.b32.xlu1 %v3703_v2, %s5899_s17 }
 0x597   : > { %3824 = vrot.lane.b32.xlu0 %v3704_v45, %s5899_s17 }
 0x599   : > { %3826 = vrot.lane.b32.xlu1 %v3705_v20, %s5899_s17 }
 0x59b   : > { %3828 = vrot.lane.b32.xlu0 %v3706_v18, %s5899_s17 }
 0x59d   : > { %3830 = vrot.lane.b32.xlu1 %v3707_v35, %s5899_s17 }
 0x59f   : > { %3832 = vrot.lane.b32.xlu0 %v3708_v4, %s5899_s17 }
 0x5a1   : > { %3834 = vrot.lane.b32.xlu1 %v3709_v43, %s5899_s17 }
 0x5a3   : > { %3836 = vrot.lane.b32.xlu0 %v3710_v17, %s5899_s17 }
 0x5a5   : > { %3838 = vrot.lane.b32.xlu1 %v3711_v34, %s5899_s17 }
 0x5a7   : > { %4762 = vrot.lane.b32.xlu0 %v8029_v28, %s5898_s18 }
 0x5a9   : > { %4764 = vrot.lane.b32.xlu1 %v8036_v5, %s5898_s18 }
 0x5ab   : > { %4766 = vrot.lane.b32.xlu0 %v8041_v60, %s5898_s18 }
 0x5ad   : > { %4768 = vrot.lane.b32.xlu1 %v8043_v33, %s5898_s18 }
 0x5af   : > { %4770 = vrot.lane.b32.xlu0 %v8049_v8, %s5898_s18 }
 0x5b1   : > { %4772 = vrot.lane.b32.xlu1 %v8051_v51, %s5898_s18 }
 0x5b3   : > { %4774 = vrot.lane.b32.xlu0 %v8057_v12, %s5898_s18 }
 0x5b5   : > { %4776 = vrot.lane.b32.xlu1 %v8059_v39, %s5898_s18 }
 0x5b7   : > { %4778 = vrot.lane.b32.xlu0 %v8066_v36, %s5898_s18 }
 0x5b9   : > { %4780 = vrot.lane.b32.xlu1 %v8068_v58, %s5898_s18 }
 0x5bb   : > { %4782 = vrot.lane.b32.xlu0 %v8076_v32, %s5898_s18 }
 0x5bd   : > { %4784 = vrot.lane.b32.xlu1 %v8078_v56, %s5898_s18 }
 0x5bf   : > { %4786 = vrot.lane.b32.xlu0 %v8087_v22, %s5898_s18 }
 0x5c1   : > { %4788 = vrot.lane.b32.xlu1 %v8089_v29, %s5898_s18 }
 0x5c3   : > { %4790 = vrot.lane.b32.xlu0 %v8099_v26, %s5898_s18 }
 0x5c5   : > { %4792 = vrot.lane.b32.xlu1 %v8101_v61, %s5898_s18  ;;  %s5794_s18 = sshll.u32 %s5900_s14, 4  ;;  %s5795_s18 = int_to_ptr.vmem [resolvable:$false] %s5794_s18 }
 0x5c6   : > { %s5796_s9 = scalar_lea.vmem %s5795_s18, 8192  ;;  %p5797_p0 = scmp.lt.s32.totalorder %s8285_s13, %s5795_s18 }
 0x5c7   : > { %p5798_p1 = scmp.lt.s32.totalorder %s5796_s9, %s5790_s10 }
 0x5c9   : > { %p5799_p2 = por %p5798_p1, %p5797_p0 }
 0x5cb   : > { %p5800_p3 = pnand %p5799_p2, %p5793_p13 }
 0x5d0   : > { %v4683_v63 = vpop.permute.xlu1 %4682 }
 0x5d1   : > { %v4730_v40 = vmul.f32 %v7906_v54, %v4683_v63 }
 0x5d3   : > { %4843 = vrot.lane.b32.xlu0 %v4730_v40, %s5899_s17 }
 0x5e5   : > { %v4685_v21 = vpop.permute.xlu0 %4684 }
 0x5e6   : > { %v4731_v55 = vmul.f32 %v7923_v23, %v4685_v21 }
 0x5e7   : > { %v4687_v47 = vpop.permute.xlu1 %4686 }
 0x5e8   : > { %4845 = vrot.lane.b32.xlu1 %v4731_v55, %s5899_s17  ;;  %v4732_v42 = vmul.f32 %v7925_v57, %v4687_v47 }
 0x5e9   : > { %v4689_v31 = vpop.permute.xlu0 %4688 }
 0x5ea   : > { %v4733_v1 = vmul.f32 %v7929_v49, %v4689_v31  ;;  %4847 = vrot.lane.b32.xlu0 %v4732_v42, %s5899_s17 }
 0x5eb   : > { %v4691_v19 = vpop.permute.xlu1 %4690 }
 0x5ec   : > { %4849 = vrot.lane.b32.xlu1 %v4733_v1, %s5899_s17  ;;  %v4734_v16 = vmul.f32 %v7932_v37, %v4691_v19 }
 0x5ed   : > { %v4693_v0 = vpop.permute.xlu0 %4692 }
 0x5ee   : > { %v4735_v11 = vmul.f32 %v8413_v24, %v4693_v0  ;;  %4851 = vrot.lane.b32.xlu0 %v4734_v16, %s5899_s17 }
 0x5ef   : > { %v4695_v54 = vpop.permute.xlu1 %4694 }
 0x5f0   : > { %4853 = vrot.lane.b32.xlu1 %v4735_v11, %s5899_s17  ;;  %v4736_v3 = vmul.f32 %v7940_v10, %v4695_v54 }
 0x5f1   : > { %v4697_v9 = vpop.permute.xlu0 %4696 }
 0x5f2   : > { %v4737_v23 = vmul.f32 %v7945_v46, %v4697_v9  ;;  %4855 = vrot.lane.b32.xlu0 %v4736_v3, %s5899_s17 }
 0x5f3   : > { %v4699_v57 = vpop.permute.xlu1 %4698 }
 0x5f4   : > { %4857 = vrot.lane.b32.xlu1 %v4737_v23, %s5899_s17  ;;  %v4738_v49 = vmul.f32 %v7950_v14, %v4699_v57 }
 0x5f5   : > { %v4701_v37 = vpop.permute.xlu0 %4700 }
 0x5f6   : > { %v4739_v39 = vmul.f32 %v7953_v38, %v4701_v37  ;;  %4859 = vrot.lane.b32.xlu0 %v4738_v49, %s5899_s17 }
 0x5f7   : > { %v4703_v28 = vpop.permute.xlu1 %4702 }
 0x5f8   : > { %4861 = vrot.lane.b32.xlu1 %v4739_v39, %s5899_s17  ;;  %v4740_v10 = vmul.f32 %v7958_v52, %v4703_v28 }
 0x5f9   : > { %v4705_v5 = vpop.permute.xlu0 %4704 }
 0x5fa   : > { %v4741_v46 = vmul.f32 %v7961_v50, %v4705_v5  ;;  %4863 = vrot.lane.b32.xlu0 %v4740_v10, %s5899_s17 }
 0x5fb   : > { %v4707_v60 = vpop.permute.xlu1 %4706 }
 0x5fc   : > { %4865 = vrot.lane.b32.xlu1 %v4741_v46, %s5899_s17  ;;  %v4742_v14 = vmul.f32 %v7966_v15, %v4707_v60 }
 0x5fd   : > { %v4709_v38 = vpop.permute.xlu0 %4708 }
 0x5fe   : > { %v4743_v33 = vmul.f32 %v7969_v41, %v4709_v38  ;;  %4867 = vrot.lane.b32.xlu0 %v4742_v14, %s5899_s17 }
 0x5ff   : > { %v4711_v52 = vpop.permute.xlu1 %4710 }
 0x600   : > { %4869 = vrot.lane.b32.xlu1 %v4743_v33, %s5899_s17  ;;  %v4744_v50 = vmul.f32 %v7974_v62, %v4711_v52 }
 0x601   : > { %v4713_v8 = vpop.permute.xlu0 %4712 }
 0x602   : > { %v4745_v51 = vmul.f32 %v7977_v13, %v4713_v8  ;;  %4871 = vrot.lane.b32.xlu0 %v4744_v50, %s5899_s17 }
 0x603   : > { %v3819_v15 = vpop.permute.xlu1 %3818 }
 0x604   : > { %4873 = vrot.lane.b32.xlu1 %v4745_v51, %s5899_s17  ;;  %3861 = vst.msk [vmem:[%s8109_s28 + $0x28] sm:$0xff] %vm358_vm0, %v3819_v15 }
 0x605   : > { %v3821_v41 = vpop.permute.xlu0 %3820 }
 0x606   : > { %3862 = vst.msk [vmem:[%s8109_s28 + $0x30] sm:$0xff] %vm358_vm0, %v3821_v41 }
 0x607   : > { %v3823_v12 = vpop.permute.xlu1 %3822 }
 0x608   : > { %3863 = vst.msk [vmem:[%s8109_s28 + $0x38] sm:$0xff] %vm358_vm0, %v3823_v12 }
 0x609   : > { %v3825_v62 = vpop.permute.xlu0 %3824 }
 0x60a   : > { %3864 = vst.msk [vmem:[%s8109_s28 + $0x40] sm:$0xff] %vm358_vm0, %v3825_v62 }
 0x60b   : > { %v3827_v13 = vpop.permute.xlu1 %3826 }
 0x60c   : > { %3865 = vst.msk [vmem:[%s8109_s28 + $0x48] sm:$0xff] %vm358_vm0, %v3827_v13 }
 0x60d   : > { %v3829_v36 = vpop.permute.xlu0 %3828 }
 0x60e   : > { %3866 = vst.msk [vmem:[%s8109_s28 + $0x50] sm:$0xff] %vm358_vm0, %v3829_v36 }
 0x60f   : > { %v3831_v58 = vpop.permute.xlu1 %3830 }
 0x610   : > { %3867 = vst.msk [vmem:[%s8109_s28 + $0x58] sm:$0xff] %vm358_vm0, %v3831_v58 }
 0x611   : > { %v3833_v32 = vpop.permute.xlu0 %3832 }
 0x612   : > { %3868 = vst.msk [vmem:[%s8109_s28 + $0x60] sm:$0xff] %vm358_vm0, %v3833_v32 }
 0x613   : > { %v3835_v56 = vpop.permute.xlu1 %3834 }
 0x614   : > { %3869 = vst.msk [vmem:[%s8109_s28 + $0x68] sm:$0xff] %vm358_vm0, %v3835_v56 }
 0x615   : > { %v3837_v22 = vpop.permute.xlu0 %3836 }
 0x616   : > { %3870 = vst.msk [vmem:[%s8109_s28 + $0x70] sm:$0xff] %vm358_vm0, %v3837_v22 }
 0x617   : > { %v3839_v29 = vpop.permute.xlu1 %3838 }
 0x618   : > { %3871 = vst.msk [vmem:[%s8109_s28 + $0x78] sm:$0xff] %vm358_vm0, %v3839_v29 }
 0x619   : > { %v4763_v26 = vpop.permute.xlu0 %4762 }
 0x61a   : > { %5180 = vst.msk [vmem:[%s7873_s16 + $0x80] sm:$0xff] %vm358_vm0, %v4763_v26 }
 0x61b   : > { %v4765_v61 = vpop.permute.xlu1 %4764 }
 0x61c   : > { %5181 = vst.msk [vmem:[%s7873_s16 + $0x88] sm:$0xff] %vm358_vm0, %v4765_v61 }
 0x61d   : > { %v4767_v27 = vpop.permute.xlu0 %4766 }
 0x61e   : > { %5182 = vst.msk [vmem:[%s7873_s16 + $0x90] sm:$0xff] %vm358_vm0, %v4767_v27 }
 0x61f   : > { %v4769_v25 = vpop.permute.xlu1 %4768 }
 0x620   : > { %5183 = vst.msk [vmem:[%s7873_s16 + $0x98] sm:$0xff] %vm358_vm0, %v4769_v25 }
 0x621   : > { %v4771_v59 = vpop.permute.xlu0 %4770 }
 0x622   : > { %5184 = vst.msk [vmem:[%s7873_s16 + $0xa0] sm:$0xff] %vm358_vm0, %v4771_v59 }
 0x623   : > { %v4773_v44 = vpop.permute.xlu1 %4772 }
 0x624   : > { %5185 = vst.msk [vmem:[%s7873_s16 + $0xa8] sm:$0xff] %vm358_vm0, %v4773_v44 }
 0x625   : > { %v4775_v53 = vpop.permute.xlu0 %4774 }
 0x626   : > { %5186 = vst.msk [vmem:[%s7873_s16 + $0xb0] sm:$0xff] %vm358_vm0, %v4775_v53 }
 0x627   : > { %v4777_v7 = vpop.permute.xlu1 %4776 }
 0x628   : > { %5187 = vst.msk [vmem:[%s7873_s16 + $0xb8] sm:$0xff] %vm358_vm0, %v4777_v7 }
 0x629   : > { %v4779_v30 = vpop.permute.xlu0 %4778 }
 0x62a   : > { %5188 = vst.msk [vmem:[%s7873_s16 + $0xc0] sm:$0xff] %vm358_vm0, %v4779_v30 }
 0x62b   : > { %v4781_v48 = vpop.permute.xlu1 %4780 }
 0x62c   : > { %5189 = vst.msk [vmem:[%s7873_s16 + $0xc8] sm:$0xff] %vm358_vm0, %v4781_v48 }
 0x62d   : > { %v4783_v6 = vpop.permute.xlu0 %4782 }
 0x62e   : > { %5190 = vst.msk [vmem:[%s7873_s16 + $0xd0] sm:$0xff] %vm358_vm0, %v4783_v6 }
 0x62f   : > { %v4785_v2 = vpop.permute.xlu1 %4784 }
 0x630   : > { %5191 = vst.msk [vmem:[%s7873_s16 + $0xd8] sm:$0xff] %vm358_vm0, %v4785_v2 }
 0x631   : > { %v4787_v45 = vpop.permute.xlu0 %4786 }
 0x632   : > { %5192 = vst.msk [vmem:[%s7873_s16 + $0xe0] sm:$0xff] %vm358_vm0, %v4787_v45 }
 0x633   : > { %v4789_v20 = vpop.permute.xlu1 %4788 }
 0x634   : > { %5193 = vst.msk [vmem:[%s7873_s16 + $0xe8] sm:$0xff] %vm358_vm0, %v4789_v20 }
 0x635   : > { %v4791_v18 = vpop.permute.xlu0 %4790 }
 0x636   : > { %5194 = vst.msk [vmem:[%s7873_s16 + $0xf0] sm:$0xff] %vm358_vm0, %v4791_v18 }
 0x637   : > { %v4793_v35 = vpop.permute.xlu1 %4792 }
 0x638   : > { %5195 = vst.msk [vmem:[%s7873_s16 + $0xf8] sm:$0xff] %vm358_vm0, %v4793_v35 }
 0x639   : > { %5803 = shalt.err (!%p5800_p3)
}
 0x63a   : > { %s5804_s16 = scalar_lea.hbm %s8283_s26, 4096  ;;  %s5808_s19 = scalar_lea.hbm %s8408_s6, 8192 }
 0x63b   : > { %p5805_p4 = scmp.ne.s32.totalorder %s8283_s26, %s5804_s16  ;;  %p5809_p9 = scmp.lt.u32.totalorder %s8283_s26, %s8408_s6 }
 0x63c   : > { %p5810_p10 = scmp.lt.u32.totalorder %s5808_s19, %s5804_s16  ;;  %p5812_p12 = scmp.lt.u32.totalorder %s5804_s16, %s8283_s26 }
 0x63d   : > { %p5806_p7 = pnand %p5805_p4, %p5976_p5 }
 0x63e   : > { %p5811_p11 = por %p5810_p10, %p5809_p9 }
 0x63f   : > { %p5807_p8 = pneg %p5806_p7 }
 0x640   : > { %p5813_p13 = por %p5812_p12, %p5811_p11 }
 0x642   : > { %p5814_p0 = pnand %p5813_p13, %p5807_p8 }
 0x644   : > { %5817 = shalt.err (!%p5814_p0)
}
 0x645   : > { %s5901_s10 = smov 128   ;;  %v4844_v4 = vpop.permute.xlu0 %4843  ;;  %s8350_s9 = scalar_lea.hbm %s8407_s5, %s5223_s12 }
 0x646   : > { %5434 = dma.vmem_to_hbm [thread:$0]  (%p5976_p5), %s8285_s13, 4096, %s8283_s26, %s4914_s11, %s5901_s10, %s5901_s10, %s5890_s20  }
 0x647   : > { %5196 = vst.msk [vmem:[%s8109_s28 + $0x80] sm:$0xff] %vm358_vm0, %v4844_v4  ;;  %s4927_s13 = sshll.u32 %s8109_s28, 4  ;;  %s4909_s16 = scalar_lea.sflag [#allocation6], %s7852_s29  ;;  %s8352_s13 = int_to_ptr.vmem [resolvable:$true] %s4927_s13 }
 0x648   : > { %s5818_s17 = scalar_lea.vmem %s8352_s13, 4096  ;;  %s5902_s25 = smov [#allocation5]  }
 0x649   : > { %p5819_p1 = scmp.ne.s32.totalorder %s8352_s13, %s5818_s17  ;;  %s5822_s15 = sshll.u32 %s5902_s25, 4  ;;  %s5823_s15 = int_to_ptr.vmem [resolvable:$false] %s5822_s15 }
 0x64a   : > { %s5824_s12 = scalar_lea.vmem %s5823_s15, 8192  ;;  %p5825_p4 = scmp.lt.s32.totalorder %s8352_s13, %s5823_s15 }
 0x64b   : > { %p5820_p2 = pnand %p5819_p1, %p5976_p5  ;;  %p5826_p7 = scmp.lt.s32.totalorder %s5824_s12, %s5818_s17 }
 0x64d   : > { %p5821_p3 = pneg %p5820_p2  ;;  %p5827_p8 = por %p5826_p7, %p5825_p4 }
 0x64f   : > { %p5828_p9 = pnand %p5827_p8, %p5821_p3 }
 0x65a   : > { %v4846_v43 = vpop.permute.xlu1 %4845 }
 0x65b   : > { %5197 = vst.msk [vmem:[%s8109_s28 + $0x88] sm:$0xff] %vm358_vm0, %v4846_v43 }
 0x65c   : > { %v4848_v17 = vpop.permute.xlu0 %4847 }
 0x65d   : > { %5198 = vst.msk [vmem:[%s8109_s28 + $0x90] sm:$0xff] %vm358_vm0, %v4848_v17 }
 0x65e   : > { %v4850_v34 = vpop.permute.xlu1 %4849 }
 0x65f   : > { %5199 = vst.msk [vmem:[%s8109_s28 + $0x98] sm:$0xff] %vm358_vm0, %v4850_v34 }
 0x660   : > { %v4852_v63 = vpop.permute.xlu0 %4851 }
 0x661   : > { %5200 = vst.msk [vmem:[%s8109_s28 + $0xa0] sm:$0xff] %vm358_vm0, %v4852_v63 }
 0x662   : > { %v4854_v40 = vpop.permute.xlu1 %4853 }
 0x663   : > { %5201 = vst.msk [vmem:[%s8109_s28 + $0xa8] sm:$0xff] %vm358_vm0, %v4854_v40 }
 0x664   : > { %v4856_v21 = vpop.permute.xlu0 %4855 }
 0x665   : > { %5202 = vst.msk [vmem:[%s8109_s28 + $0xb0] sm:$0xff] %vm358_vm0, %v4856_v21 }
 0x666   : > { %v4858_v55 = vpop.permute.xlu1 %4857 }
 0x667   : > { %5203 = vst.msk [vmem:[%s8109_s28 + $0xb8] sm:$0xff] %vm358_vm0, %v4858_v55 }
 0x668   : > { %v4860_v47 = vpop.permute.xlu0 %4859 }
 0x669   : > { %5204 = vst.msk [vmem:[%s8109_s28 + $0xc0] sm:$0xff] %vm358_vm0, %v4860_v47 }
 0x66a   : > { %v4862_v42 = vpop.permute.xlu1 %4861 }
 0x66b   : > { %5205 = vst.msk [vmem:[%s8109_s28 + $0xc8] sm:$0xff] %vm358_vm0, %v4862_v42 }
 0x66c   : > { %v4864_v31 = vpop.permute.xlu0 %4863 }
 0x66d   : > { %5206 = vst.msk [vmem:[%s8109_s28 + $0xd0] sm:$0xff] %vm358_vm0, %v4864_v31 }
 0x66e   : > { %v4866_v1 = vpop.permute.xlu1 %4865 }
 0x66f   : > { %5207 = vst.msk [vmem:[%s8109_s28 + $0xd8] sm:$0xff] %vm358_vm0, %v4866_v1 }
 0x670   : > { %v4868_v19 = vpop.permute.xlu0 %4867 }
 0x671   : > { %5208 = vst.msk [vmem:[%s8109_s28 + $0xe0] sm:$0xff] %vm358_vm0, %v4868_v19 }
 0x672   : > { %v4870_v16 = vpop.permute.xlu1 %4869 }
 0x673   : > { %5209 = vst.msk [vmem:[%s8109_s28 + $0xe8] sm:$0xff] %vm358_vm0, %v4870_v16 }
 0x674   : > { %v4872_v0 = vpop.permute.xlu0 %4871 }
 0x675   : > { %5210 = vst.msk [vmem:[%s8109_s28 + $0xf0] sm:$0xff] %vm358_vm0, %v4872_v0 }
 0x676   : > { %v4874_v24 = vpop.permute.xlu1 %4873 }
 0x677   : > { %5211 = vst.msk [vmem:[%s8109_s28 + $0xf8] sm:$0xff] %vm358_vm0, %v4874_v24 }
 0x678   : > { %5831 = shalt.err (!%p5828_p9)
}
 0x679   : > { %s5832_s28 = scalar_lea.hbm %s8350_s9, 4096  ;;  %s5836_s18 = scalar_lea.hbm %s8407_s5, 8192 }
 0x67a   : > { %p5833_p10 = scmp.ne.s32.totalorder %s8350_s9, %s5832_s28  ;;  %p5837_p13 = scmp.lt.u32.totalorder %s8350_s9, %s8407_s5 }
 0x67b   : > { %p5838_p0 = scmp.lt.u32.totalorder %s5836_s18, %s5832_s28  ;;  %p5840_p2 = scmp.lt.u32.totalorder %s5832_s28, %s8350_s9 }
 0x67c   : > { %p5834_p11 = pnand %p5833_p10, %p5976_p5 }
 0x67d   : > { %p5839_p1 = por %p5838_p0, %p5837_p13 }
 0x67e   : > { %p5835_p12 = pneg %p5834_p11 }
 0x67f   : > { %p5841_p3 = por %p5840_p2, %p5839_p1 }
 0x681   : > { %p5842_p4 = pnand %p5841_p3, %p5835_p12 }
 0x683   : > { %5845 = shalt.err (!%p5842_p4)
}
 0x684   : > { %5433 = dma.vmem_to_hbm [thread:$0]  (%p5976_p5), %s8352_s13, 4096, %s8350_s9, %s4909_s16, %s5901_s10, %s5901_s10, %s5890_s20  }
 0x685 PF: > { %p5444_p7 = scmp.ge.s32.totalorder %s5884_s24, 2  ;;  %s4958_s17 = sand.u32 1, %s5872_s21  }
 0x686   : > { %s4959_s25 = scalar_lea.sflag [#allocation6], %s4958_s17 }
 0x687   : > { %p5438_p8 = pnand %p5444_p7, %p5980_p6 }
 0x689   : > { %5863 = dma.done.wait (!%p5438_p8), %s4959_s25, 4096  }
 0x68a   : > { %5865 = vsyncadd (!%p5438_p8), %s4959_s25, 4294963200  ;;  %s4968_s7 = scalar_lea.sflag [#allocation8], %s4958_s17 }
 0x68b   : > { %5867 = dma.done.wait (!%p5438_p8), %s4968_s7, 4096  }
 0x68c   : > { %5869 = vsyncadd (!%p5438_p8), %s4968_s7, 4294963200  ;;  %p20_p5 = scmp.ge.s32.totalorder %s5963_s27, 4   ;;  %s8414_s21 = smov %s5876_s22 }
 0x68d   : > { %s8415_s22 = smov %s5880_s23  ;;  %s8416_s23 = smov %s5974_s30 }
 0x68e   : > { %s8417_s24 = smov %s5963_s27  ;;  %22 = sbr.rel (!%p20_p5) target bundleno = 5 (0x5), region = 105 }
 0x695   :  { %4973 = vsyncpa [#allocation6], 1 }
 0x696   :  { %4975 = vsyncpa [#allocation6 + $0x1], 1 }
 0x697   :  { %4976 = vsyncpa [#allocation8], 1 }
 0x698   :  { %4978 = vsyncpa [#allocation8 + $0x1], 1 }

</bundles_post_ra>
